<compile_context>
chip_gen: v5e
topology: v5e:2x2
jax: 0.10.0
libtpu: 0.0.40
codegen_flags: <defaults>
</compile_context>

<pallas_src>
import functools

import jax
import jax.numpy as jnp
from jax.experimental import pallas as pl
from jax.experimental.pallas import tpu as pltpu


def _round_up(x, m):
    return (x + m - 1) // m * m


def _pick_depth_tile(do, lpad, depth_tile, max_lanes=4096):
    if depth_tile is not None:
        assert do % depth_tile == 0, "depth_tile must divide output depth"
        return depth_tile
    best = 1
    for cand in range(1, do + 1):
        if do % cand == 0 and cand * lpad <= max(lpad, max_lanes):
            best = cand
    return best


def _conv_stats_kernel(xp_ref, w_ref, mask_ref, conv_ref, sum_ref, sq_ref,
                       slab_ref, *, cin, kd, kh, kw, wp, dsz, lpad, kc):
    # xp_ref   : (Dp, Cin, Lin)      bf16 padded sample (H*W flattened on lanes)
    # w_ref    : (Cout, KCp)         bf16 conv weights as one GEMM matrix
    # mask_ref : (1, Lpad)           f32 valid-lane mask for the stats
    # conv_ref : (Cout, dsz*Lpad)    f32 raw conv output for this depth tile
    # sum_ref  : (Cout, 1)           f32 running per-channel sum   (across tiles)
    # sq_ref   : (Cout, 1)           f32 running per-channel sumsq (across tiles)
    # slab_ref : (KCp, Lpad)         bf16 scratch: in-kernel im2col slab
    dt = pl.program_id(1)
    cout = w_ref.shape[0]
    kcp = slab_ref.shape[0]

    @pl.when(dt == 0)
    def _init():
        sum_ref[...] = jnp.zeros_like(sum_ref)
        sq_ref[...] = jnp.zeros_like(sq_ref)

    if kcp > kc:  # zero the K-padding rows once per grid step
        slab_ref[kc:, :] = jnp.zeros((kcp - kc, lpad), slab_ref.dtype)

    w = w_ref[...]
    mask = mask_ref[...]
    d0 = dt * dsz

    s_acc = jnp.zeros((cout, 1), jnp.float32)
    q_acc = jnp.zeros((cout, 1), jnp.float32)

    for dd in range(dsz):                      # output depths in this tile
        # --- in-kernel im2col: 27 shifted lane slices into the slab ---
        for z0 in range(kd):
            row = xp_ref[d0 + dd + z0]         # (Cin, Lin) bf16, dynamic depth
            for z1 in range(kh):
                for z2 in range(kw):
                    tap = (z0 * kh + z1) * kw + z2
                    sft = z1 * wp + z2
                    slab_ref[tap * cin:(tap + 1) * cin, :] = row[:, sft:sft + lpad]

        # --- Conv3d for this depth row: one K=KCp MXU GEMM, f32 accumulate ---
        acc = jnp.dot(w, slab_ref[...], preferred_element_type=jnp.float32)
        conv_ref[:, dd * lpad:(dd + 1) * lpad] = acc

        # --- InstanceNorm statistics over valid lanes only ---
        am = acc * mask
        s_acc = s_acc + jnp.sum(am, axis=1, keepdims=True)
        q_acc = q_acc + jnp.sum(acc * am, axis=1, keepdims=True)

    sum_ref[...] += s_acc
    sq_ref[...] += q_acc


def _norm_lrelu_kernel(conv_ref, sum_ref, sq_ref, g_ref, b_ref, o_ref,
                       *, inv_count, eps, neg_slope):
    # conv_ref : (Cout, dsz*Lpad) f32   sum/sq: (Cout, 1)   g/b: (Cout, 1)
    x = conv_ref[...]
    mean = sum_ref[...] * inv_count
    var = jnp.maximum(sq_ref[...] * inv_count - mean * mean, 0.0)
    scale = g_ref[...] * jax.lax.rsqrt(var + eps)     # gamma folded into scale
    shift = b_ref[...] - mean * scale
    y = x * scale + shift
    o_ref[...] = jnp.where(y >= 0, y, neg_slope * y)


def basic_conv(x, weight, gamma, beta, *, stride=1, padding=0,
               eps=1e-5, neg_slope=0.01, depth_tile=None):
    """x: (N, Cin, D, H, W); weight: (Cout, Cin, KD, KH, KW); returns NCDHW f32."""
    n, cin, d, h, w = x.shape
    cout, cin_w, kd, kh, kw = weight.shape
    assert cin == cin_w, "groups != 1 not supported"
    assert stride == 1, "stride != 1 not supported"  # TODO(synk): strided path

    dp, hp, wp = d + 2 * padding, h + 2 * padding, w + 2 * padding
    do, ho, wo = dp - (kd - 1), hp - (kh - 1), wp - (kw - 1)

    lpad = _round_up(ho * wp, 128)                       # overcomplete lane grid
    shift_max = (kh - 1) * wp + (kw - 1)
    lin = _round_up(lpad + shift_max, 128)               # input lane width
    kc = kd * kh * kw * cin
    kcp = _round_up(kc, 128)                             # padded GEMM depth
    s_count = do * ho * wo                               # instance-norm count

    dsz = _pick_depth_tile(do, lpad, depth_tile)
    dt_n = do // dsz

    # --- glue (layout only): pad, flatten H*W onto lanes, bf16 ---
    xpad = jnp.pad(x, ((0, 0), (0, 0),
                       (padding, padding), (padding, padding), (padding, padding)))
    xflat = xpad.reshape(n, cin, dp, hp * wp).transpose(0, 2, 1, 3)  # (N,Dp,Cin,Hp*Wp)
    xflat = jnp.pad(xflat, ((0, 0), (0, 0), (0, 0), (0, lin - hp * wp)))
    xflat = xflat.astype(jnp.bfloat16)

    # weights (O,I,KD,KH,KW) -> (O, KD,KH,KW,I) -> (O, KC) -> pad K to KCp.
    w_gemm = jnp.transpose(weight, (0, 2, 3, 4, 1)).reshape(cout, kc)
    w_gemm = jnp.pad(w_gemm, ((0, 0), (0, kcp - kc))).astype(jnp.bfloat16)

    lane = jnp.arange(lpad, dtype=jnp.int32)
    valid = ((lane % wp) < wo) & ((lane // wp) < ho)
    mask = valid.astype(jnp.float32).reshape(1, lpad)

    g = gamma.reshape(cout, 1).astype(jnp.float32)
    b = beta.reshape(cout, 1).astype(jnp.float32)

    cparams = pltpu.CompilerParams(
        dimension_semantics=("parallel", "arbitrary"),
        vmem_limit_bytes=48 * 1024 * 1024)   # <= v7x's 64 MiB physical VMEM

    # --- pass 1: conv tiles + per-(n, c) sum / sumsq accumulation ---
    conv_k = functools.partial(_conv_stats_kernel, cin=cin, kd=kd, kh=kh, kw=kw,
                               wp=wp, dsz=dsz, lpad=lpad, kc=kc)
    conv_raw, ssum, ssq = pl.pallas_call(
        conv_k,
        out_shape=(jax.ShapeDtypeStruct((n, cout, do * lpad), jnp.float32),
                   jax.ShapeDtypeStruct((n, cout, 1), jnp.float32),
                   jax.ShapeDtypeStruct((n, cout, 1), jnp.float32)),
        grid_spec=pltpu.PrefetchScalarGridSpec(
            num_scalar_prefetch=0,
            grid=(n, dt_n),
            in_specs=[
                pl.BlockSpec((None, dp, cin, lin), lambda i, t: (i, 0, 0, 0)),
                pl.BlockSpec((cout, kcp), lambda i, t: (0, 0)),
                pl.BlockSpec((1, lpad), lambda i, t: (0, 0)),
            ],
            out_specs=(
                pl.BlockSpec((None, cout, dsz * lpad), lambda i, t: (i, 0, t)),
                pl.BlockSpec((None, cout, 1), lambda i, t: (i, 0, 0)),
                pl.BlockSpec((None, cout, 1), lambda i, t: (i, 0, 0)),
            ),
            scratch_shapes=[pltpu.VMEM((kcp, lpad), jnp.bfloat16)],
        ),
        compiler_params=cparams,
    )(xflat, w_gemm, mask)

    # --- pass 2: normalize + affine + LeakyReLU (fully parallel) ---
    norm_k = functools.partial(_norm_lrelu_kernel, inv_count=1.0 / s_count,
                               eps=eps, neg_slope=neg_slope)
    out = pl.pallas_call(
        norm_k,
        out_shape=jax.ShapeDtypeStruct((n, cout, do * lpad), jnp.float32),
        grid_spec=pltpu.PrefetchScalarGridSpec(
            num_scalar_prefetch=0,
            grid=(n, dt_n),
            in_specs=[
                pl.BlockSpec((None, cout, dsz * lpad), lambda i, t: (i, 0, t)),
                pl.BlockSpec((None, cout, 1), lambda i, t: (i, 0, 0)),
                pl.BlockSpec((None, cout, 1), lambda i, t: (i, 0, 0)),
                pl.BlockSpec((cout, 1), lambda i, t: (0, 0)),
                pl.BlockSpec((cout, 1), lambda i, t: (0, 0)),
            ],
            out_specs=pl.BlockSpec((None, cout, dsz * lpad), lambda i, t: (i, 0, t)),
        ),
        compiler_params=pltpu.CompilerParams(
            dimension_semantics=("parallel", "parallel"),
            vmem_limit_bytes=48 * 1024 * 1024),
    )(conv_raw, ssum, ssq, g, b)

    # slice the valid (ho, wo) window out of the overcomplete lane grid
    out = out.reshape(n, cout, do, lpad)[:, :, :, :ho * wp]
    out = out.reshape(n, cout, do, ho, wp)[:, :, :, :, :wo]
    return out


def _reference(x, weight, gamma, beta, stride, padding, eps, neg_slope):
    # bf16 conv operands + f32 accumulation, matching the kernel's MXU path.
    y = jax.lax.conv_general_dilated(
        x.astype(jnp.bfloat16), weight.astype(jnp.bfloat16),
        window_strides=(stride,) * 3,
        padding=[(padding, padding)] * 3,
        dimension_numbers=("NCDHW", "OIDHW", "NCDHW"),
        preferred_element_type=jnp.float32)
    mean = y.mean(axis=(2, 3, 4), keepdims=True)
    var = ((y - mean) ** 2).mean(axis=(2, 3, 4), keepdims=True)
    yhat = (y - mean) * jax.lax.rsqrt(var + eps)
    yhat = (yhat * gamma[None, :, None, None, None]
            + beta[None, :, None, None, None])
    return jnp.where(yhat >= 0, yhat, neg_slope * yhat)


if __name__ == "__main__":
    key = jax.random.PRNGKey(0)
    k1, k2, k3, k4 = jax.random.split(key, 4)

    # BasicConv(in_planes=4, out_planes=8, kernel_size=3, stride=1, padding=1)
    N, Cin, Cout, D, H, W, K = 2, 4, 8, 8, 8, 8, 3
    x = jax.random.normal(k1, (N, Cin, D, H, W), jnp.float32)
    weight = 0.1 * jax.random.normal(k2, (Cout, Cin, K, K, K), jnp.float32)
    gamma = 1.0 + 0.1 * jax.random.normal(k3, (Cout,), jnp.float32)
    beta = 0.1 * jax.random.normal(k4, (Cout,), jnp.float32)

    ref = _reference(x, weight, gamma, beta, 1, 1, 1e-5, 0.01)
    assert ref.shape == (N, Cout, D, H, W)

    # Default depth tiling (single depth tile for this small volume).
    out = jax.block_until_ready(
        basic_conv(x, weight, gamma, beta, stride=1, padding=1))
    assert out.shape == ref.shape
    err = float(jnp.max(jnp.abs(out - ref)))
    assert jnp.allclose(out, ref, rtol=1e-3, atol=1e-3), f"max abs err {err}"

    # Forced depth tiling: exercises the tiled, accumulated two-pass InstanceNorm.
    out_t = jax.block_until_ready(
        basic_conv(x, weight, gamma, beta, stride=1, padding=1, depth_tile=4))
    err_t = float(jnp.max(jnp.abs(out_t - ref)))
    assert jnp.allclose(out_t, ref, rtol=1e-3, atol=1e-3), f"max abs err {err_t}"

    print("KERNEL_OK")
</pallas_src>

<mosaic_0001>
module attributes {stable_mosaic.version = 11 : i64} {
  func.func @_conv_stats_kernel(%arg0: i32, %arg1: i32, %arg2: memref<1x10x4x256xbf16, #tpu.memory_space<vmem>>, %arg3: memref<8x128xbf16, #tpu.memory_space<vmem>>, %arg4: memref<1x128xf32, #tpu.memory_space<vmem>>, %arg5: memref<1x8x1024xf32, #tpu.memory_space<vmem>>, %arg6: memref<1x8x1xf32, #tpu.memory_space<vmem>>, %arg7: memref<1x8x1xf32, #tpu.memory_space<vmem>>, %arg8: memref<128x128xbf16, #tpu.memory_space<vmem>>) attributes {dimension_semantics = [#tpu.dimension_semantics<parallel>, #tpu.dimension_semantics<arbitrary>], iteration_bounds = array<i64: 2, 1>, scalar_prefetch = 0 : i64, scratch_operands = 1 : i64, tpu.core_type = #tpu.core_type<tc>, window_params = [{transform_indices = @transform_0, window_bounds = array<i64: 1, 10, 4, 256>}, {pipeline_mode = #tpu.pipeline_mode<synchronous>, transform_indices = @transform_1, window_bounds = array<i64: 8, 128>}, {pipeline_mode = #tpu.pipeline_mode<synchronous>, transform_indices = @transform_2, window_bounds = array<i64: 1, 128>}, {transform_indices = @transform_3, window_bounds = array<i64: 1, 8, 1024>}, {transform_indices = @transform_4, window_bounds = array<i64: 1, 8, 1>}, {transform_indices = @transform_5, window_bounds = array<i64: 1, 8, 1>}]} {
    %c0_i32 = arith.constant 0 : i32
    %0 = arith.cmpi eq, %arg1, %c0_i32 : i32
    %1 = arith.extui %0 : i1 to i32
    %c0_i32_0 = arith.constant 0 : i32
    %2 = arith.cmpi ne, %1, %c0_i32_0 : i32
    scf.if %2 {
      %cst_595 = arith.constant 0.000000e+00 : f32
      %686 = vector.broadcast %cst_595 : f32 to vector<8x1xf32>
      %c0_596 = arith.constant 0 : index
      %c0_597 = arith.constant 0 : index
      %c0_598 = arith.constant 0 : index
      %687 = vector.load %arg6[%c0_596, %c0_597, %c0_598] : memref<1x8x1xf32, #tpu.memory_space<vmem>>, vector<1x8x1xf32>
      %688 = vector.shape_cast %687 : vector<1x8x1xf32> to vector<8x1xf32>
      %689 = vector.shape_cast %686 : vector<8x1xf32> to vector<1x8x1xf32>
      tpu.vector_store %arg6[%c0_596, %c0_597, %c0_598], %689 {strides = array<i32>} : memref<1x8x1xf32, #tpu.memory_space<vmem>>, vector<1x8x1xf32>,
      %cst_599 = arith.constant 0.000000e+00 : f32
      %690 = vector.broadcast %cst_599 : f32 to vector<8x1xf32>
      %c0_600 = arith.constant 0 : index
      %c0_601 = arith.constant 0 : index
      %c0_602 = arith.constant 0 : index
      %691 = vector.load %arg7[%c0_600, %c0_601, %c0_602] : memref<1x8x1xf32, #tpu.memory_space<vmem>>, vector<1x8x1xf32>
      %692 = vector.shape_cast %691 : vector<1x8x1xf32> to vector<8x1xf32>
      %693 = vector.shape_cast %690 : vector<8x1xf32> to vector<1x8x1xf32>
      tpu.vector_store %arg7[%c0_600, %c0_601, %c0_602], %693 {strides = array<i32>} : memref<1x8x1xf32, #tpu.memory_space<vmem>>, vector<1x8x1xf32>,
    } else {
    }
    %cst = arith.constant 0.000000e+00 : bf16
    %3 = vector.broadcast %cst : bf16 to vector<20x128xbf16>
    %c108 = arith.constant 108 : index
    %c0 = arith.constant 0 : index
    %4 = vector.load %arg8[%c108, %c0] : memref<128x128xbf16, #tpu.memory_space<vmem>>, vector<20x128xbf16>
    tpu.vector_store %arg8[%c108, %c0], %3 {strides = array<i32>} : memref<128x128xbf16, #tpu.memory_space<vmem>>, vector<20x128xbf16>,
    %c0_1 = arith.constant 0 : index
    %c0_2 = arith.constant 0 : index
    %5 = vector.load %arg3[%c0_1, %c0_2] : memref<8x128xbf16, #tpu.memory_space<vmem>>, vector<8x128xbf16>
    %c0_3 = arith.constant 0 : index
    %c0_4 = arith.constant 0 : index
    %6 = vector.load %arg4[%c0_3, %c0_4] : memref<1x128xf32, #tpu.memory_space<vmem>>, vector<1x128xf32>
    %c8_i32 = arith.constant 8 : i32
    %7 = arith.muli %arg1, %c8_i32 : i32
    %cst_5 = arith.constant 0.000000e+00 : f32
    %8 = vector.broadcast %cst_5 : f32 to vector<8x1xf32>
    %cst_6 = arith.constant 0.000000e+00 : f32
    %9 = vector.broadcast %cst_6 : f32 to vector<8x1xf32>
    %c0_i32_7 = arith.constant 0 : i32
    %10 = arith.addi %7, %c0_i32_7 : i32
    %c0_i32_8 = arith.constant 0 : i32
    %11 = arith.addi %10, %c0_i32_8 : i32
    %c0_9 = arith.constant 0 : index
    %12 = arith.index_cast %11 : i32 to index
    %c0_10 = arith.constant 0 : index
    %c0_11 = arith.constant 0 : index
    %13 = vector.load %arg2[%c0_9, %12, %c0_10, %c0_11] : memref<1x10x4x256xbf16, #tpu.memory_space<vmem>>, vector<1x1x4x256xbf16>
    %14 = vector.shape_cast %13 : vector<1x1x4x256xbf16> to vector<4x256xbf16>
    %15 = vector.extract_strided_slice %14 {offsets = [0, 0], sizes = [4, 128], strides = [1, 1]} : vector<4x256xbf16> to vector<4x128xbf16>
    %c0_12 = arith.constant 0 : index
    %c0_13 = arith.constant 0 : index
    %16 = vector.load %arg8[%c0_12, %c0_13] : memref<128x128xbf16, #tpu.memory_space<vmem>>, vector<4x128xbf16>
    tpu.vector_store %arg8[%c0_12, %c0_13], %15 {strides = array<i32>} : memref<128x128xbf16, #tpu.memory_space<vmem>>, vector<4x128xbf16>,
    %17 = vector.extract_strided_slice %14 {offsets = [0, 1], sizes = [4, 128], strides = [1, 1]} : vector<4x256xbf16> to vector<4x128xbf16>
    %c4 = arith.constant 4 : index
    %c0_14 = arith.constant 0 : index
    %18 = vector.load %arg8[%c4, %c0_14] : memref<128x128xbf16, #tpu.memory_space<vmem>>, vector<4x128xbf16>
    tpu.vector_store %arg8[%c4, %c0_14], %17 {strides = array<i32>} : memref<128x128xbf16, #tpu.memory_space<vmem>>, vector<4x128xbf16>,
    %19 = vector.extract_strided_slice %14 {offsets = [0, 2], sizes = [4, 128], strides = [1, 1]} : vector<4x256xbf16> to vector<4x128xbf16>
    %c8 = arith.constant 8 : index
    %c0_15 = arith.constant 0 : index
    %20 = vector.load %arg8[%c8, %c0_15] : memref<128x128xbf16, #tpu.memory_space<vmem>>, vector<4x128xbf16>
    tpu.vector_store %arg8[%c8, %c0_15], %19 {strides = array<i32>} : memref<128x128xbf16, #tpu.memory_space<vmem>>, vector<4x128xbf16>,
    %21 = vector.extract_strided_slice %14 {offsets = [0, 10], sizes = [4, 128], strides = [1, 1]} : vector<4x256xbf16> to vector<4x128xbf16>
    %c12 = arith.constant 12 : index
    %c0_16 = arith.constant 0 : index
    %22 = vector.load %arg8[%c12, %c0_16] : memref<128x128xbf16, #tpu.memory_space<vmem>>, vector<4x128xbf16>
    tpu.vector_store %arg8[%c12, %c0_16], %21 {strides = array<i32>} : memref<128x128xbf16, #tpu.memory_space<vmem>>, vector<4x128xbf16>,
    %23 = vector.extract_strided_slice %14 {offsets = [0, 11], sizes = [4, 128], strides = [1, 1]} : vector<4x256xbf16> to vector<4x128xbf16>
    %c16 = arith.constant 16 : index
    %c0_17 = arith.constant 0 : index
    %24 = vector.load %arg8[%c16, %c0_17] : memref<128x128xbf16, #tpu.memory_space<vmem>>, vector<4x128xbf16>
    tpu.vector_store %arg8[%c16, %c0_17], %23 {strides = array<i32>} : memref<128x128xbf16, #tpu.memory_space<vmem>>, vector<4x128xbf16>,
    %25 = vector.extract_strided_slice %14 {offsets = [0, 12], sizes = [4, 128], strides = [1, 1]} : vector<4x256xbf16> to vector<4x128xbf16>
    %c20 = arith.constant 20 : index
    %c0_18 = arith.constant 0 : index
    %26 = vector.load %arg8[%c20, %c0_18] : memref<128x128xbf16, #tpu.memory_space<vmem>>, vector<4x128xbf16>
    tpu.vector_store %arg8[%c20, %c0_18], %25 {strides = array<i32>} : memref<128x128xbf16, #tpu.memory_space<vmem>>, vector<4x128xbf16>,
    %27 = vector.extract_strided_slice %14 {offsets = [0, 20], sizes = [4, 128], strides = [1, 1]} : vector<4x256xbf16> to vector<4x128xbf16>
    %c24 = arith.constant 24 : index
    %c0_19 = arith.constant 0 : index
    %28 = vector.load %arg8[%c24, %c0_19] : memref<128x128xbf16, #tpu.memory_space<vmem>>, vector<4x128xbf16>
    tpu.vector_store %arg8[%c24, %c0_19], %27 {strides = array<i32>} : memref<128x128xbf16, #tpu.memory_space<vmem>>, vector<4x128xbf16>,
    %29 = vector.extract_strided_slice %14 {offsets = [0, 21], sizes = [4, 128], strides = [1, 1]} : vector<4x256xbf16> to vector<4x128xbf16>
    %c28 = arith.constant 28 : index
    %c0_20 = arith.constant 0 : index
    %30 = vector.load %arg8[%c28, %c0_20] : memref<128x128xbf16, #tpu.memory_space<vmem>>, vector<4x128xbf16>
    tpu.vector_store %arg8[%c28, %c0_20], %29 {strides = array<i32>} : memref<128x128xbf16, #tpu.memory_space<vmem>>, vector<4x128xbf16>,
    %31 = vector.extract_strided_slice %14 {offsets = [0, 22], sizes = [4, 128], strides = [1, 1]} : vector<4x256xbf16> to vector<4x128xbf16>
    %c32 = arith.constant 32 : index
    %c0_21 = arith.constant 0 : index
    %32 = vector.load %arg8[%c32, %c0_21] : memref<128x128xbf16, #tpu.memory_space<vmem>>, vector<4x128xbf16>
    tpu.vector_store %arg8[%c32, %c0_21], %31 {strides = array<i32>} : memref<128x128xbf16, #tpu.memory_space<vmem>>, vector<4x128xbf16>,
    %c0_i32_22 = arith.constant 0 : i32
    %33 = arith.addi %7, %c0_i32_22 : i32
    %c1_i32 = arith.constant 1 : i32
    %34 = arith.addi %33, %c1_i32 : i32
    %c0_23 = arith.constant 0 : index
    %35 = arith.index_cast %34 : i32 to index
    %c0_24 = arith.constant 0 : index
    %c0_25 = arith.constant 0 : index
    %36 = vector.load %arg2[%c0_23, %35, %c0_24, %c0_25] : memref<1x10x4x256xbf16, #tpu.memory_space<vmem>>, vector<1x1x4x256xbf16>
    %37 = vector.shape_cast %36 : vector<1x1x4x256xbf16> to vector<4x256xbf16>
    %38 = vector.extract_strided_slice %37 {offsets = [0, 0], sizes = [4, 128], strides = [1, 1]} : vector<4x256xbf16> to vector<4x128xbf16>
    %c36 = arith.constant 36 : index
    %c0_26 = arith.constant 0 : index
    %39 = vector.load %arg8[%c36, %c0_26] : memref<128x128xbf16, #tpu.memory_space<vmem>>, vector<4x128xbf16>
    tpu.vector_store %arg8[%c36, %c0_26], %38 {strides = array<i32>} : memref<128x128xbf16, #tpu.memory_space<vmem>>, vector<4x128xbf16>,
    %40 = vector.extract_strided_slice %37 {offsets = [0, 1], sizes = [4, 128], strides = [1, 1]} : vector<4x256xbf16> to vector<4x128xbf16>
    %c40 = arith.constant 40 : index
    %c0_27 = arith.constant 0 : index
    %41 = vector.load %arg8[%c40, %c0_27] : memref<128x128xbf16, #tpu.memory_space<vmem>>, vector<4x128xbf16>
    tpu.vector_store %arg8[%c40, %c0_27], %40 {strides = array<i32>} : memref<128x128xbf16, #tpu.memory_space<vmem>>, vector<4x128xbf16>,
    %42 = vector.extract_strided_slice %37 {offsets = [0, 2], sizes = [4, 128], strides = [1, 1]} : vector<4x256xbf16> to vector<4x128xbf16>
    %c44 = arith.constant 44 : index
    %c0_28 = arith.constant 0 : index
    %43 = vector.load %arg8[%c44, %c0_28] : memref<128x128xbf16, #tpu.memory_space<vmem>>, vector<4x128xbf16>
    tpu.vector_store %arg8[%c44, %c0_28], %42 {strides = array<i32>} : memref<128x128xbf16, #tpu.memory_space<vmem>>, vector<4x128xbf16>,
    %44 = vector.extract_strided_slice %37 {offsets = [0, 10], sizes = [4, 128], strides = [1, 1]} : vector<4x256xbf16> to vector<4x128xbf16>
    %c48 = arith.constant 48 : index
    %c0_29 = arith.constant 0 : index
    %45 = vector.load %arg8[%c48, %c0_29] : memref<128x128xbf16, #tpu.memory_space<vmem>>, vector<4x128xbf16>
    tpu.vector_store %arg8[%c48, %c0_29], %44 {strides = array<i32>} : memref<128x128xbf16, #tpu.memory_space<vmem>>, vector<4x128xbf16>,
    %46 = vector.extract_strided_slice %37 {offsets = [0, 11], sizes = [4, 128], strides = [1, 1]} : vector<4x256xbf16> to vector<4x128xbf16>
    %c52 = arith.constant 52 : index
    %c0_30 = arith.constant 0 : index
    %47 = vector.load %arg8[%c52, %c0_30] : memref<128x128xbf16, #tpu.memory_space<vmem>>, vector<4x128xbf16>
    tpu.vector_store %arg8[%c52, %c0_30], %46 {strides = array<i32>} : memref<128x128xbf16, #tpu.memory_space<vmem>>, vector<4x128xbf16>,
    %48 = vector.extract_strided_slice %37 {offsets = [0, 12], sizes = [4, 128], strides = [1, 1]} : vector<4x256xbf16> to vector<4x128xbf16>
    %c56 = arith.constant 56 : index
    %c0_31 = arith.constant 0 : index
    %49 = vector.load %arg8[%c56, %c0_31] : memref<128x128xbf16, #tpu.memory_space<vmem>>, vector<4x128xbf16>
    tpu.vector_store %arg8[%c56, %c0_31], %48 {strides = array<i32>} : memref<128x128xbf16, #tpu.memory_space<vmem>>, vector<4x128xbf16>,
    %50 = vector.extract_strided_slice %37 {offsets = [0, 20], sizes = [4, 128], strides = [1, 1]} : vector<4x256xbf16> to vector<4x128xbf16>
    %c60 = arith.constant 60 : index
    %c0_32 = arith.constant 0 : index
    %51 = vector.load %arg8[%c60, %c0_32] : memref<128x128xbf16, #tpu.memory_space<vmem>>, vector<4x128xbf16>
    tpu.vector_store %arg8[%c60, %c0_32], %50 {strides = array<i32>} : memref<128x128xbf16, #tpu.memory_space<vmem>>, vector<4x128xbf16>,
    %52 = vector.extract_strided_slice %37 {offsets = [0, 21], sizes = [4, 128], strides = [1, 1]} : vector<4x256xbf16> to vector<4x128xbf16>
    %c64 = arith.constant 64 : index
    %c0_33 = arith.constant 0 : index
    %53 = vector.load %arg8[%c64, %c0_33] : memref<128x128xbf16, #tpu.memory_space<vmem>>, vector<4x128xbf16>
    tpu.vector_store %arg8[%c64, %c0_33], %52 {strides = array<i32>} : memref<128x128xbf16, #tpu.memory_space<vmem>>, vector<4x128xbf16>,
    %54 = vector.extract_strided_slice %37 {offsets = [0, 22], sizes = [4, 128], strides = [1, 1]} : vector<4x256xbf16> to vector<4x128xbf16>
    %c68 = arith.constant 68 : index
    %c0_34 = arith.constant 0 : index
    %55 = vector.load %arg8[%c68, %c0_34] : memref<128x128xbf16, #tpu.memory_space<vmem>>, vector<4x128xbf16>
    tpu.vector_store %arg8[%c68, %c0_34], %54 {strides = array<i32>} : memref<128x128xbf16, #tpu.memory_space<vmem>>, vector<4x128xbf16>,
    %c0_i32_35 = arith.constant 0 : i32
    %56 = arith.addi %7, %c0_i32_35 : i32
    %c2_i32 = arith.constant 2 : i32
    %57 = arith.addi %56, %c2_i32 : i32
    %c0_36 = arith.constant 0 : index
    %58 = arith.index_cast %57 : i32 to index
    %c0_37 = arith.constant 0 : index
    %c0_38 = arith.constant 0 : index
    %59 = vector.load %arg2[%c0_36, %58, %c0_37, %c0_38] : memref<1x10x4x256xbf16, #tpu.memory_space<vmem>>, vector<1x1x4x256xbf16>
    %60 = vector.shape_cast %59 : vector<1x1x4x256xbf16> to vector<4x256xbf16>
    %61 = vector.extract_strided_slice %60 {offsets = [0, 0], sizes = [4, 128], strides = [1, 1]} : vector<4x256xbf16> to vector<4x128xbf16>
    %c72 = arith.constant 72 : index
    %c0_39 = arith.constant 0 : index
    %62 = vector.load %arg8[%c72, %c0_39] : memref<128x128xbf16, #tpu.memory_space<vmem>>, vector<4x128xbf16>
    tpu.vector_store %arg8[%c72, %c0_39], %61 {strides = array<i32>} : memref<128x128xbf16, #tpu.memory_space<vmem>>, vector<4x128xbf16>,
    %63 = vector.extract_strided_slice %60 {offsets = [0, 1], sizes = [4, 128], strides = [1, 1]} : vector<4x256xbf16> to vector<4x128xbf16>
    %c76 = arith.constant 76 : index
    %c0_40 = arith.constant 0 : index
    %64 = vector.load %arg8[%c76, %c0_40] : memref<128x128xbf16, #tpu.memory_space<vmem>>, vector<4x128xbf16>
    tpu.vector_store %arg8[%c76, %c0_40], %63 {strides = array<i32>} : memref<128x128xbf16, #tpu.memory_space<vmem>>, vector<4x128xbf16>,
    %65 = vector.extract_strided_slice %60 {offsets = [0, 2], sizes = [4, 128], strides = [1, 1]} : vector<4x256xbf16> to vector<4x128xbf16>
    %c80 = arith.constant 80 : index
    %c0_41 = arith.constant 0 : index
    %66 = vector.load %arg8[%c80, %c0_41] : memref<128x128xbf16, #tpu.memory_space<vmem>>, vector<4x128xbf16>
    tpu.vector_store %arg8[%c80, %c0_41], %65 {strides = array<i32>} : memref<128x128xbf16, #tpu.memory_space<vmem>>, vector<4x128xbf16>,
    %67 = vector.extract_strided_slice %60 {offsets = [0, 10], sizes = [4, 128], strides = [1, 1]} : vector<4x256xbf16> to vector<4x128xbf16>
    %c84 = arith.constant 84 : index
    %c0_42 = arith.constant 0 : index
    %68 = vector.load %arg8[%c84, %c0_42] : memref<128x128xbf16, #tpu.memory_space<vmem>>, vector<4x128xbf16>
    tpu.vector_store %arg8[%c84, %c0_42], %67 {strides = array<i32>} : memref<128x128xbf16, #tpu.memory_space<vmem>>, vector<4x128xbf16>,
    %69 = vector.extract_strided_slice %60 {offsets = [0, 11], sizes = [4, 128], strides = [1, 1]} : vector<4x256xbf16> to vector<4x128xbf16>
    %c88 = arith.constant 88 : index
    %c0_43 = arith.constant 0 : index
    %70 = vector.load %arg8[%c88, %c0_43] : memref<128x128xbf16, #tpu.memory_space<vmem>>, vector<4x128xbf16>
    tpu.vector_store %arg8[%c88, %c0_43], %69 {strides = array<i32>} : memref<128x128xbf16, #tpu.memory_space<vmem>>, vector<4x128xbf16>,
    %71 = vector.extract_strided_slice %60 {offsets = [0, 12], sizes = [4, 128], strides = [1, 1]} : vector<4x256xbf16> to vector<4x128xbf16>
    %c92 = arith.constant 92 : index
    %c0_44 = arith.constant 0 : index
    %72 = vector.load %arg8[%c92, %c0_44] : memref<128x128xbf16, #tpu.memory_space<vmem>>, vector<4x128xbf16>
    tpu.vector_store %arg8[%c92, %c0_44], %71 {strides = array<i32>} : memref<128x128xbf16, #tpu.memory_space<vmem>>, vector<4x128xbf16>,
    %73 = vector.extract_strided_slice %60 {offsets = [0, 20], sizes = [4, 128], strides = [1, 1]} : vector<4x256xbf16> to vector<4x128xbf16>
    %c96 = arith.constant 96 : index
    %c0_45 = arith.constant 0 : index
    %74 = vector.load %arg8[%c96, %c0_45] : memref<128x128xbf16, #tpu.memory_space<vmem>>, vector<4x128xbf16>
    tpu.vector_store %arg8[%c96, %c0_45], %73 {strides = array<i32>} : memref<128x128xbf16, #tpu.memory_space<vmem>>, vector<4x128xbf16>,
    %75 = vector.extract_strided_slice %60 {offsets = [0, 21], sizes = [4, 128], strides = [1, 1]} : vector<4x256xbf16> to vector<4x128xbf16>
    %c100 = arith.constant 100 : index
    %c0_46 = arith.constant 0 : index
    %76 = vector.load %arg8[%c100, %c0_46] : memref<128x128xbf16, #tpu.memory_space<vmem>>, vector<4x128xbf16>
    tpu.vector_store %arg8[%c100, %c0_46], %75 {strides = array<i32>} : memref<128x128xbf16, #tpu.memory_space<vmem>>, vector<4x128xbf16>,
    %77 = vector.extract_strided_slice %60 {offsets = [0, 22], sizes = [4, 128], strides = [1, 1]} : vector<4x256xbf16> to vector<4x128xbf16>
    %c104 = arith.constant 104 : index
    %c0_47 = arith.constant 0 : index
    %78 = vector.load %arg8[%c104, %c0_47] : memref<128x128xbf16, #tpu.memory_space<vmem>>, vector<4x128xbf16>
    tpu.vector_store %arg8[%c104, %c0_47], %77 {strides = array<i32>} : memref<128x128xbf16, #tpu.memory_space<vmem>>, vector<4x128xbf16>,
    %c0_48 = arith.constant 0 : index
    %c0_49 = arith.constant 0 : index
    %79 = vector.load %arg8[%c0_48, %c0_49] : memref<128x128xbf16, #tpu.memory_space<vmem>>, vector<128x128xbf16>
    %cst_50 = arith.constant dense<0.000000e+00> : vector<8x128xf32>
    %80 = tpu.matmul %5, %79, %cst_50 {dimension_numbers = #tpu.dot_dimension_numbers<[1], [0], [0], [1], [0, 0, 1, 1], [], []>} : vector<8x128xbf16>, vector<128x128xbf16>, vector<8x128xf32> -> vector<8x128xf32>
    %c0_51 = arith.constant 0 : index
    %c0_52 = arith.constant 0 : index
    %c0_53 = arith.constant 0 : index
    %81 = vector.load %arg5[%c0_51, %c0_52, %c0_53] : memref<1x8x1024xf32, #tpu.memory_space<vmem>>, vector<1x8x128xf32>
    %82 = vector.shape_cast %81 : vector<1x8x128xf32> to vector<8x128xf32>
    %83 = vector.shape_cast %80 : vector<8x128xf32> to vector<1x8x128xf32>
    tpu.vector_store %arg5[%c0_51, %c0_52, %c0_53], %83 {strides = array<i32>} : memref<1x8x1024xf32, #tpu.memory_space<vmem>>, vector<1x8x128xf32>,
    %84 = vector.broadcast %6 : vector<1x128xf32> to vector<8x128xf32>
    %85 = arith.mulf %80, %84 : vector<8x128xf32>
    %cst_54 = arith.constant dense<0.000000e+00> : vector<8xf32>
    %86 = vector.multi_reduction <add>, %85, %cst_54 [1] : vector<8x128xf32> to vector<8xf32>
    %87 = vector.shape_cast %86 : vector<8xf32> to vector<8x1xf32>
    %88 = arith.addf %8, %87 : vector<8x1xf32>
    %89 = arith.mulf %80, %85 : vector<8x128xf32>
    %cst_55 = arith.constant dense<0.000000e+00> : vector<8xf32>
    %90 = vector.multi_reduction <add>, %89, %cst_55 [1] : vector<8x128xf32> to vector<8xf32>
    %91 = vector.shape_cast %90 : vector<8xf32> to vector<8x1xf32>
    %92 = arith.addf %9, %91 : vector<8x1xf32>
    %c1_i32_56 = arith.constant 1 : i32
    %93 = arith.addi %7, %c1_i32_56 : i32
    %c0_i32_57 = arith.constant 0 : i32
    %94 = arith.addi %93, %c0_i32_57 : i32
    %c0_58 = arith.constant 0 : index
    %95 = arith.index_cast %94 : i32 to index
    %c0_59 = arith.constant 0 : index
    %c0_60 = arith.constant 0 : index
    %96 = vector.load %arg2[%c0_58, %95, %c0_59, %c0_60] : memref<1x10x4x256xbf16, #tpu.memory_space<vmem>>, vector<1x1x4x256xbf16>
    %97 = vector.shape_cast %96 : vector<1x1x4x256xbf16> to vector<4x256xbf16>
    %98 = vector.extract_strided_slice %97 {offsets = [0, 0], sizes = [4, 128], strides = [1, 1]} : vector<4x256xbf16> to vector<4x128xbf16>
    %c0_61 = arith.constant 0 : index
    %c0_62 = arith.constant 0 : index
    %99 = vector.load %arg8[%c0_61, %c0_62] : memref<128x128xbf16, #tpu.memory_space<vmem>>, vector<4x128xbf16>
    tpu.vector_store %arg8[%c0_61, %c0_62], %98 {strides = array<i32>} : memref<128x128xbf16, #tpu.memory_space<vmem>>, vector<4x128xbf16>,
    %100 = vector.extract_strided_slice %97 {offsets = [0, 1], sizes = [4, 128], strides = [1, 1]} : vector<4x256xbf16> to vector<4x128xbf16>
    %c4_63 = arith.constant 4 : index
    %c0_64 = arith.constant 0 : index
    %101 = vector.load %arg8[%c4_63, %c0_64] : memref<128x128xbf16, #tpu.memory_space<vmem>>, vector<4x128xbf16>
    tpu.vector_store %arg8[%c4_63, %c0_64], %100 {strides = array<i32>} : memref<128x128xbf16, #tpu.memory_space<vmem>>, vector<4x128xbf16>,
    %102 = vector.extract_strided_slice %97 {offsets = [0, 2], sizes = [4, 128], strides = [1, 1]} : vector<4x256xbf16> to vector<4x128xbf16>
    %c8_65 = arith.constant 8 : index
    %c0_66 = arith.constant 0 : index
    %103 = vector.load %arg8[%c8_65, %c0_66] : memref<128x128xbf16, #tpu.memory_space<vmem>>, vector<4x128xbf16>
    tpu.vector_store %arg8[%c8_65, %c0_66], %102 {strides = array<i32>} : memref<128x128xbf16, #tpu.memory_space<vmem>>, vector<4x128xbf16>,
    %104 = vector.extract_strided_slice %97 {offsets = [0, 10], sizes = [4, 128], strides = [1, 1]} : vector<4x256xbf16> to vector<4x128xbf16>
    %c12_67 = arith.constant 12 : index
    %c0_68 = arith.constant 0 : index
    %105 = vector.load %arg8[%c12_67, %c0_68] : memref<128x128xbf16, #tpu.memory_space<vmem>>, vector<4x128xbf16>
    tpu.vector_store %arg8[%c12_67, %c0_68], %104 {strides = array<i32>} : memref<128x128xbf16, #tpu.memory_space<vmem>>, vector<4x128xbf16>,
    %106 = vector.extract_strided_slice %97 {offsets = [0, 11], sizes = [4, 128], strides = [1, 1]} : vector<4x256xbf16> to vector<4x128xbf16>
    %c16_69 = arith.constant 16 : index
    %c0_70 = arith.constant 0 : index
    %107 = vector.load %arg8[%c16_69, %c0_70] : memref<128x128xbf16, #tpu.memory_space<vmem>>, vector<4x128xbf16>
    tpu.vector_store %arg8[%c16_69, %c0_70], %106 {strides = array<i32>} : memref<128x128xbf16, #tpu.memory_space<vmem>>, vector<4x128xbf16>,
    %108 = vector.extract_strided_slice %97 {offsets = [0, 12], sizes = [4, 128], strides = [1, 1]} : vector<4x256xbf16> to vector<4x128xbf16>
    %c20_71 = arith.constant 20 : index
    %c0_72 = arith.constant 0 : index
    %109 = vector.load %arg8[%c20_71, %c0_72] : memref<128x128xbf16, #tpu.memory_space<vmem>>, vector<4x128xbf16>
    tpu.vector_store %arg8[%c20_71, %c0_72], %108 {strides = array<i32>} : memref<128x128xbf16, #tpu.memory_space<vmem>>, vector<4x128xbf16>,
    %110 = vector.extract_strided_slice %97 {offsets = [0, 20], sizes = [4, 128], strides = [1, 1]} : vector<4x256xbf16> to vector<4x128xbf16>
    %c24_73 = arith.constant 24 : index
    %c0_74 = arith.constant 0 : index
    %111 = vector.load %arg8[%c24_73, %c0_74] : memref<128x128xbf16, #tpu.memory_space<vmem>>, vector<4x128xbf16>
    tpu.vector_store %arg8[%c24_73, %c0_74], %110 {strides = array<i32>} : memref<128x128xbf16, #tpu.memory_space<vmem>>, vector<4x128xbf16>,
    %112 = vector.extract_strided_slice %97 {offsets = [0, 21], sizes = [4, 128], strides = [1, 1]} : vector<4x256xbf16> to vector<4x128xbf16>
    %c28_75 = arith.constant 28 : index
    %c0_76 = arith.constant 0 : index
    %113 = vector.load %arg8[%c28_75, %c0_76] : memref<128x128xbf16, #tpu.memory_space<vmem>>, vector<4x128xbf16>
    tpu.vector_store %arg8[%c28_75, %c0_76], %112 {strides = array<i32>} : memref<128x128xbf16, #tpu.memory_space<vmem>>, vector<4x128xbf16>,
    %114 = vector.extract_strided_slice %97 {offsets = [0, 22], sizes = [4, 128], strides = [1, 1]} : vector<4x256xbf16> to vector<4x128xbf16>
    %c32_77 = arith.constant 32 : index
    %c0_78 = arith.constant 0 : index
    %115 = vector.load %arg8[%c32_77, %c0_78] : memref<128x128xbf16, #tpu.memory_space<vmem>>, vector<4x128xbf16>
    tpu.vector_store %arg8[%c32_77, %c0_78], %114 {strides = array<i32>} : memref<128x128xbf16, #tpu.memory_space<vmem>>, vector<4x128xbf16>,
    %c1_i32_79 = arith.constant 1 : i32
    %116 = arith.addi %7, %c1_i32_79 : i32
    %c1_i32_80 = arith.constant 1 : i32
    %117 = arith.addi %116, %c1_i32_80 : i32
    %c0_81 = arith.constant 0 : index
    %118 = arith.index_cast %117 : i32 to index
    %c0_82 = arith.constant 0 : index
    %c0_83 = arith.constant 0 : index
    %119 = vector.load %arg2[%c0_81, %118, %c0_82, %c0_83] : memref<1x10x4x256xbf16, #tpu.memory_space<vmem>>, vector<1x1x4x256xbf16>
    %120 = vector.shape_cast %119 : vector<1x1x4x256xbf16> to vector<4x256xbf16>
    %121 = vector.extract_strided_slice %120 {offsets = [0, 0], sizes = [4, 128], strides = [1, 1]} : vector<4x256xbf16> to vector<4x128xbf16>
    %c36_84 = arith.constant 36 : index
    %c0_85 = arith.constant 0 : index
    %122 = vector.load %arg8[%c36_84, %c0_85] : memref<128x128xbf16, #tpu.memory_space<vmem>>, vector<4x128xbf16>
    tpu.vector_store %arg8[%c36_84, %c0_85], %121 {strides = array<i32>} : memref<128x128xbf16, #tpu.memory_space<vmem>>, vector<4x128xbf16>,
    %123 = vector.extract_strided_slice %120 {offsets = [0, 1], sizes = [4, 128], strides = [1, 1]} : vector<4x256xbf16> to vector<4x128xbf16>
    %c40_86 = arith.constant 40 : index
    %c0_87 = arith.constant 0 : index
    %124 = vector.load %arg8[%c40_86, %c0_87] : memref<128x128xbf16, #tpu.memory_space<vmem>>, vector<4x128xbf16>
    tpu.vector_store %arg8[%c40_86, %c0_87], %123 {strides = array<i32>} : memref<128x128xbf16, #tpu.memory_space<vmem>>, vector<4x128xbf16>,
    %125 = vector.extract_strided_slice %120 {offsets = [0, 2], sizes = [4, 128], strides = [1, 1]} : vector<4x256xbf16> to vector<4x128xbf16>
    %c44_88 = arith.constant 44 : index
    %c0_89 = arith.constant 0 : index
    %126 = vector.load %arg8[%c44_88, %c0_89] : memref<128x128xbf16, #tpu.memory_space<vmem>>, vector<4x128xbf16>
    tpu.vector_store %arg8[%c44_88, %c0_89], %125 {strides = array<i32>} : memref<128x128xbf16, #tpu.memory_space<vmem>>, vector<4x128xbf16>,
    %127 = vector.extract_strided_slice %120 {offsets = [0, 10], sizes = [4, 128], strides = [1, 1]} : vector<4x256xbf16> to vector<4x128xbf16>
    %c48_90 = arith.constant 48 : index
    %c0_91 = arith.constant 0 : index
    %128 = vector.load %arg8[%c48_90, %c0_91] : memref<128x128xbf16, #tpu.memory_space<vmem>>, vector<4x128xbf16>
    tpu.vector_store %arg8[%c48_90, %c0_91], %127 {strides = array<i32>} : memref<128x128xbf16, #tpu.memory_space<vmem>>, vector<4x128xbf16>,
    %129 = vector.extract_strided_slice %120 {offsets = [0, 11], sizes = [4, 128], strides = [1, 1]} : vector<4x256xbf16> to vector<4x128xbf16>
    %c52_92 = arith.constant 52 : index
    %c0_93 = arith.constant 0 : index
    %130 = vector.load %arg8[%c52_92, %c0_93] : memref<128x128xbf16, #tpu.memory_space<vmem>>, vector<4x128xbf16>
    tpu.vector_store %arg8[%c52_92, %c0_93], %129 {strides = array<i32>} : memref<128x128xbf16, #tpu.memory_space<vmem>>, vector<4x128xbf16>,
    %131 = vector.extract_strided_slice %120 {offsets = [0, 12], sizes = [4, 128], strides = [1, 1]} : vector<4x256xbf16> to vector<4x128xbf16>
    %c56_94 = arith.constant 56 : index
    %c0_95 = arith.constant 0 : index
    %132 = vector.load %arg8[%c56_94, %c0_95] : memref<128x128xbf16, #tpu.memory_space<vmem>>, vector<4x128xbf16>
    tpu.vector_store %arg8[%c56_94, %c0_95], %131 {strides = array<i32>} : memref<128x128xbf16, #tpu.memory_space<vmem>>, vector<4x128xbf16>,
    %133 = vector.extract_strided_slice %120 {offsets = [0, 20], sizes = [4, 128], strides = [1, 1]} : vector<4x256xbf16> to vector<4x128xbf16>
    %c60_96 = arith.constant 60 : index
    %c0_97 = arith.constant 0 : index
    %134 = vector.load %arg8[%c60_96, %c0_97] : memref<128x128xbf16, #tpu.memory_space<vmem>>, vector<4x128xbf16>
    tpu.vector_store %arg8[%c60_96, %c0_97], %133 {strides = array<i32>} : memref<128x128xbf16, #tpu.memory_space<vmem>>, vector<4x128xbf16>,
    %135 = vector.extract_strided_slice %120 {offsets = [0, 21], sizes = [4, 128], strides = [1, 1]} : vector<4x256xbf16> to vector<4x128xbf16>
    %c64_98 = arith.constant 64 : index
    %c0_99 = arith.constant 0 : index
    %136 = vector.load %arg8[%c64_98, %c0_99] : memref<128x128xbf16, #tpu.memory_space<vmem>>, vector<4x128xbf16>
    tpu.vector_store %arg8[%c64_98, %c0_99], %135 {strides = array<i32>} : memref<128x128xbf16, #tpu.memory_space<vmem>>, vector<4x128xbf16>,
    %137 = vector.extract_strided_slice %120 {offsets = [0, 22], sizes = [4, 128], strides = [1, 1]} : vector<4x256xbf16> to vector<4x128xbf16>
    %c68_100 = arith.constant 68 : index
    %c0_101 = arith.constant 0 : index
    %138 = vector.load %arg8[%c68_100, %c0_101] : memref<128x128xbf16, #tpu.memory_space<vmem>>, vector<4x128xbf16>
    tpu.vector_store %arg8[%c68_100, %c0_101], %137 {strides = array<i32>} : memref<128x128xbf16, #tpu.memory_space<vmem>>, vector<4x128xbf16>,
    %c1_i32_102 = arith.constant 1 : i32
    %139 = arith.addi %7, %c1_i32_102 : i32
    %c2_i32_103 = arith.constant 2 : i32
    %140 = arith.addi %139, %c2_i32_103 : i32
    %c0_104 = arith.constant 0 : index
    %141 = arith.index_cast %140 : i32 to index
    %c0_105 = arith.constant 0 : index
    %c0_106 = arith.constant 0 : index
    %142 = vector.load %arg2[%c0_104, %141, %c0_105, %c0_106] : memref<1x10x4x256xbf16, #tpu.memory_space<vmem>>, vector<1x1x4x256xbf16>
    %143 = vector.shape_cast %142 : vector<1x1x4x256xbf16> to vector<4x256xbf16>
    %144 = vector.extract_strided_slice %143 {offsets = [0, 0], sizes = [4, 128], strides = [1, 1]} : vector<4x256xbf16> to vector<4x128xbf16>
    %c72_107 = arith.constant 72 : index
    %c0_108 = arith.constant 0 : index
    %145 = vector.load %arg8[%c72_107, %c0_108] : memref<128x128xbf16, #tpu.memory_space<vmem>>, vector<4x128xbf16>
    tpu.vector_store %arg8[%c72_107, %c0_108], %144 {strides = array<i32>} : memref<128x128xbf16, #tpu.memory_space<vmem>>, vector<4x128xbf16>,
    %146 = vector.extract_strided_slice %143 {offsets = [0, 1], sizes = [4, 128], strides = [1, 1]} : vector<4x256xbf16> to vector<4x128xbf16>
    %c76_109 = arith.constant 76 : index
    %c0_110 = arith.constant 0 : index
    %147 = vector.load %arg8[%c76_109, %c0_110] : memref<128x128xbf16, #tpu.memory_space<vmem>>, vector<4x128xbf16>
    tpu.vector_store %arg8[%c76_109, %c0_110], %146 {strides = array<i32>} : memref<128x128xbf16, #tpu.memory_space<vmem>>, vector<4x128xbf16>,
    %148 = vector.extract_strided_slice %143 {offsets = [0, 2], sizes = [4, 128], strides = [1, 1]} : vector<4x256xbf16> to vector<4x128xbf16>
    %c80_111 = arith.constant 80 : index
    %c0_112 = arith.constant 0 : index
    %149 = vector.load %arg8[%c80_111, %c0_112] : memref<128x128xbf16, #tpu.memory_space<vmem>>, vector<4x128xbf16>
    tpu.vector_store %arg8[%c80_111, %c0_112], %148 {strides = array<i32>} : memref<128x128xbf16, #tpu.memory_space<vmem>>, vector<4x128xbf16>,
    %150 = vector.extract_strided_slice %143 {offsets = [0, 10], sizes = [4, 128], strides = [1, 1]} : vector<4x256xbf16> to vector<4x128xbf16>
    %c84_113 = arith.constant 84 : index
    %c0_114 = arith.constant 0 : index
    %151 = vector.load %arg8[%c84_113, %c0_114] : memref<128x128xbf16, #tpu.memory_space<vmem>>, vector<4x128xbf16>
    tpu.vector_store %arg8[%c84_113, %c0_114], %150 {strides = array<i32>} : memref<128x128xbf16, #tpu.memory_space<vmem>>, vector<4x128xbf16>,
    %152 = vector.extract_strided_slice %143 {offsets = [0, 11], sizes = [4, 128], strides = [1, 1]} : vector<4x256xbf16> to vector<4x128xbf16>
    %c88_115 = arith.constant 88 : index
    %c0_116 = arith.constant 0 : index
    %153 = vector.load %arg8[%c88_115, %c0_116] : memref<128x128xbf16, #tpu.memory_space<vmem>>, vector<4x128xbf16>
    tpu.vector_store %arg8[%c88_115, %c0_116], %152 {strides = array<i32>} : memref<128x128xbf16, #tpu.memory_space<vmem>>, vector<4x128xbf16>,
    %154 = vector.extract_strided_slice %143 {offsets = [0, 12], sizes = [4, 128], strides = [1, 1]} : vector<4x256xbf16> to vector<4x128xbf16>
    %c92_117 = arith.constant 92 : index
    %c0_118 = arith.constant 0 : index
    %155 = vector.load %arg8[%c92_117, %c0_118] : memref<128x128xbf16, #tpu.memory_space<vmem>>, vector<4x128xbf16>
    tpu.vector_store %arg8[%c92_117, %c0_118], %154 {strides = array<i32>} : memref<128x128xbf16, #tpu.memory_space<vmem>>, vector<4x128xbf16>,
    %156 = vector.extract_strided_slice %143 {offsets = [0, 20], sizes = [4, 128], strides = [1, 1]} : vector<4x256xbf16> to vector<4x128xbf16>
    %c96_119 = arith.constant 96 : index
    %c0_120 = arith.constant 0 : index
    %157 = vector.load %arg8[%c96_119, %c0_120] : memref<128x128xbf16, #tpu.memory_space<vmem>>, vector<4x128xbf16>
    tpu.vector_store %arg8[%c96_119, %c0_120], %156 {strides = array<i32>} : memref<128x128xbf16, #tpu.memory_space<vmem>>, vector<4x128xbf16>,
    %158 = vector.extract_strided_slice %143 {offsets = [0, 21], sizes = [4, 128], strides = [1, 1]} : vector<4x256xbf16> to vector<4x128xbf16>
    %c100_121 = arith.constant 100 : index
    %c0_122 = arith.constant 0 : index
    %159 = vector.load %arg8[%c100_121, %c0_122] : memref<128x128xbf16, #tpu.memory_space<vmem>>, vector<4x128xbf16>
    tpu.vector_store %arg8[%c100_121, %c0_122], %158 {strides = array<i32>} : memref<128x128xbf16, #tpu.memory_space<vmem>>, vector<4x128xbf16>,
    %160 = vector.extract_strided_slice %143 {offsets = [0, 22], sizes = [4, 128], strides = [1, 1]} : vector<4x256xbf16> to vector<4x128xbf16>
    %c104_123 = arith.constant 104 : index
    %c0_124 = arith.constant 0 : index
    %161 = vector.load %arg8[%c104_123, %c0_124] : memref<128x128xbf16, #tpu.memory_space<vmem>>, vector<4x128xbf16>
    tpu.vector_store %arg8[%c104_123, %c0_124], %160 {strides = array<i32>} : memref<128x128xbf16, #tpu.memory_space<vmem>>, vector<4x128xbf16>,
    %c0_125 = arith.constant 0 : index
    %c0_126 = arith.constant 0 : index
    %162 = vector.load %arg8[%c0_125, %c0_126] : memref<128x128xbf16, #tpu.memory_space<vmem>>, vector<128x128xbf16>
    %cst_127 = arith.constant dense<0.000000e+00> : vector<8x128xf32>
    %163 = tpu.matmul %5, %162, %cst_127 {dimension_numbers = #tpu.dot_dimension_numbers<[1], [0], [0], [1], [0, 0, 1, 1], [], []>} : vector<8x128xbf16>, vector<128x128xbf16>, vector<8x128xf32> -> vector<8x128xf32>
    %c0_128 = arith.constant 0 : index
    %c0_129 = arith.constant 0 : index
    %c128 = arith.constant 128 : index
    %164 = vector.load %arg5[%c0_128, %c0_129, %c128] : memref<1x8x1024xf32, #tpu.memory_space<vmem>>, vector<1x8x128xf32>
    %165 = vector.shape_cast %164 : vector<1x8x128xf32> to vector<8x128xf32>
    %166 = vector.shape_cast %163 : vector<8x128xf32> to vector<1x8x128xf32>
    tpu.vector_store %arg5[%c0_128, %c0_129, %c128], %166 {strides = array<i32>} : memref<1x8x1024xf32, #tpu.memory_space<vmem>>, vector<1x8x128xf32>,
    %167 = vector.broadcast %6 : vector<1x128xf32> to vector<8x128xf32>
    %168 = arith.mulf %163, %167 : vector<8x128xf32>
    %cst_130 = arith.constant dense<0.000000e+00> : vector<8xf32>
    %169 = vector.multi_reduction <add>, %168, %cst_130 [1] : vector<8x128xf32> to vector<8xf32>
    %170 = vector.shape_cast %169 : vector<8xf32> to vector<8x1xf32>
    %171 = arith.addf %88, %170 : vector<8x1xf32>
    %172 = arith.mulf %163, %168 : vector<8x128xf32>
    %cst_131 = arith.constant dense<0.000000e+00> : vector<8xf32>
    %173 = vector.multi_reduction <add>, %172, %cst_131 [1] : vector<8x128xf32> to vector<8xf32>
    %174 = vector.shape_cast %173 : vector<8xf32> to vector<8x1xf32>
    %175 = arith.addf %92, %174 : vector<8x1xf32>
    %c2_i32_132 = arith.constant 2 : i32
    %176 = arith.addi %7, %c2_i32_132 : i32
    %c0_i32_133 = arith.constant 0 : i32
    %177 = arith.addi %176, %c0_i32_133 : i32
    %c0_134 = arith.constant 0 : index
    %178 = arith.index_cast %177 : i32 to index
    %c0_135 = arith.constant 0 : index
    %c0_136 = arith.constant 0 : index
    %179 = vector.load %arg2[%c0_134, %178, %c0_135, %c0_136] : memref<1x10x4x256xbf16, #tpu.memory_space<vmem>>, vector<1x1x4x256xbf16>
    %180 = vector.shape_cast %179 : vector<1x1x4x256xbf16> to vector<4x256xbf16>
    %181 = vector.extract_strided_slice %180 {offsets = [0, 0], sizes = [4, 128], strides = [1, 1]} : vector<4x256xbf16> to vector<4x128xbf16>
    %c0_137 = arith.constant 0 : index
    %c0_138 = arith.constant 0 : index
    %182 = vector.load %arg8[%c0_137, %c0_138] : memref<128x128xbf16, #tpu.memory_space<vmem>>, vector<4x128xbf16>
    tpu.vector_store %arg8[%c0_137, %c0_138], %181 {strides = array<i32>} : memref<128x128xbf16, #tpu.memory_space<vmem>>, vector<4x128xbf16>,
    %183 = vector.extract_strided_slice %180 {offsets = [0, 1], sizes = [4, 128], strides = [1, 1]} : vector<4x256xbf16> to vector<4x128xbf16>
    %c4_139 = arith.constant 4 : index
    %c0_140 = arith.constant 0 : index
    %184 = vector.load %arg8[%c4_139, %c0_140] : memref<128x128xbf16, #tpu.memory_space<vmem>>, vector<4x128xbf16>
    tpu.vector_store %arg8[%c4_139, %c0_140], %183 {strides = array<i32>} : memref<128x128xbf16, #tpu.memory_space<vmem>>, vector<4x128xbf16>,
    %185 = vector.extract_strided_slice %180 {offsets = [0, 2], sizes = [4, 128], strides = [1, 1]} : vector<4x256xbf16> to vector<4x128xbf16>
    %c8_141 = arith.constant 8 : index
    %c0_142 = arith.constant 0 : index
    %186 = vector.load %arg8[%c8_141, %c0_142] : memref<128x128xbf16, #tpu.memory_space<vmem>>, vector<4x128xbf16>
    tpu.vector_store %arg8[%c8_141, %c0_142], %185 {strides = array<i32>} : memref<128x128xbf16, #tpu.memory_space<vmem>>, vector<4x128xbf16>,
    %187 = vector.extract_strided_slice %180 {offsets = [0, 10], sizes = [4, 128], strides = [1, 1]} : vector<4x256xbf16> to vector<4x128xbf16>
    %c12_143 = arith.constant 12 : index
    %c0_144 = arith.constant 0 : index
    %188 = vector.load %arg8[%c12_143, %c0_144] : memref<128x128xbf16, #tpu.memory_space<vmem>>, vector<4x128xbf16>
    tpu.vector_store %arg8[%c12_143, %c0_144], %187 {strides = array<i32>} : memref<128x128xbf16, #tpu.memory_space<vmem>>, vector<4x128xbf16>,
    %189 = vector.extract_strided_slice %180 {offsets = [0, 11], sizes = [4, 128], strides = [1, 1]} : vector<4x256xbf16> to vector<4x128xbf16>
    %c16_145 = arith.constant 16 : index
    %c0_146 = arith.constant 0 : index
    %190 = vector.load %arg8[%c16_145, %c0_146] : memref<128x128xbf16, #tpu.memory_space<vmem>>, vector<4x128xbf16>
    tpu.vector_store %arg8[%c16_145, %c0_146], %189 {strides = array<i32>} : memref<128x128xbf16, #tpu.memory_space<vmem>>, vector<4x128xbf16>,
    %191 = vector.extract_strided_slice %180 {offsets = [0, 12], sizes = [4, 128], strides = [1, 1]} : vector<4x256xbf16> to vector<4x128xbf16>
    %c20_147 = arith.constant 20 : index
    %c0_148 = arith.constant 0 : index
    %192 = vector.load %arg8[%c20_147, %c0_148] : memref<128x128xbf16, #tpu.memory_space<vmem>>, vector<4x128xbf16>
    tpu.vector_store %arg8[%c20_147, %c0_148], %191 {strides = array<i32>} : memref<128x128xbf16, #tpu.memory_space<vmem>>, vector<4x128xbf16>,
    %193 = vector.extract_strided_slice %180 {offsets = [0, 20], sizes = [4, 128], strides = [1, 1]} : vector<4x256xbf16> to vector<4x128xbf16>
    %c24_149 = arith.constant 24 : index
    %c0_150 = arith.constant 0 : index
    %194 = vector.load %arg8[%c24_149, %c0_150] : memref<128x128xbf16, #tpu.memory_space<vmem>>, vector<4x128xbf16>
    tpu.vector_store %arg8[%c24_149, %c0_150], %193 {strides = array<i32>} : memref<128x128xbf16, #tpu.memory_space<vmem>>, vector<4x128xbf16>,
    %195 = vector.extract_strided_slice %180 {offsets = [0, 21], sizes = [4, 128], strides = [1, 1]} : vector<4x256xbf16> to vector<4x128xbf16>
    %c28_151 = arith.constant 28 : index
    %c0_152 = arith.constant 0 : index
    %196 = vector.load %arg8[%c28_151, %c0_152] : memref<128x128xbf16, #tpu.memory_space<vmem>>, vector<4x128xbf16>
    tpu.vector_store %arg8[%c28_151, %c0_152], %195 {strides = array<i32>} : memref<128x128xbf16, #tpu.memory_space<vmem>>, vector<4x128xbf16>,
    %197 = vector.extract_strided_slice %180 {offsets = [0, 22], sizes = [4, 128], strides = [1, 1]} : vector<4x256xbf16> to vector<4x128xbf16>
    %c32_153 = arith.constant 32 : index
    %c0_154 = arith.constant 0 : index
    %198 = vector.load %arg8[%c32_153, %c0_154] : memref<128x128xbf16, #tpu.memory_space<vmem>>, vector<4x128xbf16>
    tpu.vector_store %arg8[%c32_153, %c0_154], %197 {strides = array<i32>} : memref<128x128xbf16, #tpu.memory_space<vmem>>, vector<4x128xbf16>,
    %c2_i32_155 = arith.constant 2 : i32
    %199 = arith.addi %7, %c2_i32_155 : i32
    %c1_i32_156 = arith.constant 1 : i32
    %200 = arith.addi %199, %c1_i32_156 : i32
    %c0_157 = arith.constant 0 : index
    %201 = arith.index_cast %200 : i32 to index
    %c0_158 = arith.constant 0 : index
    %c0_159 = arith.constant 0 : index
    %202 = vector.load %arg2[%c0_157, %201, %c0_158, %c0_159] : memref<1x10x4x256xbf16, #tpu.memory_space<vmem>>, vector<1x1x4x256xbf16>
    %203 = vector.shape_cast %202 : vector<1x1x4x256xbf16> to vector<4x256xbf16>
    %204 = vector.extract_strided_slice %203 {offsets = [0, 0], sizes = [4, 128], strides = [1, 1]} : vector<4x256xbf16> to vector<4x128xbf16>
    %c36_160 = arith.constant 36 : index
    %c0_161 = arith.constant 0 : index
    %205 = vector.load %arg8[%c36_160, %c0_161] : memref<128x128xbf16, #tpu.memory_space<vmem>>, vector<4x128xbf16>
    tpu.vector_store %arg8[%c36_160, %c0_161], %204 {strides = array<i32>} : memref<128x128xbf16, #tpu.memory_space<vmem>>, vector<4x128xbf16>,
    %206 = vector.extract_strided_slice %203 {offsets = [0, 1], sizes = [4, 128], strides = [1, 1]} : vector<4x256xbf16> to vector<4x128xbf16>
    %c40_162 = arith.constant 40 : index
    %c0_163 = arith.constant 0 : index
    %207 = vector.load %arg8[%c40_162, %c0_163] : memref<128x128xbf16, #tpu.memory_space<vmem>>, vector<4x128xbf16>
    tpu.vector_store %arg8[%c40_162, %c0_163], %206 {strides = array<i32>} : memref<128x128xbf16, #tpu.memory_space<vmem>>, vector<4x128xbf16>,
    %208 = vector.extract_strided_slice %203 {offsets = [0, 2], sizes = [4, 128], strides = [1, 1]} : vector<4x256xbf16> to vector<4x128xbf16>
    %c44_164 = arith.constant 44 : index
    %c0_165 = arith.constant 0 : index
    %209 = vector.load %arg8[%c44_164, %c0_165] : memref<128x128xbf16, #tpu.memory_space<vmem>>, vector<4x128xbf16>
    tpu.vector_store %arg8[%c44_164, %c0_165], %208 {strides = array<i32>} : memref<128x128xbf16, #tpu.memory_space<vmem>>, vector<4x128xbf16>,
    %210 = vector.extract_strided_slice %203 {offsets = [0, 10], sizes = [4, 128], strides = [1, 1]} : vector<4x256xbf16> to vector<4x128xbf16>
    %c48_166 = arith.constant 48 : index
    %c0_167 = arith.constant 0 : index
    %211 = vector.load %arg8[%c48_166, %c0_167] : memref<128x128xbf16, #tpu.memory_space<vmem>>, vector<4x128xbf16>
    tpu.vector_store %arg8[%c48_166, %c0_167], %210 {strides = array<i32>} : memref<128x128xbf16, #tpu.memory_space<vmem>>, vector<4x128xbf16>,
    %212 = vector.extract_strided_slice %203 {offsets = [0, 11], sizes = [4, 128], strides = [1, 1]} : vector<4x256xbf16> to vector<4x128xbf16>
    %c52_168 = arith.constant 52 : index
    %c0_169 = arith.constant 0 : index
    %213 = vector.load %arg8[%c52_168, %c0_169] : memref<128x128xbf16, #tpu.memory_space<vmem>>, vector<4x128xbf16>
    tpu.vector_store %arg8[%c52_168, %c0_169], %212 {strides = array<i32>} : memref<128x128xbf16, #tpu.memory_space<vmem>>, vector<4x128xbf16>,
    %214 = vector.extract_strided_slice %203 {offsets = [0, 12], sizes = [4, 128], strides = [1, 1]} : vector<4x256xbf16> to vector<4x128xbf16>
    %c56_170 = arith.constant 56 : index
    %c0_171 = arith.constant 0 : index
    %215 = vector.load %arg8[%c56_170, %c0_171] : memref<128x128xbf16, #tpu.memory_space<vmem>>, vector<4x128xbf16>
    tpu.vector_store %arg8[%c56_170, %c0_171], %214 {strides = array<i32>} : memref<128x128xbf16, #tpu.memory_space<vmem>>, vector<4x128xbf16>,
    %216 = vector.extract_strided_slice %203 {offsets = [0, 20], sizes = [4, 128], strides = [1, 1]} : vector<4x256xbf16> to vector<4x128xbf16>
    %c60_172 = arith.constant 60 : index
    %c0_173 = arith.constant 0 : index
    %217 = vector.load %arg8[%c60_172, %c0_173] : memref<128x128xbf16, #tpu.memory_space<vmem>>, vector<4x128xbf16>
    tpu.vector_store %arg8[%c60_172, %c0_173], %216 {strides = array<i32>} : memref<128x128xbf16, #tpu.memory_space<vmem>>, vector<4x128xbf16>,
    %218 = vector.extract_strided_slice %203 {offsets = [0, 21], sizes = [4, 128], strides = [1, 1]} : vector<4x256xbf16> to vector<4x128xbf16>
    %c64_174 = arith.constant 64 : index
    %c0_175 = arith.constant 0 : index
    %219 = vector.load %arg8[%c64_174, %c0_175] : memref<128x128xbf16, #tpu.memory_space<vmem>>, vector<4x128xbf16>
    tpu.vector_store %arg8[%c64_174, %c0_175], %218 {strides = array<i32>} : memref<128x128xbf16, #tpu.memory_space<vmem>>, vector<4x128xbf16>,
    %220 = vector.extract_strided_slice %203 {offsets = [0, 22], sizes = [4, 128], strides = [1, 1]} : vector<4x256xbf16> to vector<4x128xbf16>
    %c68_176 = arith.constant 68 : index
    %c0_177 = arith.constant 0 : index
    %221 = vector.load %arg8[%c68_176, %c0_177] : memref<128x128xbf16, #tpu.memory_space<vmem>>, vector<4x128xbf16>
    tpu.vector_store %arg8[%c68_176, %c0_177], %220 {strides = array<i32>} : memref<128x128xbf16, #tpu.memory_space<vmem>>, vector<4x128xbf16>,
    %c2_i32_178 = arith.constant 2 : i32
    %222 = arith.addi %7, %c2_i32_178 : i32
    %c2_i32_179 = arith.constant 2 : i32
    %223 = arith.addi %222, %c2_i32_179 : i32
    %c0_180 = arith.constant 0 : index
    %224 = arith.index_cast %223 : i32 to index
    %c0_181 = arith.constant 0 : index
    %c0_182 = arith.constant 0 : index
    %225 = vector.load %arg2[%c0_180, %224, %c0_181, %c0_182] : memref<1x10x4x256xbf16, #tpu.memory_space<vmem>>, vector<1x1x4x256xbf16>
    %226 = vector.shape_cast %225 : vector<1x1x4x256xbf16> to vector<4x256xbf16>
    %227 = vector.extract_strided_slice %226 {offsets = [0, 0], sizes = [4, 128], strides = [1, 1]} : vector<4x256xbf16> to vector<4x128xbf16>
    %c72_183 = arith.constant 72 : index
    %c0_184 = arith.constant 0 : index
    %228 = vector.load %arg8[%c72_183, %c0_184] : memref<128x128xbf16, #tpu.memory_space<vmem>>, vector<4x128xbf16>
    tpu.vector_store %arg8[%c72_183, %c0_184], %227 {strides = array<i32>} : memref<128x128xbf16, #tpu.memory_space<vmem>>, vector<4x128xbf16>,
    %229 = vector.extract_strided_slice %226 {offsets = [0, 1], sizes = [4, 128], strides = [1, 1]} : vector<4x256xbf16> to vector<4x128xbf16>
    %c76_185 = arith.constant 76 : index
    %c0_186 = arith.constant 0 : index
    %230 = vector.load %arg8[%c76_185, %c0_186] : memref<128x128xbf16, #tpu.memory_space<vmem>>, vector<4x128xbf16>
    tpu.vector_store %arg8[%c76_185, %c0_186], %229 {strides = array<i32>} : memref<128x128xbf16, #tpu.memory_space<vmem>>, vector<4x128xbf16>,
    %231 = vector.extract_strided_slice %226 {offsets = [0, 2], sizes = [4, 128], strides = [1, 1]} : vector<4x256xbf16> to vector<4x128xbf16>
    %c80_187 = arith.constant 80 : index
    %c0_188 = arith.constant 0 : index
    %232 = vector.load %arg8[%c80_187, %c0_188] : memref<128x128xbf16, #tpu.memory_space<vmem>>, vector<4x128xbf16>
    tpu.vector_store %arg8[%c80_187, %c0_188], %231 {strides = array<i32>} : memref<128x128xbf16, #tpu.memory_space<vmem>>, vector<4x128xbf16>,
    %233 = vector.extract_strided_slice %226 {offsets = [0, 10], sizes = [4, 128], strides = [1, 1]} : vector<4x256xbf16> to vector<4x128xbf16>
    %c84_189 = arith.constant 84 : index
    %c0_190 = arith.constant 0 : index
    %234 = vector.load %arg8[%c84_189, %c0_190] : memref<128x128xbf16, #tpu.memory_space<vmem>>, vector<4x128xbf16>
    tpu.vector_store %arg8[%c84_189, %c0_190], %233 {strides = array<i32>} : memref<128x128xbf16, #tpu.memory_space<vmem>>, vector<4x128xbf16>,
    %235 = vector.extract_strided_slice %226 {offsets = [0, 11], sizes = [4, 128], strides = [1, 1]} : vector<4x256xbf16> to vector<4x128xbf16>
    %c88_191 = arith.constant 88 : index
    %c0_192 = arith.constant 0 : index
    %236 = vector.load %arg8[%c88_191, %c0_192] : memref<128x128xbf16, #tpu.memory_space<vmem>>, vector<4x128xbf16>
    tpu.vector_store %arg8[%c88_191, %c0_192], %235 {strides = array<i32>} : memref<128x128xbf16, #tpu.memory_space<vmem>>, vector<4x128xbf16>,
    %237 = vector.extract_strided_slice %226 {offsets = [0, 12], sizes = [4, 128], strides = [1, 1]} : vector<4x256xbf16> to vector<4x128xbf16>
    %c92_193 = arith.constant 92 : index
    %c0_194 = arith.constant 0 : index
    %238 = vector.load %arg8[%c92_193, %c0_194] : memref<128x128xbf16, #tpu.memory_space<vmem>>, vector<4x128xbf16>
    tpu.vector_store %arg8[%c92_193, %c0_194], %237 {strides = array<i32>} : memref<128x128xbf16, #tpu.memory_space<vmem>>, vector<4x128xbf16>,
    %239 = vector.extract_strided_slice %226 {offsets = [0, 20], sizes = [4, 128], strides = [1, 1]} : vector<4x256xbf16> to vector<4x128xbf16>
    %c96_195 = arith.constant 96 : index
    %c0_196 = arith.constant 0 : index
    %240 = vector.load %arg8[%c96_195, %c0_196] : memref<128x128xbf16, #tpu.memory_space<vmem>>, vector<4x128xbf16>
    tpu.vector_store %arg8[%c96_195, %c0_196], %239 {strides = array<i32>} : memref<128x128xbf16, #tpu.memory_space<vmem>>, vector<4x128xbf16>,
    %241 = vector.extract_strided_slice %226 {offsets = [0, 21], sizes = [4, 128], strides = [1, 1]} : vector<4x256xbf16> to vector<4x128xbf16>
    %c100_197 = arith.constant 100 : index
    %c0_198 = arith.constant 0 : index
    %242 = vector.load %arg8[%c100_197, %c0_198] : memref<128x128xbf16, #tpu.memory_space<vmem>>, vector<4x128xbf16>
    tpu.vector_store %arg8[%c100_197, %c0_198], %241 {strides = array<i32>} : memref<128x128xbf16, #tpu.memory_space<vmem>>, vector<4x128xbf16>,
    %243 = vector.extract_strided_slice %226 {offsets = [0, 22], sizes = [4, 128], strides = [1, 1]} : vector<4x256xbf16> to vector<4x128xbf16>
    %c104_199 = arith.constant 104 : index
    %c0_200 = arith.constant 0 : index
    %244 = vector.load %arg8[%c104_199, %c0_200] : memref<128x128xbf16, #tpu.memory_space<vmem>>, vector<4x128xbf16>
    tpu.vector_store %arg8[%c104_199, %c0_200], %243 {strides = array<i32>} : memref<128x128xbf16, #tpu.memory_space<vmem>>, vector<4x128xbf16>,
    %c0_201 = arith.constant 0 : index
    %c0_202 = arith.constant 0 : index
    %245 = vector.load %arg8[%c0_201, %c0_202] : memref<128x128xbf16, #tpu.memory_space<vmem>>, vector<128x128xbf16>
    %cst_203 = arith.constant dense<0.000000e+00> : vector<8x128xf32>
    %246 = tpu.matmul %5, %245, %cst_203 {dimension_numbers = #tpu.dot_dimension_numbers<[1], [0], [0], [1], [0, 0, 1, 1], [], []>} : vector<8x128xbf16>, vector<128x128xbf16>, vector<8x128xf32> -> vector<8x128xf32>
    %c0_204 = arith.constant 0 : index
    %c0_205 = arith.constant 0 : index
    %c256 = arith.constant 256 : index
    %247 = vector.load %arg5[%c0_204, %c0_205, %c256] : memref<1x8x1024xf32, #tpu.memory_space<vmem>>, vector<1x8x128xf32>
    %248 = vector.shape_cast %247 : vector<1x8x128xf32> to vector<8x128xf32>
    %249 = vector.shape_cast %246 : vector<8x128xf32> to vector<1x8x128xf32>
    tpu.vector_store %arg5[%c0_204, %c0_205, %c256], %249 {strides = array<i32>} : memref<1x8x1024xf32, #tpu.memory_space<vmem>>, vector<1x8x128xf32>,
    %250 = vector.broadcast %6 : vector<1x128xf32> to vector<8x128xf32>
    %251 = arith.mulf %246, %250 : vector<8x128xf32>
    %cst_206 = arith.constant dense<0.000000e+00> : vector<8xf32>
    %252 = vector.multi_reduction <add>, %251, %cst_206 [1] : vector<8x128xf32> to vector<8xf32>
    %253 = vector.shape_cast %252 : vector<8xf32> to vector<8x1xf32>
    %254 = arith.addf %171, %253 : vector<8x1xf32>
    %255 = arith.mulf %246, %251 : vector<8x128xf32>
    %cst_207 = arith.constant dense<0.000000e+00> : vector<8xf32>
    %256 = vector.multi_reduction <add>, %255, %cst_207 [1] : vector<8x128xf32> to vector<8xf32>
    %257 = vector.shape_cast %256 : vector<8xf32> to vector<8x1xf32>
    %258 = arith.addf %175, %257 : vector<8x1xf32>
    %c3_i32 = arith.constant 3 : i32
    %259 = arith.addi %7, %c3_i32 : i32
    %c0_i32_208 = arith.constant 0 : i32
    %260 = arith.addi %259, %c0_i32_208 : i32
    %c0_209 = arith.constant 0 : index
    %261 = arith.index_cast %260 : i32 to index
    %c0_210 = arith.constant 0 : index
    %c0_211 = arith.constant 0 : index
    %262 = vector.load %arg2[%c0_209, %261, %c0_210, %c0_211] : memref<1x10x4x256xbf16, #tpu.memory_space<vmem>>, vector<1x1x4x256xbf16>
    %263 = vector.shape_cast %262 : vector<1x1x4x256xbf16> to vector<4x256xbf16>
    %264 = vector.extract_strided_slice %263 {offsets = [0, 0], sizes = [4, 128], strides = [1, 1]} : vector<4x256xbf16> to vector<4x128xbf16>
    %c0_212 = arith.constant 0 : index
    %c0_213 = arith.constant 0 : index
    %265 = vector.load %arg8[%c0_212, %c0_213] : memref<128x128xbf16, #tpu.memory_space<vmem>>, vector<4x128xbf16>
    tpu.vector_store %arg8[%c0_212, %c0_213], %264 {strides = array<i32>} : memref<128x128xbf16, #tpu.memory_space<vmem>>, vector<4x128xbf16>,
    %266 = vector.extract_strided_slice %263 {offsets = [0, 1], sizes = [4, 128], strides = [1, 1]} : vector<4x256xbf16> to vector<4x128xbf16>
    %c4_214 = arith.constant 4 : index
    %c0_215 = arith.constant 0 : index
    %267 = vector.load %arg8[%c4_214, %c0_215] : memref<128x128xbf16, #tpu.memory_space<vmem>>, vector<4x128xbf16>
    tpu.vector_store %arg8[%c4_214, %c0_215], %266 {strides = array<i32>} : memref<128x128xbf16, #tpu.memory_space<vmem>>, vector<4x128xbf16>,
    %268 = vector.extract_strided_slice %263 {offsets = [0, 2], sizes = [4, 128], strides = [1, 1]} : vector<4x256xbf16> to vector<4x128xbf16>
    %c8_216 = arith.constant 8 : index
    %c0_217 = arith.constant 0 : index
    %269 = vector.load %arg8[%c8_216, %c0_217] : memref<128x128xbf16, #tpu.memory_space<vmem>>, vector<4x128xbf16>
    tpu.vector_store %arg8[%c8_216, %c0_217], %268 {strides = array<i32>} : memref<128x128xbf16, #tpu.memory_space<vmem>>, vector<4x128xbf16>,
    %270 = vector.extract_strided_slice %263 {offsets = [0, 10], sizes = [4, 128], strides = [1, 1]} : vector<4x256xbf16> to vector<4x128xbf16>
    %c12_218 = arith.constant 12 : index
    %c0_219 = arith.constant 0 : index
    %271 = vector.load %arg8[%c12_218, %c0_219] : memref<128x128xbf16, #tpu.memory_space<vmem>>, vector<4x128xbf16>
    tpu.vector_store %arg8[%c12_218, %c0_219], %270 {strides = array<i32>} : memref<128x128xbf16, #tpu.memory_space<vmem>>, vector<4x128xbf16>,
    %272 = vector.extract_strided_slice %263 {offsets = [0, 11], sizes = [4, 128], strides = [1, 1]} : vector<4x256xbf16> to vector<4x128xbf16>
    %c16_220 = arith.constant 16 : index
    %c0_221 = arith.constant 0 : index
    %273 = vector.load %arg8[%c16_220, %c0_221] : memref<128x128xbf16, #tpu.memory_space<vmem>>, vector<4x128xbf16>
    tpu.vector_store %arg8[%c16_220, %c0_221], %272 {strides = array<i32>} : memref<128x128xbf16, #tpu.memory_space<vmem>>, vector<4x128xbf16>,
    %274 = vector.extract_strided_slice %263 {offsets = [0, 12], sizes = [4, 128], strides = [1, 1]} : vector<4x256xbf16> to vector<4x128xbf16>
    %c20_222 = arith.constant 20 : index
    %c0_223 = arith.constant 0 : index
    %275 = vector.load %arg8[%c20_222, %c0_223] : memref<128x128xbf16, #tpu.memory_space<vmem>>, vector<4x128xbf16>
    tpu.vector_store %arg8[%c20_222, %c0_223], %274 {strides = array<i32>} : memref<128x128xbf16, #tpu.memory_space<vmem>>, vector<4x128xbf16>,
    %276 = vector.extract_strided_slice %263 {offsets = [0, 20], sizes = [4, 128], strides = [1, 1]} : vector<4x256xbf16> to vector<4x128xbf16>
    %c24_224 = arith.constant 24 : index
    %c0_225 = arith.constant 0 : index
    %277 = vector.load %arg8[%c24_224, %c0_225] : memref<128x128xbf16, #tpu.memory_space<vmem>>, vector<4x128xbf16>
    tpu.vector_store %arg8[%c24_224, %c0_225], %276 {strides = array<i32>} : memref<128x128xbf16, #tpu.memory_space<vmem>>, vector<4x128xbf16>,
    %278 = vector.extract_strided_slice %263 {offsets = [0, 21], sizes = [4, 128], strides = [1, 1]} : vector<4x256xbf16> to vector<4x128xbf16>
    %c28_226 = arith.constant 28 : index
    %c0_227 = arith.constant 0 : index
    %279 = vector.load %arg8[%c28_226, %c0_227] : memref<128x128xbf16, #tpu.memory_space<vmem>>, vector<4x128xbf16>
    tpu.vector_store %arg8[%c28_226, %c0_227], %278 {strides = array<i32>} : memref<128x128xbf16, #tpu.memory_space<vmem>>, vector<4x128xbf16>,
    %280 = vector.extract_strided_slice %263 {offsets = [0, 22], sizes = [4, 128], strides = [1, 1]} : vector<4x256xbf16> to vector<4x128xbf16>
    %c32_228 = arith.constant 32 : index
    %c0_229 = arith.constant 0 : index
    %281 = vector.load %arg8[%c32_228, %c0_229] : memref<128x128xbf16, #tpu.memory_space<vmem>>, vector<4x128xbf16>
    tpu.vector_store %arg8[%c32_228, %c0_229], %280 {strides = array<i32>} : memref<128x128xbf16, #tpu.memory_space<vmem>>, vector<4x128xbf16>,
    %c3_i32_230 = arith.constant 3 : i32
    %282 = arith.addi %7, %c3_i32_230 : i32
    %c1_i32_231 = arith.constant 1 : i32
    %283 = arith.addi %282, %c1_i32_231 : i32
    %c0_232 = arith.constant 0 : index
    %284 = arith.index_cast %283 : i32 to index
    %c0_233 = arith.constant 0 : index
    %c0_234 = arith.constant 0 : index
    %285 = vector.load %arg2[%c0_232, %284, %c0_233, %c0_234] : memref<1x10x4x256xbf16, #tpu.memory_space<vmem>>, vector<1x1x4x256xbf16>
    %286 = vector.shape_cast %285 : vector<1x1x4x256xbf16> to vector<4x256xbf16>
    %287 = vector.extract_strided_slice %286 {offsets = [0, 0], sizes = [4, 128], strides = [1, 1]} : vector<4x256xbf16> to vector<4x128xbf16>
    %c36_235 = arith.constant 36 : index
    %c0_236 = arith.constant 0 : index
    %288 = vector.load %arg8[%c36_235, %c0_236] : memref<128x128xbf16, #tpu.memory_space<vmem>>, vector<4x128xbf16>
    tpu.vector_store %arg8[%c36_235, %c0_236], %287 {strides = array<i32>} : memref<128x128xbf16, #tpu.memory_space<vmem>>, vector<4x128xbf16>,
    %289 = vector.extract_strided_slice %286 {offsets = [0, 1], sizes = [4, 128], strides = [1, 1]} : vector<4x256xbf16> to vector<4x128xbf16>
    %c40_237 = arith.constant 40 : index
    %c0_238 = arith.constant 0 : index
    %290 = vector.load %arg8[%c40_237, %c0_238] : memref<128x128xbf16, #tpu.memory_space<vmem>>, vector<4x128xbf16>
    tpu.vector_store %arg8[%c40_237, %c0_238], %289 {strides = array<i32>} : memref<128x128xbf16, #tpu.memory_space<vmem>>, vector<4x128xbf16>,
    %291 = vector.extract_strided_slice %286 {offsets = [0, 2], sizes = [4, 128], strides = [1, 1]} : vector<4x256xbf16> to vector<4x128xbf16>
    %c44_239 = arith.constant 44 : index
    %c0_240 = arith.constant 0 : index
    %292 = vector.load %arg8[%c44_239, %c0_240] : memref<128x128xbf16, #tpu.memory_space<vmem>>, vector<4x128xbf16>
    tpu.vector_store %arg8[%c44_239, %c0_240], %291 {strides = array<i32>} : memref<128x128xbf16, #tpu.memory_space<vmem>>, vector<4x128xbf16>,
    %293 = vector.extract_strided_slice %286 {offsets = [0, 10], sizes = [4, 128], strides = [1, 1]} : vector<4x256xbf16> to vector<4x128xbf16>
    %c48_241 = arith.constant 48 : index
    %c0_242 = arith.constant 0 : index
    %294 = vector.load %arg8[%c48_241, %c0_242] : memref<128x128xbf16, #tpu.memory_space<vmem>>, vector<4x128xbf16>
    tpu.vector_store %arg8[%c48_241, %c0_242], %293 {strides = array<i32>} : memref<128x128xbf16, #tpu.memory_space<vmem>>, vector<4x128xbf16>,
    %295 = vector.extract_strided_slice %286 {offsets = [0, 11], sizes = [4, 128], strides = [1, 1]} : vector<4x256xbf16> to vector<4x128xbf16>
    %c52_243 = arith.constant 52 : index
    %c0_244 = arith.constant 0 : index
    %296 = vector.load %arg8[%c52_243, %c0_244] : memref<128x128xbf16, #tpu.memory_space<vmem>>, vector<4x128xbf16>
    tpu.vector_store %arg8[%c52_243, %c0_244], %295 {strides = array<i32>} : memref<128x128xbf16, #tpu.memory_space<vmem>>, vector<4x128xbf16>,
    %297 = vector.extract_strided_slice %286 {offsets = [0, 12], sizes = [4, 128], strides = [1, 1]} : vector<4x256xbf16> to vector<4x128xbf16>
    %c56_245 = arith.constant 56 : index
    %c0_246 = arith.constant 0 : index
    %298 = vector.load %arg8[%c56_245, %c0_246] : memref<128x128xbf16, #tpu.memory_space<vmem>>, vector<4x128xbf16>
    tpu.vector_store %arg8[%c56_245, %c0_246], %297 {strides = array<i32>} : memref<128x128xbf16, #tpu.memory_space<vmem>>, vector<4x128xbf16>,
    %299 = vector.extract_strided_slice %286 {offsets = [0, 20], sizes = [4, 128], strides = [1, 1]} : vector<4x256xbf16> to vector<4x128xbf16>
    %c60_247 = arith.constant 60 : index
    %c0_248 = arith.constant 0 : index
    %300 = vector.load %arg8[%c60_247, %c0_248] : memref<128x128xbf16, #tpu.memory_space<vmem>>, vector<4x128xbf16>
    tpu.vector_store %arg8[%c60_247, %c0_248], %299 {strides = array<i32>} : memref<128x128xbf16, #tpu.memory_space<vmem>>, vector<4x128xbf16>,
    %301 = vector.extract_strided_slice %286 {offsets = [0, 21], sizes = [4, 128], strides = [1, 1]} : vector<4x256xbf16> to vector<4x128xbf16>
    %c64_249 = arith.constant 64 : index
    %c0_250 = arith.constant 0 : index
    %302 = vector.load %arg8[%c64_249, %c0_250] : memref<128x128xbf16, #tpu.memory_space<vmem>>, vector<4x128xbf16>
    tpu.vector_store %arg8[%c64_249, %c0_250], %301 {strides = array<i32>} : memref<128x128xbf16, #tpu.memory_space<vmem>>, vector<4x128xbf16>,
    %303 = vector.extract_strided_slice %286 {offsets = [0, 22], sizes = [4, 128], strides = [1, 1]} : vector<4x256xbf16> to vector<4x128xbf16>
    %c68_251 = arith.constant 68 : index
    %c0_252 = arith.constant 0 : index
    %304 = vector.load %arg8[%c68_251, %c0_252] : memref<128x128xbf16, #tpu.memory_space<vmem>>, vector<4x128xbf16>
    tpu.vector_store %arg8[%c68_251, %c0_252], %303 {strides = array<i32>} : memref<128x128xbf16, #tpu.memory_space<vmem>>, vector<4x128xbf16>,
    %c3_i32_253 = arith.constant 3 : i32
    %305 = arith.addi %7, %c3_i32_253 : i32
    %c2_i32_254 = arith.constant 2 : i32
    %306 = arith.addi %305, %c2_i32_254 : i32
    %c0_255 = arith.constant 0 : index
    %307 = arith.index_cast %306 : i32 to index
    %c0_256 = arith.constant 0 : index
    %c0_257 = arith.constant 0 : index
    %308 = vector.load %arg2[%c0_255, %307, %c0_256, %c0_257] : memref<1x10x4x256xbf16, #tpu.memory_space<vmem>>, vector<1x1x4x256xbf16>
    %309 = vector.shape_cast %308 : vector<1x1x4x256xbf16> to vector<4x256xbf16>
    %310 = vector.extract_strided_slice %309 {offsets = [0, 0], sizes = [4, 128], strides = [1, 1]} : vector<4x256xbf16> to vector<4x128xbf16>
    %c72_258 = arith.constant 72 : index
    %c0_259 = arith.constant 0 : index
    %311 = vector.load %arg8[%c72_258, %c0_259] : memref<128x128xbf16, #tpu.memory_space<vmem>>, vector<4x128xbf16>
    tpu.vector_store %arg8[%c72_258, %c0_259], %310 {strides = array<i32>} : memref<128x128xbf16, #tpu.memory_space<vmem>>, vector<4x128xbf16>,
    %312 = vector.extract_strided_slice %309 {offsets = [0, 1], sizes = [4, 128], strides = [1, 1]} : vector<4x256xbf16> to vector<4x128xbf16>
    %c76_260 = arith.constant 76 : index
    %c0_261 = arith.constant 0 : index
    %313 = vector.load %arg8[%c76_260, %c0_261] : memref<128x128xbf16, #tpu.memory_space<vmem>>, vector<4x128xbf16>
    tpu.vector_store %arg8[%c76_260, %c0_261], %312 {strides = array<i32>} : memref<128x128xbf16, #tpu.memory_space<vmem>>, vector<4x128xbf16>,
    %314 = vector.extract_strided_slice %309 {offsets = [0, 2], sizes = [4, 128], strides = [1, 1]} : vector<4x256xbf16> to vector<4x128xbf16>
    %c80_262 = arith.constant 80 : index
    %c0_263 = arith.constant 0 : index
    %315 = vector.load %arg8[%c80_262, %c0_263] : memref<128x128xbf16, #tpu.memory_space<vmem>>, vector<4x128xbf16>
    tpu.vector_store %arg8[%c80_262, %c0_263], %314 {strides = array<i32>} : memref<128x128xbf16, #tpu.memory_space<vmem>>, vector<4x128xbf16>,
    %316 = vector.extract_strided_slice %309 {offsets = [0, 10], sizes = [4, 128], strides = [1, 1]} : vector<4x256xbf16> to vector<4x128xbf16>
    %c84_264 = arith.constant 84 : index
    %c0_265 = arith.constant 0 : index
    %317 = vector.load %arg8[%c84_264, %c0_265] : memref<128x128xbf16, #tpu.memory_space<vmem>>, vector<4x128xbf16>
    tpu.vector_store %arg8[%c84_264, %c0_265], %316 {strides = array<i32>} : memref<128x128xbf16, #tpu.memory_space<vmem>>, vector<4x128xbf16>,
    %318 = vector.extract_strided_slice %309 {offsets = [0, 11], sizes = [4, 128], strides = [1, 1]} : vector<4x256xbf16> to vector<4x128xbf16>
    %c88_266 = arith.constant 88 : index
    %c0_267 = arith.constant 0 : index
    %319 = vector.load %arg8[%c88_266, %c0_267] : memref<128x128xbf16, #tpu.memory_space<vmem>>, vector<4x128xbf16>
    tpu.vector_store %arg8[%c88_266, %c0_267], %318 {strides = array<i32>} : memref<128x128xbf16, #tpu.memory_space<vmem>>, vector<4x128xbf16>,
    %320 = vector.extract_strided_slice %309 {offsets = [0, 12], sizes = [4, 128], strides = [1, 1]} : vector<4x256xbf16> to vector<4x128xbf16>
    %c92_268 = arith.constant 92 : index
    %c0_269 = arith.constant 0 : index
    %321 = vector.load %arg8[%c92_268, %c0_269] : memref<128x128xbf16, #tpu.memory_space<vmem>>, vector<4x128xbf16>
    tpu.vector_store %arg8[%c92_268, %c0_269], %320 {strides = array<i32>} : memref<128x128xbf16, #tpu.memory_space<vmem>>, vector<4x128xbf16>,
    %322 = vector.extract_strided_slice %309 {offsets = [0, 20], sizes = [4, 128], strides = [1, 1]} : vector<4x256xbf16> to vector<4x128xbf16>
    %c96_270 = arith.constant 96 : index
    %c0_271 = arith.constant 0 : index
    %323 = vector.load %arg8[%c96_270, %c0_271] : memref<128x128xbf16, #tpu.memory_space<vmem>>, vector<4x128xbf16>
    tpu.vector_store %arg8[%c96_270, %c0_271], %322 {strides = array<i32>} : memref<128x128xbf16, #tpu.memory_space<vmem>>, vector<4x128xbf16>,
    %324 = vector.extract_strided_slice %309 {offsets = [0, 21], sizes = [4, 128], strides = [1, 1]} : vector<4x256xbf16> to vector<4x128xbf16>
    %c100_272 = arith.constant 100 : index
    %c0_273 = arith.constant 0 : index
    %325 = vector.load %arg8[%c100_272, %c0_273] : memref<128x128xbf16, #tpu.memory_space<vmem>>, vector<4x128xbf16>
    tpu.vector_store %arg8[%c100_272, %c0_273], %324 {strides = array<i32>} : memref<128x128xbf16, #tpu.memory_space<vmem>>, vector<4x128xbf16>,
    %326 = vector.extract_strided_slice %309 {offsets = [0, 22], sizes = [4, 128], strides = [1, 1]} : vector<4x256xbf16> to vector<4x128xbf16>
    %c104_274 = arith.constant 104 : index
    %c0_275 = arith.constant 0 : index
    %327 = vector.load %arg8[%c104_274, %c0_275] : memref<128x128xbf16, #tpu.memory_space<vmem>>, vector<4x128xbf16>
    tpu.vector_store %arg8[%c104_274, %c0_275], %326 {strides = array<i32>} : memref<128x128xbf16, #tpu.memory_space<vmem>>, vector<4x128xbf16>,
    %c0_276 = arith.constant 0 : index
    %c0_277 = arith.constant 0 : index
    %328 = vector.load %arg8[%c0_276, %c0_277] : memref<128x128xbf16, #tpu.memory_space<vmem>>, vector<128x128xbf16>
    %cst_278 = arith.constant dense<0.000000e+00> : vector<8x128xf32>
    %329 = tpu.matmul %5, %328, %cst_278 {dimension_numbers = #tpu.dot_dimension_numbers<[1], [0], [0], [1], [0, 0, 1, 1], [], []>} : vector<8x128xbf16>, vector<128x128xbf16>, vector<8x128xf32> -> vector<8x128xf32>
    %c0_279 = arith.constant 0 : index
    %c0_280 = arith.constant 0 : index
    %c384 = arith.constant 384 : index
    %330 = vector.load %arg5[%c0_279, %c0_280, %c384] : memref<1x8x1024xf32, #tpu.memory_space<vmem>>, vector<1x8x128xf32>
    %331 = vector.shape_cast %330 : vector<1x8x128xf32> to vector<8x128xf32>
    %332 = vector.shape_cast %329 : vector<8x128xf32> to vector<1x8x128xf32>
    tpu.vector_store %arg5[%c0_279, %c0_280, %c384], %332 {strides = array<i32>} : memref<1x8x1024xf32, #tpu.memory_space<vmem>>, vector<1x8x128xf32>,
    %333 = vector.broadcast %6 : vector<1x128xf32> to vector<8x128xf32>
    %334 = arith.mulf %329, %333 : vector<8x128xf32>
    %cst_281 = arith.constant dense<0.000000e+00> : vector<8xf32>
    %335 = vector.multi_reduction <add>, %334, %cst_281 [1] : vector<8x128xf32> to vector<8xf32>
    %336 = vector.shape_cast %335 : vector<8xf32> to vector<8x1xf32>
    %337 = arith.addf %254, %336 : vector<8x1xf32>
    %338 = arith.mulf %329, %334 : vector<8x128xf32>
    %cst_282 = arith.constant dense<0.000000e+00> : vector<8xf32>
    %339 = vector.multi_reduction <add>, %338, %cst_282 [1] : vector<8x128xf32> to vector<8xf32>
    %340 = vector.shape_cast %339 : vector<8xf32> to vector<8x1xf32>
    %341 = arith.addf %258, %340 : vector<8x1xf32>
    %c4_i32 = arith.constant 4 : i32
    %342 = arith.addi %7, %c4_i32 : i32
    %c0_i32_283 = arith.constant 0 : i32
    %343 = arith.addi %342, %c0_i32_283 : i32
    %c0_284 = arith.constant 0 : index
    %344 = arith.index_cast %343 : i32 to index
    %c0_285 = arith.constant 0 : index
    %c0_286 = arith.constant 0 : index
    %345 = vector.load %arg2[%c0_284, %344, %c0_285, %c0_286] : memref<1x10x4x256xbf16, #tpu.memory_space<vmem>>, vector<1x1x4x256xbf16>
    %346 = vector.shape_cast %345 : vector<1x1x4x256xbf16> to vector<4x256xbf16>
    %347 = vector.extract_strided_slice %346 {offsets = [0, 0], sizes = [4, 128], strides = [1, 1]} : vector<4x256xbf16> to vector<4x128xbf16>
    %c0_287 = arith.constant 0 : index
    %c0_288 = arith.constant 0 : index
    %348 = vector.load %arg8[%c0_287, %c0_288] : memref<128x128xbf16, #tpu.memory_space<vmem>>, vector<4x128xbf16>
    tpu.vector_store %arg8[%c0_287, %c0_288], %347 {strides = array<i32>} : memref<128x128xbf16, #tpu.memory_space<vmem>>, vector<4x128xbf16>,
    %349 = vector.extract_strided_slice %346 {offsets = [0, 1], sizes = [4, 128], strides = [1, 1]} : vector<4x256xbf16> to vector<4x128xbf16>
    %c4_289 = arith.constant 4 : index
    %c0_290 = arith.constant 0 : index
    %350 = vector.load %arg8[%c4_289, %c0_290] : memref<128x128xbf16, #tpu.memory_space<vmem>>, vector<4x128xbf16>
    tpu.vector_store %arg8[%c4_289, %c0_290], %349 {strides = array<i32>} : memref<128x128xbf16, #tpu.memory_space<vmem>>, vector<4x128xbf16>,
    %351 = vector.extract_strided_slice %346 {offsets = [0, 2], sizes = [4, 128], strides = [1, 1]} : vector<4x256xbf16> to vector<4x128xbf16>
    %c8_291 = arith.constant 8 : index
    %c0_292 = arith.constant 0 : index
    %352 = vector.load %arg8[%c8_291, %c0_292] : memref<128x128xbf16, #tpu.memory_space<vmem>>, vector<4x128xbf16>
    tpu.vector_store %arg8[%c8_291, %c0_292], %351 {strides = array<i32>} : memref<128x128xbf16, #tpu.memory_space<vmem>>, vector<4x128xbf16>,
    %353 = vector.extract_strided_slice %346 {offsets = [0, 10], sizes = [4, 128], strides = [1, 1]} : vector<4x256xbf16> to vector<4x128xbf16>
    %c12_293 = arith.constant 12 : index
    %c0_294 = arith.constant 0 : index
    %354 = vector.load %arg8[%c12_293, %c0_294] : memref<128x128xbf16, #tpu.memory_space<vmem>>, vector<4x128xbf16>
    tpu.vector_store %arg8[%c12_293, %c0_294], %353 {strides = array<i32>} : memref<128x128xbf16, #tpu.memory_space<vmem>>, vector<4x128xbf16>,
    %355 = vector.extract_strided_slice %346 {offsets = [0, 11], sizes = [4, 128], strides = [1, 1]} : vector<4x256xbf16> to vector<4x128xbf16>
    %c16_295 = arith.constant 16 : index
    %c0_296 = arith.constant 0 : index
    %356 = vector.load %arg8[%c16_295, %c0_296] : memref<128x128xbf16, #tpu.memory_space<vmem>>, vector<4x128xbf16>
    tpu.vector_store %arg8[%c16_295, %c0_296], %355 {strides = array<i32>} : memref<128x128xbf16, #tpu.memory_space<vmem>>, vector<4x128xbf16>,
    %357 = vector.extract_strided_slice %346 {offsets = [0, 12], sizes = [4, 128], strides = [1, 1]} : vector<4x256xbf16> to vector<4x128xbf16>
    %c20_297 = arith.constant 20 : index
    %c0_298 = arith.constant 0 : index
    %358 = vector.load %arg8[%c20_297, %c0_298] : memref<128x128xbf16, #tpu.memory_space<vmem>>, vector<4x128xbf16>
    tpu.vector_store %arg8[%c20_297, %c0_298], %357 {strides = array<i32>} : memref<128x128xbf16, #tpu.memory_space<vmem>>, vector<4x128xbf16>,
    %359 = vector.extract_strided_slice %346 {offsets = [0, 20], sizes = [4, 128], strides = [1, 1]} : vector<4x256xbf16> to vector<4x128xbf16>
    %c24_299 = arith.constant 24 : index
    %c0_300 = arith.constant 0 : index
    %360 = vector.load %arg8[%c24_299, %c0_300] : memref<128x128xbf16, #tpu.memory_space<vmem>>, vector<4x128xbf16>
    tpu.vector_store %arg8[%c24_299, %c0_300], %359 {strides = array<i32>} : memref<128x128xbf16, #tpu.memory_space<vmem>>, vector<4x128xbf16>,
    %361 = vector.extract_strided_slice %346 {offsets = [0, 21], sizes = [4, 128], strides = [1, 1]} : vector<4x256xbf16> to vector<4x128xbf16>
    %c28_301 = arith.constant 28 : index
    %c0_302 = arith.constant 0 : index
    %362 = vector.load %arg8[%c28_301, %c0_302] : memref<128x128xbf16, #tpu.memory_space<vmem>>, vector<4x128xbf16>
    tpu.vector_store %arg8[%c28_301, %c0_302], %361 {strides = array<i32>} : memref<128x128xbf16, #tpu.memory_space<vmem>>, vector<4x128xbf16>,
    %363 = vector.extract_strided_slice %346 {offsets = [0, 22], sizes = [4, 128], strides = [1, 1]} : vector<4x256xbf16> to vector<4x128xbf16>
    %c32_303 = arith.constant 32 : index
    %c0_304 = arith.constant 0 : index
    %364 = vector.load %arg8[%c32_303, %c0_304] : memref<128x128xbf16, #tpu.memory_space<vmem>>, vector<4x128xbf16>
    tpu.vector_store %arg8[%c32_303, %c0_304], %363 {strides = array<i32>} : memref<128x128xbf16, #tpu.memory_space<vmem>>, vector<4x128xbf16>,
    %c4_i32_305 = arith.constant 4 : i32
    %365 = arith.addi %7, %c4_i32_305 : i32
    %c1_i32_306 = arith.constant 1 : i32
    %366 = arith.addi %365, %c1_i32_306 : i32
    %c0_307 = arith.constant 0 : index
    %367 = arith.index_cast %366 : i32 to index
    %c0_308 = arith.constant 0 : index
    %c0_309 = arith.constant 0 : index
    %368 = vector.load %arg2[%c0_307, %367, %c0_308, %c0_309] : memref<1x10x4x256xbf16, #tpu.memory_space<vmem>>, vector<1x1x4x256xbf16>
    %369 = vector.shape_cast %368 : vector<1x1x4x256xbf16> to vector<4x256xbf16>
    %370 = vector.extract_strided_slice %369 {offsets = [0, 0], sizes = [4, 128], strides = [1, 1]} : vector<4x256xbf16> to vector<4x128xbf16>
    %c36_310 = arith.constant 36 : index
    %c0_311 = arith.constant 0 : index
    %371 = vector.load %arg8[%c36_310, %c0_311] : memref<128x128xbf16, #tpu.memory_space<vmem>>, vector<4x128xbf16>
    tpu.vector_store %arg8[%c36_310, %c0_311], %370 {strides = array<i32>} : memref<128x128xbf16, #tpu.memory_space<vmem>>, vector<4x128xbf16>,
    %372 = vector.extract_strided_slice %369 {offsets = [0, 1], sizes = [4, 128], strides = [1, 1]} : vector<4x256xbf16> to vector<4x128xbf16>
    %c40_312 = arith.constant 40 : index
    %c0_313 = arith.constant 0 : index
    %373 = vector.load %arg8[%c40_312, %c0_313] : memref<128x128xbf16, #tpu.memory_space<vmem>>, vector<4x128xbf16>
    tpu.vector_store %arg8[%c40_312, %c0_313], %372 {strides = array<i32>} : memref<128x128xbf16, #tpu.memory_space<vmem>>, vector<4x128xbf16>,
    %374 = vector.extract_strided_slice %369 {offsets = [0, 2], sizes = [4, 128], strides = [1, 1]} : vector<4x256xbf16> to vector<4x128xbf16>
    %c44_314 = arith.constant 44 : index
    %c0_315 = arith.constant 0 : index
    %375 = vector.load %arg8[%c44_314, %c0_315] : memref<128x128xbf16, #tpu.memory_space<vmem>>, vector<4x128xbf16>
    tpu.vector_store %arg8[%c44_314, %c0_315], %374 {strides = array<i32>} : memref<128x128xbf16, #tpu.memory_space<vmem>>, vector<4x128xbf16>,
    %376 = vector.extract_strided_slice %369 {offsets = [0, 10], sizes = [4, 128], strides = [1, 1]} : vector<4x256xbf16> to vector<4x128xbf16>
    %c48_316 = arith.constant 48 : index
    %c0_317 = arith.constant 0 : index
    %377 = vector.load %arg8[%c48_316, %c0_317] : memref<128x128xbf16, #tpu.memory_space<vmem>>, vector<4x128xbf16>
    tpu.vector_store %arg8[%c48_316, %c0_317], %376 {strides = array<i32>} : memref<128x128xbf16, #tpu.memory_space<vmem>>, vector<4x128xbf16>,
    %378 = vector.extract_strided_slice %369 {offsets = [0, 11], sizes = [4, 128], strides = [1, 1]} : vector<4x256xbf16> to vector<4x128xbf16>
    %c52_318 = arith.constant 52 : index
    %c0_319 = arith.constant 0 : index
    %379 = vector.load %arg8[%c52_318, %c0_319] : memref<128x128xbf16, #tpu.memory_space<vmem>>, vector<4x128xbf16>
    tpu.vector_store %arg8[%c52_318, %c0_319], %378 {strides = array<i32>} : memref<128x128xbf16, #tpu.memory_space<vmem>>, vector<4x128xbf16>,
    %380 = vector.extract_strided_slice %369 {offsets = [0, 12], sizes = [4, 128], strides = [1, 1]} : vector<4x256xbf16> to vector<4x128xbf16>
    %c56_320 = arith.constant 56 : index
    %c0_321 = arith.constant 0 : index
    %381 = vector.load %arg8[%c56_320, %c0_321] : memref<128x128xbf16, #tpu.memory_space<vmem>>, vector<4x128xbf16>
    tpu.vector_store %arg8[%c56_320, %c0_321], %380 {strides = array<i32>} : memref<128x128xbf16, #tpu.memory_space<vmem>>, vector<4x128xbf16>,
    %382 = vector.extract_strided_slice %369 {offsets = [0, 20], sizes = [4, 128], strides = [1, 1]} : vector<4x256xbf16> to vector<4x128xbf16>
    %c60_322 = arith.constant 60 : index
    %c0_323 = arith.constant 0 : index
    %383 = vector.load %arg8[%c60_322, %c0_323] : memref<128x128xbf16, #tpu.memory_space<vmem>>, vector<4x128xbf16>
    tpu.vector_store %arg8[%c60_322, %c0_323], %382 {strides = array<i32>} : memref<128x128xbf16, #tpu.memory_space<vmem>>, vector<4x128xbf16>,
    %384 = vector.extract_strided_slice %369 {offsets = [0, 21], sizes = [4, 128], strides = [1, 1]} : vector<4x256xbf16> to vector<4x128xbf16>
    %c64_324 = arith.constant 64 : index
    %c0_325 = arith.constant 0 : index
    %385 = vector.load %arg8[%c64_324, %c0_325] : memref<128x128xbf16, #tpu.memory_space<vmem>>, vector<4x128xbf16>
    tpu.vector_store %arg8[%c64_324, %c0_325], %384 {strides = array<i32>} : memref<128x128xbf16, #tpu.memory_space<vmem>>, vector<4x128xbf16>,
    %386 = vector.extract_strided_slice %369 {offsets = [0, 22], sizes = [4, 128], strides = [1, 1]} : vector<4x256xbf16> to vector<4x128xbf16>
    %c68_326 = arith.constant 68 : index
    %c0_327 = arith.constant 0 : index
    %387 = vector.load %arg8[%c68_326, %c0_327] : memref<128x128xbf16, #tpu.memory_space<vmem>>, vector<4x128xbf16>
    tpu.vector_store %arg8[%c68_326, %c0_327], %386 {strides = array<i32>} : memref<128x128xbf16, #tpu.memory_space<vmem>>, vector<4x128xbf16>,
    %c4_i32_328 = arith.constant 4 : i32
    %388 = arith.addi %7, %c4_i32_328 : i32
    %c2_i32_329 = arith.constant 2 : i32
    %389 = arith.addi %388, %c2_i32_329 : i32
    %c0_330 = arith.constant 0 : index
    %390 = arith.index_cast %389 : i32 to index
    %c0_331 = arith.constant 0 : index
    %c0_332 = arith.constant 0 : index
    %391 = vector.load %arg2[%c0_330, %390, %c0_331, %c0_332] : memref<1x10x4x256xbf16, #tpu.memory_space<vmem>>, vector<1x1x4x256xbf16>
    %392 = vector.shape_cast %391 : vector<1x1x4x256xbf16> to vector<4x256xbf16>
    %393 = vector.extract_strided_slice %392 {offsets = [0, 0], sizes = [4, 128], strides = [1, 1]} : vector<4x256xbf16> to vector<4x128xbf16>
    %c72_333 = arith.constant 72 : index
    %c0_334 = arith.constant 0 : index
    %394 = vector.load %arg8[%c72_333, %c0_334] : memref<128x128xbf16, #tpu.memory_space<vmem>>, vector<4x128xbf16>
    tpu.vector_store %arg8[%c72_333, %c0_334], %393 {strides = array<i32>} : memref<128x128xbf16, #tpu.memory_space<vmem>>, vector<4x128xbf16>,
    %395 = vector.extract_strided_slice %392 {offsets = [0, 1], sizes = [4, 128], strides = [1, 1]} : vector<4x256xbf16> to vector<4x128xbf16>
    %c76_335 = arith.constant 76 : index
    %c0_336 = arith.constant 0 : index
    %396 = vector.load %arg8[%c76_335, %c0_336] : memref<128x128xbf16, #tpu.memory_space<vmem>>, vector<4x128xbf16>
    tpu.vector_store %arg8[%c76_335, %c0_336], %395 {strides = array<i32>} : memref<128x128xbf16, #tpu.memory_space<vmem>>, vector<4x128xbf16>,
    %397 = vector.extract_strided_slice %392 {offsets = [0, 2], sizes = [4, 128], strides = [1, 1]} : vector<4x256xbf16> to vector<4x128xbf16>
    %c80_337 = arith.constant 80 : index
    %c0_338 = arith.constant 0 : index
    %398 = vector.load %arg8[%c80_337, %c0_338] : memref<128x128xbf16, #tpu.memory_space<vmem>>, vector<4x128xbf16>
    tpu.vector_store %arg8[%c80_337, %c0_338], %397 {strides = array<i32>} : memref<128x128xbf16, #tpu.memory_space<vmem>>, vector<4x128xbf16>,
    %399 = vector.extract_strided_slice %392 {offsets = [0, 10], sizes = [4, 128], strides = [1, 1]} : vector<4x256xbf16> to vector<4x128xbf16>
    %c84_339 = arith.constant 84 : index
    %c0_340 = arith.constant 0 : index
    %400 = vector.load %arg8[%c84_339, %c0_340] : memref<128x128xbf16, #tpu.memory_space<vmem>>, vector<4x128xbf16>
    tpu.vector_store %arg8[%c84_339, %c0_340], %399 {strides = array<i32>} : memref<128x128xbf16, #tpu.memory_space<vmem>>, vector<4x128xbf16>,
    %401 = vector.extract_strided_slice %392 {offsets = [0, 11], sizes = [4, 128], strides = [1, 1]} : vector<4x256xbf16> to vector<4x128xbf16>
    %c88_341 = arith.constant 88 : index
    %c0_342 = arith.constant 0 : index
    %402 = vector.load %arg8[%c88_341, %c0_342] : memref<128x128xbf16, #tpu.memory_space<vmem>>, vector<4x128xbf16>
    tpu.vector_store %arg8[%c88_341, %c0_342], %401 {strides = array<i32>} : memref<128x128xbf16, #tpu.memory_space<vmem>>, vector<4x128xbf16>,
    %403 = vector.extract_strided_slice %392 {offsets = [0, 12], sizes = [4, 128], strides = [1, 1]} : vector<4x256xbf16> to vector<4x128xbf16>
    %c92_343 = arith.constant 92 : index
    %c0_344 = arith.constant 0 : index
    %404 = vector.load %arg8[%c92_343, %c0_344] : memref<128x128xbf16, #tpu.memory_space<vmem>>, vector<4x128xbf16>
    tpu.vector_store %arg8[%c92_343, %c0_344], %403 {strides = array<i32>} : memref<128x128xbf16, #tpu.memory_space<vmem>>, vector<4x128xbf16>,
    %405 = vector.extract_strided_slice %392 {offsets = [0, 20], sizes = [4, 128], strides = [1, 1]} : vector<4x256xbf16> to vector<4x128xbf16>
    %c96_345 = arith.constant 96 : index
    %c0_346 = arith.constant 0 : index
    %406 = vector.load %arg8[%c96_345, %c0_346] : memref<128x128xbf16, #tpu.memory_space<vmem>>, vector<4x128xbf16>
    tpu.vector_store %arg8[%c96_345, %c0_346], %405 {strides = array<i32>} : memref<128x128xbf16, #tpu.memory_space<vmem>>, vector<4x128xbf16>,
    %407 = vector.extract_strided_slice %392 {offsets = [0, 21], sizes = [4, 128], strides = [1, 1]} : vector<4x256xbf16> to vector<4x128xbf16>
    %c100_347 = arith.constant 100 : index
    %c0_348 = arith.constant 0 : index
    %408 = vector.load %arg8[%c100_347, %c0_348] : memref<128x128xbf16, #tpu.memory_space<vmem>>, vector<4x128xbf16>
    tpu.vector_store %arg8[%c100_347, %c0_348], %407 {strides = array<i32>} : memref<128x128xbf16, #tpu.memory_space<vmem>>, vector<4x128xbf16>,
    %409 = vector.extract_strided_slice %392 {offsets = [0, 22], sizes = [4, 128], strides = [1, 1]} : vector<4x256xbf16> to vector<4x128xbf16>
    %c104_349 = arith.constant 104 : index
    %c0_350 = arith.constant 0 : index
    %410 = vector.load %arg8[%c104_349, %c0_350] : memref<128x128xbf16, #tpu.memory_space<vmem>>, vector<4x128xbf16>
    tpu.vector_store %arg8[%c104_349, %c0_350], %409 {strides = array<i32>} : memref<128x128xbf16, #tpu.memory_space<vmem>>, vector<4x128xbf16>,
    %c0_351 = arith.constant 0 : index
    %c0_352 = arith.constant 0 : index
    %411 = vector.load %arg8[%c0_351, %c0_352] : memref<128x128xbf16, #tpu.memory_space<vmem>>, vector<128x128xbf16>
    %cst_353 = arith.constant dense<0.000000e+00> : vector<8x128xf32>
    %412 = tpu.matmul %5, %411, %cst_353 {dimension_numbers = #tpu.dot_dimension_numbers<[1], [0], [0], [1], [0, 0, 1, 1], [], []>} : vector<8x128xbf16>, vector<128x128xbf16>, vector<8x128xf32> -> vector<8x128xf32>
    %c0_354 = arith.constant 0 : index
    %c0_355 = arith.constant 0 : index
    %c512 = arith.constant 512 : index
    %413 = vector.load %arg5[%c0_354, %c0_355, %c512] : memref<1x8x1024xf32, #tpu.memory_space<vmem>>, vector<1x8x128xf32>
    %414 = vector.shape_cast %413 : vector<1x8x128xf32> to vector<8x128xf32>
    %415 = vector.shape_cast %412 : vector<8x128xf32> to vector<1x8x128xf32>
    tpu.vector_store %arg5[%c0_354, %c0_355, %c512], %415 {strides = array<i32>} : memref<1x8x1024xf32, #tpu.memory_space<vmem>>, vector<1x8x128xf32>,
    %416 = vector.broadcast %6 : vector<1x128xf32> to vector<8x128xf32>
    %417 = arith.mulf %412, %416 : vector<8x128xf32>
    %cst_356 = arith.constant dense<0.000000e+00> : vector<8xf32>
    %418 = vector.multi_reduction <add>, %417, %cst_356 [1] : vector<8x128xf32> to vector<8xf32>
    %419 = vector.shape_cast %418 : vector<8xf32> to vector<8x1xf32>
    %420 = arith.addf %337, %419 : vector<8x1xf32>
    %421 = arith.mulf %412, %417 : vector<8x128xf32>
    %cst_357 = arith.constant dense<0.000000e+00> : vector<8xf32>
    %422 = vector.multi_reduction <add>, %421, %cst_357 [1] : vector<8x128xf32> to vector<8xf32>
    %423 = vector.shape_cast %422 : vector<8xf32> to vector<8x1xf32>
    %424 = arith.addf %341, %423 : vector<8x1xf32>
    %c5_i32 = arith.constant 5 : i32
    %425 = arith.addi %7, %c5_i32 : i32
    %c0_i32_358 = arith.constant 0 : i32
    %426 = arith.addi %425, %c0_i32_358 : i32
    %c0_359 = arith.constant 0 : index
    %427 = arith.index_cast %426 : i32 to index
    %c0_360 = arith.constant 0 : index
    %c0_361 = arith.constant 0 : index
    %428 = vector.load %arg2[%c0_359, %427, %c0_360, %c0_361] : memref<1x10x4x256xbf16, #tpu.memory_space<vmem>>, vector<1x1x4x256xbf16>
    %429 = vector.shape_cast %428 : vector<1x1x4x256xbf16> to vector<4x256xbf16>
    %430 = vector.extract_strided_slice %429 {offsets = [0, 0], sizes = [4, 128], strides = [1, 1]} : vector<4x256xbf16> to vector<4x128xbf16>
    %c0_362 = arith.constant 0 : index
    %c0_363 = arith.constant 0 : index
    %431 = vector.load %arg8[%c0_362, %c0_363] : memref<128x128xbf16, #tpu.memory_space<vmem>>, vector<4x128xbf16>
    tpu.vector_store %arg8[%c0_362, %c0_363], %430 {strides = array<i32>} : memref<128x128xbf16, #tpu.memory_space<vmem>>, vector<4x128xbf16>,
    %432 = vector.extract_strided_slice %429 {offsets = [0, 1], sizes = [4, 128], strides = [1, 1]} : vector<4x256xbf16> to vector<4x128xbf16>
    %c4_364 = arith.constant 4 : index
    %c0_365 = arith.constant 0 : index
    %433 = vector.load %arg8[%c4_364, %c0_365] : memref<128x128xbf16, #tpu.memory_space<vmem>>, vector<4x128xbf16>
    tpu.vector_store %arg8[%c4_364, %c0_365], %432 {strides = array<i32>} : memref<128x128xbf16, #tpu.memory_space<vmem>>, vector<4x128xbf16>,
    %434 = vector.extract_strided_slice %429 {offsets = [0, 2], sizes = [4, 128], strides = [1, 1]} : vector<4x256xbf16> to vector<4x128xbf16>
    %c8_366 = arith.constant 8 : index
    %c0_367 = arith.constant 0 : index
    %435 = vector.load %arg8[%c8_366, %c0_367] : memref<128x128xbf16, #tpu.memory_space<vmem>>, vector<4x128xbf16>
    tpu.vector_store %arg8[%c8_366, %c0_367], %434 {strides = array<i32>} : memref<128x128xbf16, #tpu.memory_space<vmem>>, vector<4x128xbf16>,
    %436 = vector.extract_strided_slice %429 {offsets = [0, 10], sizes = [4, 128], strides = [1, 1]} : vector<4x256xbf16> to vector<4x128xbf16>
    %c12_368 = arith.constant 12 : index
    %c0_369 = arith.constant 0 : index
    %437 = vector.load %arg8[%c12_368, %c0_369] : memref<128x128xbf16, #tpu.memory_space<vmem>>, vector<4x128xbf16>
    tpu.vector_store %arg8[%c12_368, %c0_369], %436 {strides = array<i32>} : memref<128x128xbf16, #tpu.memory_space<vmem>>, vector<4x128xbf16>,
    %438 = vector.extract_strided_slice %429 {offsets = [0, 11], sizes = [4, 128], strides = [1, 1]} : vector<4x256xbf16> to vector<4x128xbf16>
    %c16_370 = arith.constant 16 : index
    %c0_371 = arith.constant 0 : index
    %439 = vector.load %arg8[%c16_370, %c0_371] : memref<128x128xbf16, #tpu.memory_space<vmem>>, vector<4x128xbf16>
    tpu.vector_store %arg8[%c16_370, %c0_371], %438 {strides = array<i32>} : memref<128x128xbf16, #tpu.memory_space<vmem>>, vector<4x128xbf16>,
    %440 = vector.extract_strided_slice %429 {offsets = [0, 12], sizes = [4, 128], strides = [1, 1]} : vector<4x256xbf16> to vector<4x128xbf16>
    %c20_372 = arith.constant 20 : index
    %c0_373 = arith.constant 0 : index
    %441 = vector.load %arg8[%c20_372, %c0_373] : memref<128x128xbf16, #tpu.memory_space<vmem>>, vector<4x128xbf16>
    tpu.vector_store %arg8[%c20_372, %c0_373], %440 {strides = array<i32>} : memref<128x128xbf16, #tpu.memory_space<vmem>>, vector<4x128xbf16>,
    %442 = vector.extract_strided_slice %429 {offsets = [0, 20], sizes = [4, 128], strides = [1, 1]} : vector<4x256xbf16> to vector<4x128xbf16>
    %c24_374 = arith.constant 24 : index
    %c0_375 = arith.constant 0 : index
    %443 = vector.load %arg8[%c24_374, %c0_375] : memref<128x128xbf16, #tpu.memory_space<vmem>>, vector<4x128xbf16>
    tpu.vector_store %arg8[%c24_374, %c0_375], %442 {strides = array<i32>} : memref<128x128xbf16, #tpu.memory_space<vmem>>, vector<4x128xbf16>,
    %444 = vector.extract_strided_slice %429 {offsets = [0, 21], sizes = [4, 128], strides = [1, 1]} : vector<4x256xbf16> to vector<4x128xbf16>
    %c28_376 = arith.constant 28 : index
    %c0_377 = arith.constant 0 : index
    %445 = vector.load %arg8[%c28_376, %c0_377] : memref<128x128xbf16, #tpu.memory_space<vmem>>, vector<4x128xbf16>
    tpu.vector_store %arg8[%c28_376, %c0_377], %444 {strides = array<i32>} : memref<128x128xbf16, #tpu.memory_space<vmem>>, vector<4x128xbf16>,
    %446 = vector.extract_strided_slice %429 {offsets = [0, 22], sizes = [4, 128], strides = [1, 1]} : vector<4x256xbf16> to vector<4x128xbf16>
    %c32_378 = arith.constant 32 : index
    %c0_379 = arith.constant 0 : index
    %447 = vector.load %arg8[%c32_378, %c0_379] : memref<128x128xbf16, #tpu.memory_space<vmem>>, vector<4x128xbf16>
    tpu.vector_store %arg8[%c32_378, %c0_379], %446 {strides = array<i32>} : memref<128x128xbf16, #tpu.memory_space<vmem>>, vector<4x128xbf16>,
    %c5_i32_380 = arith.constant 5 : i32
    %448 = arith.addi %7, %c5_i32_380 : i32
    %c1_i32_381 = arith.constant 1 : i32
    %449 = arith.addi %448, %c1_i32_381 : i32
    %c0_382 = arith.constant 0 : index
    %450 = arith.index_cast %449 : i32 to index
    %c0_383 = arith.constant 0 : index
    %c0_384 = arith.constant 0 : index
    %451 = vector.load %arg2[%c0_382, %450, %c0_383, %c0_384] : memref<1x10x4x256xbf16, #tpu.memory_space<vmem>>, vector<1x1x4x256xbf16>
    %452 = vector.shape_cast %451 : vector<1x1x4x256xbf16> to vector<4x256xbf16>
    %453 = vector.extract_strided_slice %452 {offsets = [0, 0], sizes = [4, 128], strides = [1, 1]} : vector<4x256xbf16> to vector<4x128xbf16>
    %c36_385 = arith.constant 36 : index
    %c0_386 = arith.constant 0 : index
    %454 = vector.load %arg8[%c36_385, %c0_386] : memref<128x128xbf16, #tpu.memory_space<vmem>>, vector<4x128xbf16>
    tpu.vector_store %arg8[%c36_385, %c0_386], %453 {strides = array<i32>} : memref<128x128xbf16, #tpu.memory_space<vmem>>, vector<4x128xbf16>,
    %455 = vector.extract_strided_slice %452 {offsets = [0, 1], sizes = [4, 128], strides = [1, 1]} : vector<4x256xbf16> to vector<4x128xbf16>
    %c40_387 = arith.constant 40 : index
    %c0_388 = arith.constant 0 : index
    %456 = vector.load %arg8[%c40_387, %c0_388] : memref<128x128xbf16, #tpu.memory_space<vmem>>, vector<4x128xbf16>
    tpu.vector_store %arg8[%c40_387, %c0_388], %455 {strides = array<i32>} : memref<128x128xbf16, #tpu.memory_space<vmem>>, vector<4x128xbf16>,
    %457 = vector.extract_strided_slice %452 {offsets = [0, 2], sizes = [4, 128], strides = [1, 1]} : vector<4x256xbf16> to vector<4x128xbf16>
    %c44_389 = arith.constant 44 : index
    %c0_390 = arith.constant 0 : index
    %458 = vector.load %arg8[%c44_389, %c0_390] : memref<128x128xbf16, #tpu.memory_space<vmem>>, vector<4x128xbf16>
    tpu.vector_store %arg8[%c44_389, %c0_390], %457 {strides = array<i32>} : memref<128x128xbf16, #tpu.memory_space<vmem>>, vector<4x128xbf16>,
    %459 = vector.extract_strided_slice %452 {offsets = [0, 10], sizes = [4, 128], strides = [1, 1]} : vector<4x256xbf16> to vector<4x128xbf16>
    %c48_391 = arith.constant 48 : index
    %c0_392 = arith.constant 0 : index
    %460 = vector.load %arg8[%c48_391, %c0_392] : memref<128x128xbf16, #tpu.memory_space<vmem>>, vector<4x128xbf16>
    tpu.vector_store %arg8[%c48_391, %c0_392], %459 {strides = array<i32>} : memref<128x128xbf16, #tpu.memory_space<vmem>>, vector<4x128xbf16>,
    %461 = vector.extract_strided_slice %452 {offsets = [0, 11], sizes = [4, 128], strides = [1, 1]} : vector<4x256xbf16> to vector<4x128xbf16>
    %c52_393 = arith.constant 52 : index
    %c0_394 = arith.constant 0 : index
    %462 = vector.load %arg8[%c52_393, %c0_394] : memref<128x128xbf16, #tpu.memory_space<vmem>>, vector<4x128xbf16>
    tpu.vector_store %arg8[%c52_393, %c0_394], %461 {strides = array<i32>} : memref<128x128xbf16, #tpu.memory_space<vmem>>, vector<4x128xbf16>,
    %463 = vector.extract_strided_slice %452 {offsets = [0, 12], sizes = [4, 128], strides = [1, 1]} : vector<4x256xbf16> to vector<4x128xbf16>
    %c56_395 = arith.constant 56 : index
    %c0_396 = arith.constant 0 : index
    %464 = vector.load %arg8[%c56_395, %c0_396] : memref<128x128xbf16, #tpu.memory_space<vmem>>, vector<4x128xbf16>
    tpu.vector_store %arg8[%c56_395, %c0_396], %463 {strides = array<i32>} : memref<128x128xbf16, #tpu.memory_space<vmem>>, vector<4x128xbf16>,
    %465 = vector.extract_strided_slice %452 {offsets = [0, 20], sizes = [4, 128], strides = [1, 1]} : vector<4x256xbf16> to vector<4x128xbf16>
    %c60_397 = arith.constant 60 : index
    %c0_398 = arith.constant 0 : index
    %466 = vector.load %arg8[%c60_397, %c0_398] : memref<128x128xbf16, #tpu.memory_space<vmem>>, vector<4x128xbf16>
    tpu.vector_store %arg8[%c60_397, %c0_398], %465 {strides = array<i32>} : memref<128x128xbf16, #tpu.memory_space<vmem>>, vector<4x128xbf16>,
    %467 = vector.extract_strided_slice %452 {offsets = [0, 21], sizes = [4, 128], strides = [1, 1]} : vector<4x256xbf16> to vector<4x128xbf16>
    %c64_399 = arith.constant 64 : index
    %c0_400 = arith.constant 0 : index
    %468 = vector.load %arg8[%c64_399, %c0_400] : memref<128x128xbf16, #tpu.memory_space<vmem>>, vector<4x128xbf16>
    tpu.vector_store %arg8[%c64_399, %c0_400], %467 {strides = array<i32>} : memref<128x128xbf16, #tpu.memory_space<vmem>>, vector<4x128xbf16>,
    %469 = vector.extract_strided_slice %452 {offsets = [0, 22], sizes = [4, 128], strides = [1, 1]} : vector<4x256xbf16> to vector<4x128xbf16>
    %c68_401 = arith.constant 68 : index
    %c0_402 = arith.constant 0 : index
    %470 = vector.load %arg8[%c68_401, %c0_402] : memref<128x128xbf16, #tpu.memory_space<vmem>>, vector<4x128xbf16>
    tpu.vector_store %arg8[%c68_401, %c0_402], %469 {strides = array<i32>} : memref<128x128xbf16, #tpu.memory_space<vmem>>, vector<4x128xbf16>,
    %c5_i32_403 = arith.constant 5 : i32
    %471 = arith.addi %7, %c5_i32_403 : i32
    %c2_i32_404 = arith.constant 2 : i32
    %472 = arith.addi %471, %c2_i32_404 : i32
    %c0_405 = arith.constant 0 : index
    %473 = arith.index_cast %472 : i32 to index
    %c0_406 = arith.constant 0 : index
    %c0_407 = arith.constant 0 : index
    %474 = vector.load %arg2[%c0_405, %473, %c0_406, %c0_407] : memref<1x10x4x256xbf16, #tpu.memory_space<vmem>>, vector<1x1x4x256xbf16>
    %475 = vector.shape_cast %474 : vector<1x1x4x256xbf16> to vector<4x256xbf16>
    %476 = vector.extract_strided_slice %475 {offsets = [0, 0], sizes = [4, 128], strides = [1, 1]} : vector<4x256xbf16> to vector<4x128xbf16>
    %c72_408 = arith.constant 72 : index
    %c0_409 = arith.constant 0 : index
    %477 = vector.load %arg8[%c72_408, %c0_409] : memref<128x128xbf16, #tpu.memory_space<vmem>>, vector<4x128xbf16>
    tpu.vector_store %arg8[%c72_408, %c0_409], %476 {strides = array<i32>} : memref<128x128xbf16, #tpu.memory_space<vmem>>, vector<4x128xbf16>,
    %478 = vector.extract_strided_slice %475 {offsets = [0, 1], sizes = [4, 128], strides = [1, 1]} : vector<4x256xbf16> to vector<4x128xbf16>
    %c76_410 = arith.constant 76 : index
    %c0_411 = arith.constant 0 : index
    %479 = vector.load %arg8[%c76_410, %c0_411] : memref<128x128xbf16, #tpu.memory_space<vmem>>, vector<4x128xbf16>
    tpu.vector_store %arg8[%c76_410, %c0_411], %478 {strides = array<i32>} : memref<128x128xbf16, #tpu.memory_space<vmem>>, vector<4x128xbf16>,
    %480 = vector.extract_strided_slice %475 {offsets = [0, 2], sizes = [4, 128], strides = [1, 1]} : vector<4x256xbf16> to vector<4x128xbf16>
    %c80_412 = arith.constant 80 : index
    %c0_413 = arith.constant 0 : index
    %481 = vector.load %arg8[%c80_412, %c0_413] : memref<128x128xbf16, #tpu.memory_space<vmem>>, vector<4x128xbf16>
    tpu.vector_store %arg8[%c80_412, %c0_413], %480 {strides = array<i32>} : memref<128x128xbf16, #tpu.memory_space<vmem>>, vector<4x128xbf16>,
    %482 = vector.extract_strided_slice %475 {offsets = [0, 10], sizes = [4, 128], strides = [1, 1]} : vector<4x256xbf16> to vector<4x128xbf16>
    %c84_414 = arith.constant 84 : index
    %c0_415 = arith.constant 0 : index
    %483 = vector.load %arg8[%c84_414, %c0_415] : memref<128x128xbf16, #tpu.memory_space<vmem>>, vector<4x128xbf16>
    tpu.vector_store %arg8[%c84_414, %c0_415], %482 {strides = array<i32>} : memref<128x128xbf16, #tpu.memory_space<vmem>>, vector<4x128xbf16>,
    %484 = vector.extract_strided_slice %475 {offsets = [0, 11], sizes = [4, 128], strides = [1, 1]} : vector<4x256xbf16> to vector<4x128xbf16>
    %c88_416 = arith.constant 88 : index
    %c0_417 = arith.constant 0 : index
    %485 = vector.load %arg8[%c88_416, %c0_417] : memref<128x128xbf16, #tpu.memory_space<vmem>>, vector<4x128xbf16>
    tpu.vector_store %arg8[%c88_416, %c0_417], %484 {strides = array<i32>} : memref<128x128xbf16, #tpu.memory_space<vmem>>, vector<4x128xbf16>,
    %486 = vector.extract_strided_slice %475 {offsets = [0, 12], sizes = [4, 128], strides = [1, 1]} : vector<4x256xbf16> to vector<4x128xbf16>
    %c92_418 = arith.constant 92 : index
    %c0_419 = arith.constant 0 : index
    %487 = vector.load %arg8[%c92_418, %c0_419] : memref<128x128xbf16, #tpu.memory_space<vmem>>, vector<4x128xbf16>
    tpu.vector_store %arg8[%c92_418, %c0_419], %486 {strides = array<i32>} : memref<128x128xbf16, #tpu.memory_space<vmem>>, vector<4x128xbf16>,
    %488 = vector.extract_strided_slice %475 {offsets = [0, 20], sizes = [4, 128], strides = [1, 1]} : vector<4x256xbf16> to vector<4x128xbf16>
    %c96_420 = arith.constant 96 : index
    %c0_421 = arith.constant 0 : index
    %489 = vector.load %arg8[%c96_420, %c0_421] : memref<128x128xbf16, #tpu.memory_space<vmem>>, vector<4x128xbf16>
    tpu.vector_store %arg8[%c96_420, %c0_421], %488 {strides = array<i32>} : memref<128x128xbf16, #tpu.memory_space<vmem>>, vector<4x128xbf16>,
    %490 = vector.extract_strided_slice %475 {offsets = [0, 21], sizes = [4, 128], strides = [1, 1]} : vector<4x256xbf16> to vector<4x128xbf16>
    %c100_422 = arith.constant 100 : index
    %c0_423 = arith.constant 0 : index
    %491 = vector.load %arg8[%c100_422, %c0_423] : memref<128x128xbf16, #tpu.memory_space<vmem>>, vector<4x128xbf16>
    tpu.vector_store %arg8[%c100_422, %c0_423], %490 {strides = array<i32>} : memref<128x128xbf16, #tpu.memory_space<vmem>>, vector<4x128xbf16>,
    %492 = vector.extract_strided_slice %475 {offsets = [0, 22], sizes = [4, 128], strides = [1, 1]} : vector<4x256xbf16> to vector<4x128xbf16>
    %c104_424 = arith.constant 104 : index
    %c0_425 = arith.constant 0 : index
    %493 = vector.load %arg8[%c104_424, %c0_425] : memref<128x128xbf16, #tpu.memory_space<vmem>>, vector<4x128xbf16>
    tpu.vector_store %arg8[%c104_424, %c0_425], %492 {strides = array<i32>} : memref<128x128xbf16, #tpu.memory_space<vmem>>, vector<4x128xbf16>,
    %c0_426 = arith.constant 0 : index
    %c0_427 = arith.constant 0 : index
    %494 = vector.load %arg8[%c0_426, %c0_427] : memref<128x128xbf16, #tpu.memory_space<vmem>>, vector<128x128xbf16>
    %cst_428 = arith.constant dense<0.000000e+00> : vector<8x128xf32>
    %495 = tpu.matmul %5, %494, %cst_428 {dimension_numbers = #tpu.dot_dimension_numbers<[1], [0], [0], [1], [0, 0, 1, 1], [], []>} : vector<8x128xbf16>, vector<128x128xbf16>, vector<8x128xf32> -> vector<8x128xf32>
    %c0_429 = arith.constant 0 : index
    %c0_430 = arith.constant 0 : index
    %c640 = arith.constant 640 : index
    %496 = vector.load %arg5[%c0_429, %c0_430, %c640] : memref<1x8x1024xf32, #tpu.memory_space<vmem>>, vector<1x8x128xf32>
    %497 = vector.shape_cast %496 : vector<1x8x128xf32> to vector<8x128xf32>
    %498 = vector.shape_cast %495 : vector<8x128xf32> to vector<1x8x128xf32>
    tpu.vector_store %arg5[%c0_429, %c0_430, %c640], %498 {strides = array<i32>} : memref<1x8x1024xf32, #tpu.memory_space<vmem>>, vector<1x8x128xf32>,
    %499 = vector.broadcast %6 : vector<1x128xf32> to vector<8x128xf32>
    %500 = arith.mulf %495, %499 : vector<8x128xf32>
    %cst_431 = arith.constant dense<0.000000e+00> : vector<8xf32>
    %501 = vector.multi_reduction <add>, %500, %cst_431 [1] : vector<8x128xf32> to vector<8xf32>
    %502 = vector.shape_cast %501 : vector<8xf32> to vector<8x1xf32>
    %503 = arith.addf %420, %502 : vector<8x1xf32>
    %504 = arith.mulf %495, %500 : vector<8x128xf32>
    %cst_432 = arith.constant dense<0.000000e+00> : vector<8xf32>
    %505 = vector.multi_reduction <add>, %504, %cst_432 [1] : vector<8x128xf32> to vector<8xf32>
    %506 = vector.shape_cast %505 : vector<8xf32> to vector<8x1xf32>
    %507 = arith.addf %424, %506 : vector<8x1xf32>
    %c6_i32 = arith.constant 6 : i32
    %508 = arith.addi %7, %c6_i32 : i32
    %c0_i32_433 = arith.constant 0 : i32
    %509 = arith.addi %508, %c0_i32_433 : i32
    %c0_434 = arith.constant 0 : index
    %510 = arith.index_cast %509 : i32 to index
    %c0_435 = arith.constant 0 : index
    %c0_436 = arith.constant 0 : index
    %511 = vector.load %arg2[%c0_434, %510, %c0_435, %c0_436] : memref<1x10x4x256xbf16, #tpu.memory_space<vmem>>, vector<1x1x4x256xbf16>
    %512 = vector.shape_cast %511 : vector<1x1x4x256xbf16> to vector<4x256xbf16>
    %513 = vector.extract_strided_slice %512 {offsets = [0, 0], sizes = [4, 128], strides = [1, 1]} : vector<4x256xbf16> to vector<4x128xbf16>
    %c0_437 = arith.constant 0 : index
    %c0_438 = arith.constant 0 : index
    %514 = vector.load %arg8[%c0_437, %c0_438] : memref<128x128xbf16, #tpu.memory_space<vmem>>, vector<4x128xbf16>
    tpu.vector_store %arg8[%c0_437, %c0_438], %513 {strides = array<i32>} : memref<128x128xbf16, #tpu.memory_space<vmem>>, vector<4x128xbf16>,
    %515 = vector.extract_strided_slice %512 {offsets = [0, 1], sizes = [4, 128], strides = [1, 1]} : vector<4x256xbf16> to vector<4x128xbf16>
    %c4_439 = arith.constant 4 : index
    %c0_440 = arith.constant 0 : index
    %516 = vector.load %arg8[%c4_439, %c0_440] : memref<128x128xbf16, #tpu.memory_space<vmem>>, vector<4x128xbf16>
    tpu.vector_store %arg8[%c4_439, %c0_440], %515 {strides = array<i32>} : memref<128x128xbf16, #tpu.memory_space<vmem>>, vector<4x128xbf16>,
    %517 = vector.extract_strided_slice %512 {offsets = [0, 2], sizes = [4, 128], strides = [1, 1]} : vector<4x256xbf16> to vector<4x128xbf16>
    %c8_441 = arith.constant 8 : index
    %c0_442 = arith.constant 0 : index
    %518 = vector.load %arg8[%c8_441, %c0_442] : memref<128x128xbf16, #tpu.memory_space<vmem>>, vector<4x128xbf16>
    tpu.vector_store %arg8[%c8_441, %c0_442], %517 {strides = array<i32>} : memref<128x128xbf16, #tpu.memory_space<vmem>>, vector<4x128xbf16>,
    %519 = vector.extract_strided_slice %512 {offsets = [0, 10], sizes = [4, 128], strides = [1, 1]} : vector<4x256xbf16> to vector<4x128xbf16>
    %c12_443 = arith.constant 12 : index
    %c0_444 = arith.constant 0 : index
    %520 = vector.load %arg8[%c12_443, %c0_444] : memref<128x128xbf16, #tpu.memory_space<vmem>>, vector<4x128xbf16>
    tpu.vector_store %arg8[%c12_443, %c0_444], %519 {strides = array<i32>} : memref<128x128xbf16, #tpu.memory_space<vmem>>, vector<4x128xbf16>,
    %521 = vector.extract_strided_slice %512 {offsets = [0, 11], sizes = [4, 128], strides = [1, 1]} : vector<4x256xbf16> to vector<4x128xbf16>
    %c16_445 = arith.constant 16 : index
    %c0_446 = arith.constant 0 : index
    %522 = vector.load %arg8[%c16_445, %c0_446] : memref<128x128xbf16, #tpu.memory_space<vmem>>, vector<4x128xbf16>
    tpu.vector_store %arg8[%c16_445, %c0_446], %521 {strides = array<i32>} : memref<128x128xbf16, #tpu.memory_space<vmem>>, vector<4x128xbf16>,
    %523 = vector.extract_strided_slice %512 {offsets = [0, 12], sizes = [4, 128], strides = [1, 1]} : vector<4x256xbf16> to vector<4x128xbf16>
    %c20_447 = arith.constant 20 : index
    %c0_448 = arith.constant 0 : index
    %524 = vector.load %arg8[%c20_447, %c0_448] : memref<128x128xbf16, #tpu.memory_space<vmem>>, vector<4x128xbf16>
    tpu.vector_store %arg8[%c20_447, %c0_448], %523 {strides = array<i32>} : memref<128x128xbf16, #tpu.memory_space<vmem>>, vector<4x128xbf16>,
    %525 = vector.extract_strided_slice %512 {offsets = [0, 20], sizes = [4, 128], strides = [1, 1]} : vector<4x256xbf16> to vector<4x128xbf16>
    %c24_449 = arith.constant 24 : index
    %c0_450 = arith.constant 0 : index
    %526 = vector.load %arg8[%c24_449, %c0_450] : memref<128x128xbf16, #tpu.memory_space<vmem>>, vector<4x128xbf16>
    tpu.vector_store %arg8[%c24_449, %c0_450], %525 {strides = array<i32>} : memref<128x128xbf16, #tpu.memory_space<vmem>>, vector<4x128xbf16>,
    %527 = vector.extract_strided_slice %512 {offsets = [0, 21], sizes = [4, 128], strides = [1, 1]} : vector<4x256xbf16> to vector<4x128xbf16>
    %c28_451 = arith.constant 28 : index
    %c0_452 = arith.constant 0 : index
    %528 = vector.load %arg8[%c28_451, %c0_452] : memref<128x128xbf16, #tpu.memory_space<vmem>>, vector<4x128xbf16>
    tpu.vector_store %arg8[%c28_451, %c0_452], %527 {strides = array<i32>} : memref<128x128xbf16, #tpu.memory_space<vmem>>, vector<4x128xbf16>,
    %529 = vector.extract_strided_slice %512 {offsets = [0, 22], sizes = [4, 128], strides = [1, 1]} : vector<4x256xbf16> to vector<4x128xbf16>
    %c32_453 = arith.constant 32 : index
    %c0_454 = arith.constant 0 : index
    %530 = vector.load %arg8[%c32_453, %c0_454] : memref<128x128xbf16, #tpu.memory_space<vmem>>, vector<4x128xbf16>
    tpu.vector_store %arg8[%c32_453, %c0_454], %529 {strides = array<i32>} : memref<128x128xbf16, #tpu.memory_space<vmem>>, vector<4x128xbf16>,
    %c6_i32_455 = arith.constant 6 : i32
    %531 = arith.addi %7, %c6_i32_455 : i32
    %c1_i32_456 = arith.constant 1 : i32
    %532 = arith.addi %531, %c1_i32_456 : i32
    %c0_457 = arith.constant 0 : index
    %533 = arith.index_cast %532 : i32 to index
    %c0_458 = arith.constant 0 : index
    %c0_459 = arith.constant 0 : index
    %534 = vector.load %arg2[%c0_457, %533, %c0_458, %c0_459] : memref<1x10x4x256xbf16, #tpu.memory_space<vmem>>, vector<1x1x4x256xbf16>
    %535 = vector.shape_cast %534 : vector<1x1x4x256xbf16> to vector<4x256xbf16>
    %536 = vector.extract_strided_slice %535 {offsets = [0, 0], sizes = [4, 128], strides = [1, 1]} : vector<4x256xbf16> to vector<4x128xbf16>
    %c36_460 = arith.constant 36 : index
    %c0_461 = arith.constant 0 : index
    %537 = vector.load %arg8[%c36_460, %c0_461] : memref<128x128xbf16, #tpu.memory_space<vmem>>, vector<4x128xbf16>
    tpu.vector_store %arg8[%c36_460, %c0_461], %536 {strides = array<i32>} : memref<128x128xbf16, #tpu.memory_space<vmem>>, vector<4x128xbf16>,
    %538 = vector.extract_strided_slice %535 {offsets = [0, 1], sizes = [4, 128], strides = [1, 1]} : vector<4x256xbf16> to vector<4x128xbf16>
    %c40_462 = arith.constant 40 : index
    %c0_463 = arith.constant 0 : index
    %539 = vector.load %arg8[%c40_462, %c0_463] : memref<128x128xbf16, #tpu.memory_space<vmem>>, vector<4x128xbf16>
    tpu.vector_store %arg8[%c40_462, %c0_463], %538 {strides = array<i32>} : memref<128x128xbf16, #tpu.memory_space<vmem>>, vector<4x128xbf16>,
    %540 = vector.extract_strided_slice %535 {offsets = [0, 2], sizes = [4, 128], strides = [1, 1]} : vector<4x256xbf16> to vector<4x128xbf16>
    %c44_464 = arith.constant 44 : index
    %c0_465 = arith.constant 0 : index
    %541 = vector.load %arg8[%c44_464, %c0_465] : memref<128x128xbf16, #tpu.memory_space<vmem>>, vector<4x128xbf16>
    tpu.vector_store %arg8[%c44_464, %c0_465], %540 {strides = array<i32>} : memref<128x128xbf16, #tpu.memory_space<vmem>>, vector<4x128xbf16>,
    %542 = vector.extract_strided_slice %535 {offsets = [0, 10], sizes = [4, 128], strides = [1, 1]} : vector<4x256xbf16> to vector<4x128xbf16>
    %c48_466 = arith.constant 48 : index
    %c0_467 = arith.constant 0 : index
    %543 = vector.load %arg8[%c48_466, %c0_467] : memref<128x128xbf16, #tpu.memory_space<vmem>>, vector<4x128xbf16>
    tpu.vector_store %arg8[%c48_466, %c0_467], %542 {strides = array<i32>} : memref<128x128xbf16, #tpu.memory_space<vmem>>, vector<4x128xbf16>,
    %544 = vector.extract_strided_slice %535 {offsets = [0, 11], sizes = [4, 128], strides = [1, 1]} : vector<4x256xbf16> to vector<4x128xbf16>
    %c52_468 = arith.constant 52 : index
    %c0_469 = arith.constant 0 : index
    %545 = vector.load %arg8[%c52_468, %c0_469] : memref<128x128xbf16, #tpu.memory_space<vmem>>, vector<4x128xbf16>
    tpu.vector_store %arg8[%c52_468, %c0_469], %544 {strides = array<i32>} : memref<128x128xbf16, #tpu.memory_space<vmem>>, vector<4x128xbf16>,
    %546 = vector.extract_strided_slice %535 {offsets = [0, 12], sizes = [4, 128], strides = [1, 1]} : vector<4x256xbf16> to vector<4x128xbf16>
    %c56_470 = arith.constant 56 : index
    %c0_471 = arith.constant 0 : index
    %547 = vector.load %arg8[%c56_470, %c0_471] : memref<128x128xbf16, #tpu.memory_space<vmem>>, vector<4x128xbf16>
    tpu.vector_store %arg8[%c56_470, %c0_471], %546 {strides = array<i32>} : memref<128x128xbf16, #tpu.memory_space<vmem>>, vector<4x128xbf16>,
    %548 = vector.extract_strided_slice %535 {offsets = [0, 20], sizes = [4, 128], strides = [1, 1]} : vector<4x256xbf16> to vector<4x128xbf16>
    %c60_472 = arith.constant 60 : index
    %c0_473 = arith.constant 0 : index
    %549 = vector.load %arg8[%c60_472, %c0_473] : memref<128x128xbf16, #tpu.memory_space<vmem>>, vector<4x128xbf16>
    tpu.vector_store %arg8[%c60_472, %c0_473], %548 {strides = array<i32>} : memref<128x128xbf16, #tpu.memory_space<vmem>>, vector<4x128xbf16>,
    %550 = vector.extract_strided_slice %535 {offsets = [0, 21], sizes = [4, 128], strides = [1, 1]} : vector<4x256xbf16> to vector<4x128xbf16>
    %c64_474 = arith.constant 64 : index
    %c0_475 = arith.constant 0 : index
    %551 = vector.load %arg8[%c64_474, %c0_475] : memref<128x128xbf16, #tpu.memory_space<vmem>>, vector<4x128xbf16>
    tpu.vector_store %arg8[%c64_474, %c0_475], %550 {strides = array<i32>} : memref<128x128xbf16, #tpu.memory_space<vmem>>, vector<4x128xbf16>,
    %552 = vector.extract_strided_slice %535 {offsets = [0, 22], sizes = [4, 128], strides = [1, 1]} : vector<4x256xbf16> to vector<4x128xbf16>
    %c68_476 = arith.constant 68 : index
    %c0_477 = arith.constant 0 : index
    %553 = vector.load %arg8[%c68_476, %c0_477] : memref<128x128xbf16, #tpu.memory_space<vmem>>, vector<4x128xbf16>
    tpu.vector_store %arg8[%c68_476, %c0_477], %552 {strides = array<i32>} : memref<128x128xbf16, #tpu.memory_space<vmem>>, vector<4x128xbf16>,
    %c6_i32_478 = arith.constant 6 : i32
    %554 = arith.addi %7, %c6_i32_478 : i32
    %c2_i32_479 = arith.constant 2 : i32
    %555 = arith.addi %554, %c2_i32_479 : i32
    %c0_480 = arith.constant 0 : index
    %556 = arith.index_cast %555 : i32 to index
    %c0_481 = arith.constant 0 : index
    %c0_482 = arith.constant 0 : index
    %557 = vector.load %arg2[%c0_480, %556, %c0_481, %c0_482] : memref<1x10x4x256xbf16, #tpu.memory_space<vmem>>, vector<1x1x4x256xbf16>
    %558 = vector.shape_cast %557 : vector<1x1x4x256xbf16> to vector<4x256xbf16>
    %559 = vector.extract_strided_slice %558 {offsets = [0, 0], sizes = [4, 128], strides = [1, 1]} : vector<4x256xbf16> to vector<4x128xbf16>
    %c72_483 = arith.constant 72 : index
    %c0_484 = arith.constant 0 : index
    %560 = vector.load %arg8[%c72_483, %c0_484] : memref<128x128xbf16, #tpu.memory_space<vmem>>, vector<4x128xbf16>
    tpu.vector_store %arg8[%c72_483, %c0_484], %559 {strides = array<i32>} : memref<128x128xbf16, #tpu.memory_space<vmem>>, vector<4x128xbf16>,
    %561 = vector.extract_strided_slice %558 {offsets = [0, 1], sizes = [4, 128], strides = [1, 1]} : vector<4x256xbf16> to vector<4x128xbf16>
    %c76_485 = arith.constant 76 : index
    %c0_486 = arith.constant 0 : index
    %562 = vector.load %arg8[%c76_485, %c0_486] : memref<128x128xbf16, #tpu.memory_space<vmem>>, vector<4x128xbf16>
    tpu.vector_store %arg8[%c76_485, %c0_486], %561 {strides = array<i32>} : memref<128x128xbf16, #tpu.memory_space<vmem>>, vector<4x128xbf16>,
    %563 = vector.extract_strided_slice %558 {offsets = [0, 2], sizes = [4, 128], strides = [1, 1]} : vector<4x256xbf16> to vector<4x128xbf16>
    %c80_487 = arith.constant 80 : index
    %c0_488 = arith.constant 0 : index
    %564 = vector.load %arg8[%c80_487, %c0_488] : memref<128x128xbf16, #tpu.memory_space<vmem>>, vector<4x128xbf16>
    tpu.vector_store %arg8[%c80_487, %c0_488], %563 {strides = array<i32>} : memref<128x128xbf16, #tpu.memory_space<vmem>>, vector<4x128xbf16>,
    %565 = vector.extract_strided_slice %558 {offsets = [0, 10], sizes = [4, 128], strides = [1, 1]} : vector<4x256xbf16> to vector<4x128xbf16>
    %c84_489 = arith.constant 84 : index
    %c0_490 = arith.constant 0 : index
    %566 = vector.load %arg8[%c84_489, %c0_490] : memref<128x128xbf16, #tpu.memory_space<vmem>>, vector<4x128xbf16>
    tpu.vector_store %arg8[%c84_489, %c0_490], %565 {strides = array<i32>} : memref<128x128xbf16, #tpu.memory_space<vmem>>, vector<4x128xbf16>,
    %567 = vector.extract_strided_slice %558 {offsets = [0, 11], sizes = [4, 128], strides = [1, 1]} : vector<4x256xbf16> to vector<4x128xbf16>
    %c88_491 = arith.constant 88 : index
    %c0_492 = arith.constant 0 : index
    %568 = vector.load %arg8[%c88_491, %c0_492] : memref<128x128xbf16, #tpu.memory_space<vmem>>, vector<4x128xbf16>
    tpu.vector_store %arg8[%c88_491, %c0_492], %567 {strides = array<i32>} : memref<128x128xbf16, #tpu.memory_space<vmem>>, vector<4x128xbf16>,
    %569 = vector.extract_strided_slice %558 {offsets = [0, 12], sizes = [4, 128], strides = [1, 1]} : vector<4x256xbf16> to vector<4x128xbf16>
    %c92_493 = arith.constant 92 : index
    %c0_494 = arith.constant 0 : index
    %570 = vector.load %arg8[%c92_493, %c0_494] : memref<128x128xbf16, #tpu.memory_space<vmem>>, vector<4x128xbf16>
    tpu.vector_store %arg8[%c92_493, %c0_494], %569 {strides = array<i32>} : memref<128x128xbf16, #tpu.memory_space<vmem>>, vector<4x128xbf16>,
    %571 = vector.extract_strided_slice %558 {offsets = [0, 20], sizes = [4, 128], strides = [1, 1]} : vector<4x256xbf16> to vector<4x128xbf16>
    %c96_495 = arith.constant 96 : index
    %c0_496 = arith.constant 0 : index
    %572 = vector.load %arg8[%c96_495, %c0_496] : memref<128x128xbf16, #tpu.memory_space<vmem>>, vector<4x128xbf16>
    tpu.vector_store %arg8[%c96_495, %c0_496], %571 {strides = array<i32>} : memref<128x128xbf16, #tpu.memory_space<vmem>>, vector<4x128xbf16>,
    %573 = vector.extract_strided_slice %558 {offsets = [0, 21], sizes = [4, 128], strides = [1, 1]} : vector<4x256xbf16> to vector<4x128xbf16>
    %c100_497 = arith.constant 100 : index
    %c0_498 = arith.constant 0 : index
    %574 = vector.load %arg8[%c100_497, %c0_498] : memref<128x128xbf16, #tpu.memory_space<vmem>>, vector<4x128xbf16>
    tpu.vector_store %arg8[%c100_497, %c0_498], %573 {strides = array<i32>} : memref<128x128xbf16, #tpu.memory_space<vmem>>, vector<4x128xbf16>,
    %575 = vector.extract_strided_slice %558 {offsets = [0, 22], sizes = [4, 128], strides = [1, 1]} : vector<4x256xbf16> to vector<4x128xbf16>
    %c104_499 = arith.constant 104 : index
    %c0_500 = arith.constant 0 : index
    %576 = vector.load %arg8[%c104_499, %c0_500] : memref<128x128xbf16, #tpu.memory_space<vmem>>, vector<4x128xbf16>
    tpu.vector_store %arg8[%c104_499, %c0_500], %575 {strides = array<i32>} : memref<128x128xbf16, #tpu.memory_space<vmem>>, vector<4x128xbf16>,
    %c0_501 = arith.constant 0 : index
    %c0_502 = arith.constant 0 : index
    %577 = vector.load %arg8[%c0_501, %c0_502] : memref<128x128xbf16, #tpu.memory_space<vmem>>, vector<128x128xbf16>
    %cst_503 = arith.constant dense<0.000000e+00> : vector<8x128xf32>
    %578 = tpu.matmul %5, %577, %cst_503 {dimension_numbers = #tpu.dot_dimension_numbers<[1], [0], [0], [1], [0, 0, 1, 1], [], []>} : vector<8x128xbf16>, vector<128x128xbf16>, vector<8x128xf32> -> vector<8x128xf32>
    %c0_504 = arith.constant 0 : index
    %c0_505 = arith.constant 0 : index
    %c768 = arith.constant 768 : index
    %579 = vector.load %arg5[%c0_504, %c0_505, %c768] : memref<1x8x1024xf32, #tpu.memory_space<vmem>>, vector<1x8x128xf32>
    %580 = vector.shape_cast %579 : vector<1x8x128xf32> to vector<8x128xf32>
    %581 = vector.shape_cast %578 : vector<8x128xf32> to vector<1x8x128xf32>
    tpu.vector_store %arg5[%c0_504, %c0_505, %c768], %581 {strides = array<i32>} : memref<1x8x1024xf32, #tpu.memory_space<vmem>>, vector<1x8x128xf32>,
    %582 = vector.broadcast %6 : vector<1x128xf32> to vector<8x128xf32>
    %583 = arith.mulf %578, %582 : vector<8x128xf32>
    %cst_506 = arith.constant dense<0.000000e+00> : vector<8xf32>
    %584 = vector.multi_reduction <add>, %583, %cst_506 [1] : vector<8x128xf32> to vector<8xf32>
    %585 = vector.shape_cast %584 : vector<8xf32> to vector<8x1xf32>
    %586 = arith.addf %503, %585 : vector<8x1xf32>
    %587 = arith.mulf %578, %583 : vector<8x128xf32>
    %cst_507 = arith.constant dense<0.000000e+00> : vector<8xf32>
    %588 = vector.multi_reduction <add>, %587, %cst_507 [1] : vector<8x128xf32> to vector<8xf32>
    %589 = vector.shape_cast %588 : vector<8xf32> to vector<8x1xf32>
    %590 = arith.addf %507, %589 : vector<8x1xf32>
    %c7_i32 = arith.constant 7 : i32
    %591 = arith.addi %7, %c7_i32 : i32
    %c0_i32_508 = arith.constant 0 : i32
    %592 = arith.addi %591, %c0_i32_508 : i32
    %c0_509 = arith.constant 0 : index
    %593 = arith.index_cast %592 : i32 to index
    %c0_510 = arith.constant 0 : index
    %c0_511 = arith.constant 0 : index
    %594 = vector.load %arg2[%c0_509, %593, %c0_510, %c0_511] : memref<1x10x4x256xbf16, #tpu.memory_space<vmem>>, vector<1x1x4x256xbf16>
    %595 = vector.shape_cast %594 : vector<1x1x4x256xbf16> to vector<4x256xbf16>
    %596 = vector.extract_strided_slice %595 {offsets = [0, 0], sizes = [4, 128], strides = [1, 1]} : vector<4x256xbf16> to vector<4x128xbf16>
    %c0_512 = arith.constant 0 : index
    %c0_513 = arith.constant 0 : index
    %597 = vector.load %arg8[%c0_512, %c0_513] : memref<128x128xbf16, #tpu.memory_space<vmem>>, vector<4x128xbf16>
    tpu.vector_store %arg8[%c0_512, %c0_513], %596 {strides = array<i32>} : memref<128x128xbf16, #tpu.memory_space<vmem>>, vector<4x128xbf16>,
    %598 = vector.extract_strided_slice %595 {offsets = [0, 1], sizes = [4, 128], strides = [1, 1]} : vector<4x256xbf16> to vector<4x128xbf16>
    %c4_514 = arith.constant 4 : index
    %c0_515 = arith.constant 0 : index
    %599 = vector.load %arg8[%c4_514, %c0_515] : memref<128x128xbf16, #tpu.memory_space<vmem>>, vector<4x128xbf16>
    tpu.vector_store %arg8[%c4_514, %c0_515], %598 {strides = array<i32>} : memref<128x128xbf16, #tpu.memory_space<vmem>>, vector<4x128xbf16>,
    %600 = vector.extract_strided_slice %595 {offsets = [0, 2], sizes = [4, 128], strides = [1, 1]} : vector<4x256xbf16> to vector<4x128xbf16>
    %c8_516 = arith.constant 8 : index
    %c0_517 = arith.constant 0 : index
    %601 = vector.load %arg8[%c8_516, %c0_517] : memref<128x128xbf16, #tpu.memory_space<vmem>>, vector<4x128xbf16>
    tpu.vector_store %arg8[%c8_516, %c0_517], %600 {strides = array<i32>} : memref<128x128xbf16, #tpu.memory_space<vmem>>, vector<4x128xbf16>,
    %602 = vector.extract_strided_slice %595 {offsets = [0, 10], sizes = [4, 128], strides = [1, 1]} : vector<4x256xbf16> to vector<4x128xbf16>
    %c12_518 = arith.constant 12 : index
    %c0_519 = arith.constant 0 : index
    %603 = vector.load %arg8[%c12_518, %c0_519] : memref<128x128xbf16, #tpu.memory_space<vmem>>, vector<4x128xbf16>
    tpu.vector_store %arg8[%c12_518, %c0_519], %602 {strides = array<i32>} : memref<128x128xbf16, #tpu.memory_space<vmem>>, vector<4x128xbf16>,
    %604 = vector.extract_strided_slice %595 {offsets = [0, 11], sizes = [4, 128], strides = [1, 1]} : vector<4x256xbf16> to vector<4x128xbf16>
    %c16_520 = arith.constant 16 : index
    %c0_521 = arith.constant 0 : index
    %605 = vector.load %arg8[%c16_520, %c0_521] : memref<128x128xbf16, #tpu.memory_space<vmem>>, vector<4x128xbf16>
    tpu.vector_store %arg8[%c16_520, %c0_521], %604 {strides = array<i32>} : memref<128x128xbf16, #tpu.memory_space<vmem>>, vector<4x128xbf16>,
    %606 = vector.extract_strided_slice %595 {offsets = [0, 12], sizes = [4, 128], strides = [1, 1]} : vector<4x256xbf16> to vector<4x128xbf16>
    %c20_522 = arith.constant 20 : index
    %c0_523 = arith.constant 0 : index
    %607 = vector.load %arg8[%c20_522, %c0_523] : memref<128x128xbf16, #tpu.memory_space<vmem>>, vector<4x128xbf16>
    tpu.vector_store %arg8[%c20_522, %c0_523], %606 {strides = array<i32>} : memref<128x128xbf16, #tpu.memory_space<vmem>>, vector<4x128xbf16>,
    %608 = vector.extract_strided_slice %595 {offsets = [0, 20], sizes = [4, 128], strides = [1, 1]} : vector<4x256xbf16> to vector<4x128xbf16>
    %c24_524 = arith.constant 24 : index
    %c0_525 = arith.constant 0 : index
    %609 = vector.load %arg8[%c24_524, %c0_525] : memref<128x128xbf16, #tpu.memory_space<vmem>>, vector<4x128xbf16>
    tpu.vector_store %arg8[%c24_524, %c0_525], %608 {strides = array<i32>} : memref<128x128xbf16, #tpu.memory_space<vmem>>, vector<4x128xbf16>,
    %610 = vector.extract_strided_slice %595 {offsets = [0, 21], sizes = [4, 128], strides = [1, 1]} : vector<4x256xbf16> to vector<4x128xbf16>
    %c28_526 = arith.constant 28 : index
    %c0_527 = arith.constant 0 : index
    %611 = vector.load %arg8[%c28_526, %c0_527] : memref<128x128xbf16, #tpu.memory_space<vmem>>, vector<4x128xbf16>
    tpu.vector_store %arg8[%c28_526, %c0_527], %610 {strides = array<i32>} : memref<128x128xbf16, #tpu.memory_space<vmem>>, vector<4x128xbf16>,
    %612 = vector.extract_strided_slice %595 {offsets = [0, 22], sizes = [4, 128], strides = [1, 1]} : vector<4x256xbf16> to vector<4x128xbf16>
    %c32_528 = arith.constant 32 : index
    %c0_529 = arith.constant 0 : index
    %613 = vector.load %arg8[%c32_528, %c0_529] : memref<128x128xbf16, #tpu.memory_space<vmem>>, vector<4x128xbf16>
    tpu.vector_store %arg8[%c32_528, %c0_529], %612 {strides = array<i32>} : memref<128x128xbf16, #tpu.memory_space<vmem>>, vector<4x128xbf16>,
    %c7_i32_530 = arith.constant 7 : i32
    %614 = arith.addi %7, %c7_i32_530 : i32
    %c1_i32_531 = arith.constant 1 : i32
    %615 = arith.addi %614, %c1_i32_531 : i32
    %c0_532 = arith.constant 0 : index
    %616 = arith.index_cast %615 : i32 to index
    %c0_533 = arith.constant 0 : index
    %c0_534 = arith.constant 0 : index
    %617 = vector.load %arg2[%c0_532, %616, %c0_533, %c0_534] : memref<1x10x4x256xbf16, #tpu.memory_space<vmem>>, vector<1x1x4x256xbf16>
    %618 = vector.shape_cast %617 : vector<1x1x4x256xbf16> to vector<4x256xbf16>
    %619 = vector.extract_strided_slice %618 {offsets = [0, 0], sizes = [4, 128], strides = [1, 1]} : vector<4x256xbf16> to vector<4x128xbf16>
    %c36_535 = arith.constant 36 : index
    %c0_536 = arith.constant 0 : index
    %620 = vector.load %arg8[%c36_535, %c0_536] : memref<128x128xbf16, #tpu.memory_space<vmem>>, vector<4x128xbf16>
    tpu.vector_store %arg8[%c36_535, %c0_536], %619 {strides = array<i32>} : memref<128x128xbf16, #tpu.memory_space<vmem>>, vector<4x128xbf16>,
    %621 = vector.extract_strided_slice %618 {offsets = [0, 1], sizes = [4, 128], strides = [1, 1]} : vector<4x256xbf16> to vector<4x128xbf16>
    %c40_537 = arith.constant 40 : index
    %c0_538 = arith.constant 0 : index
    %622 = vector.load %arg8[%c40_537, %c0_538] : memref<128x128xbf16, #tpu.memory_space<vmem>>, vector<4x128xbf16>
    tpu.vector_store %arg8[%c40_537, %c0_538], %621 {strides = array<i32>} : memref<128x128xbf16, #tpu.memory_space<vmem>>, vector<4x128xbf16>,
    %623 = vector.extract_strided_slice %618 {offsets = [0, 2], sizes = [4, 128], strides = [1, 1]} : vector<4x256xbf16> to vector<4x128xbf16>
    %c44_539 = arith.constant 44 : index
    %c0_540 = arith.constant 0 : index
    %624 = vector.load %arg8[%c44_539, %c0_540] : memref<128x128xbf16, #tpu.memory_space<vmem>>, vector<4x128xbf16>
    tpu.vector_store %arg8[%c44_539, %c0_540], %623 {strides = array<i32>} : memref<128x128xbf16, #tpu.memory_space<vmem>>, vector<4x128xbf16>,
    %625 = vector.extract_strided_slice %618 {offsets = [0, 10], sizes = [4, 128], strides = [1, 1]} : vector<4x256xbf16> to vector<4x128xbf16>
    %c48_541 = arith.constant 48 : index
    %c0_542 = arith.constant 0 : index
    %626 = vector.load %arg8[%c48_541, %c0_542] : memref<128x128xbf16, #tpu.memory_space<vmem>>, vector<4x128xbf16>
    tpu.vector_store %arg8[%c48_541, %c0_542], %625 {strides = array<i32>} : memref<128x128xbf16, #tpu.memory_space<vmem>>, vector<4x128xbf16>,
    %627 = vector.extract_strided_slice %618 {offsets = [0, 11], sizes = [4, 128], strides = [1, 1]} : vector<4x256xbf16> to vector<4x128xbf16>
    %c52_543 = arith.constant 52 : index
    %c0_544 = arith.constant 0 : index
    %628 = vector.load %arg8[%c52_543, %c0_544] : memref<128x128xbf16, #tpu.memory_space<vmem>>, vector<4x128xbf16>
    tpu.vector_store %arg8[%c52_543, %c0_544], %627 {strides = array<i32>} : memref<128x128xbf16, #tpu.memory_space<vmem>>, vector<4x128xbf16>,
    %629 = vector.extract_strided_slice %618 {offsets = [0, 12], sizes = [4, 128], strides = [1, 1]} : vector<4x256xbf16> to vector<4x128xbf16>
    %c56_545 = arith.constant 56 : index
    %c0_546 = arith.constant 0 : index
    %630 = vector.load %arg8[%c56_545, %c0_546] : memref<128x128xbf16, #tpu.memory_space<vmem>>, vector<4x128xbf16>
    tpu.vector_store %arg8[%c56_545, %c0_546], %629 {strides = array<i32>} : memref<128x128xbf16, #tpu.memory_space<vmem>>, vector<4x128xbf16>,
    %631 = vector.extract_strided_slice %618 {offsets = [0, 20], sizes = [4, 128], strides = [1, 1]} : vector<4x256xbf16> to vector<4x128xbf16>
    %c60_547 = arith.constant 60 : index
    %c0_548 = arith.constant 0 : index
    %632 = vector.load %arg8[%c60_547, %c0_548] : memref<128x128xbf16, #tpu.memory_space<vmem>>, vector<4x128xbf16>
    tpu.vector_store %arg8[%c60_547, %c0_548], %631 {strides = array<i32>} : memref<128x128xbf16, #tpu.memory_space<vmem>>, vector<4x128xbf16>,
    %633 = vector.extract_strided_slice %618 {offsets = [0, 21], sizes = [4, 128], strides = [1, 1]} : vector<4x256xbf16> to vector<4x128xbf16>
    %c64_549 = arith.constant 64 : index
    %c0_550 = arith.constant 0 : index
    %634 = vector.load %arg8[%c64_549, %c0_550] : memref<128x128xbf16, #tpu.memory_space<vmem>>, vector<4x128xbf16>
    tpu.vector_store %arg8[%c64_549, %c0_550], %633 {strides = array<i32>} : memref<128x128xbf16, #tpu.memory_space<vmem>>, vector<4x128xbf16>,
    %635 = vector.extract_strided_slice %618 {offsets = [0, 22], sizes = [4, 128], strides = [1, 1]} : vector<4x256xbf16> to vector<4x128xbf16>
    %c68_551 = arith.constant 68 : index
    %c0_552 = arith.constant 0 : index
    %636 = vector.load %arg8[%c68_551, %c0_552] : memref<128x128xbf16, #tpu.memory_space<vmem>>, vector<4x128xbf16>
    tpu.vector_store %arg8[%c68_551, %c0_552], %635 {strides = array<i32>} : memref<128x128xbf16, #tpu.memory_space<vmem>>, vector<4x128xbf16>,
    %c7_i32_553 = arith.constant 7 : i32
    %637 = arith.addi %7, %c7_i32_553 : i32
    %c2_i32_554 = arith.constant 2 : i32
    %638 = arith.addi %637, %c2_i32_554 : i32
    %c0_555 = arith.constant 0 : index
    %639 = arith.index_cast %638 : i32 to index
    %c0_556 = arith.constant 0 : index
    %c0_557 = arith.constant 0 : index
    %640 = vector.load %arg2[%c0_555, %639, %c0_556, %c0_557] : memref<1x10x4x256xbf16, #tpu.memory_space<vmem>>, vector<1x1x4x256xbf16>
    %641 = vector.shape_cast %640 : vector<1x1x4x256xbf16> to vector<4x256xbf16>
    %642 = vector.extract_strided_slice %641 {offsets = [0, 0], sizes = [4, 128], strides = [1, 1]} : vector<4x256xbf16> to vector<4x128xbf16>
    %c72_558 = arith.constant 72 : index
    %c0_559 = arith.constant 0 : index
    %643 = vector.load %arg8[%c72_558, %c0_559] : memref<128x128xbf16, #tpu.memory_space<vmem>>, vector<4x128xbf16>
    tpu.vector_store %arg8[%c72_558, %c0_559], %642 {strides = array<i32>} : memref<128x128xbf16, #tpu.memory_space<vmem>>, vector<4x128xbf16>,
    %644 = vector.extract_strided_slice %641 {offsets = [0, 1], sizes = [4, 128], strides = [1, 1]} : vector<4x256xbf16> to vector<4x128xbf16>
    %c76_560 = arith.constant 76 : index
    %c0_561 = arith.constant 0 : index
    %645 = vector.load %arg8[%c76_560, %c0_561] : memref<128x128xbf16, #tpu.memory_space<vmem>>, vector<4x128xbf16>
    tpu.vector_store %arg8[%c76_560, %c0_561], %644 {strides = array<i32>} : memref<128x128xbf16, #tpu.memory_space<vmem>>, vector<4x128xbf16>,
    %646 = vector.extract_strided_slice %641 {offsets = [0, 2], sizes = [4, 128], strides = [1, 1]} : vector<4x256xbf16> to vector<4x128xbf16>
    %c80_562 = arith.constant 80 : index
    %c0_563 = arith.constant 0 : index
    %647 = vector.load %arg8[%c80_562, %c0_563] : memref<128x128xbf16, #tpu.memory_space<vmem>>, vector<4x128xbf16>
    tpu.vector_store %arg8[%c80_562, %c0_563], %646 {strides = array<i32>} : memref<128x128xbf16, #tpu.memory_space<vmem>>, vector<4x128xbf16>,
    %648 = vector.extract_strided_slice %641 {offsets = [0, 10], sizes = [4, 128], strides = [1, 1]} : vector<4x256xbf16> to vector<4x128xbf16>
    %c84_564 = arith.constant 84 : index
    %c0_565 = arith.constant 0 : index
    %649 = vector.load %arg8[%c84_564, %c0_565] : memref<128x128xbf16, #tpu.memory_space<vmem>>, vector<4x128xbf16>
    tpu.vector_store %arg8[%c84_564, %c0_565], %648 {strides = array<i32>} : memref<128x128xbf16, #tpu.memory_space<vmem>>, vector<4x128xbf16>,
    %650 = vector.extract_strided_slice %641 {offsets = [0, 11], sizes = [4, 128], strides = [1, 1]} : vector<4x256xbf16> to vector<4x128xbf16>
    %c88_566 = arith.constant 88 : index
    %c0_567 = arith.constant 0 : index
    %651 = vector.load %arg8[%c88_566, %c0_567] : memref<128x128xbf16, #tpu.memory_space<vmem>>, vector<4x128xbf16>
    tpu.vector_store %arg8[%c88_566, %c0_567], %650 {strides = array<i32>} : memref<128x128xbf16, #tpu.memory_space<vmem>>, vector<4x128xbf16>,
    %652 = vector.extract_strided_slice %641 {offsets = [0, 12], sizes = [4, 128], strides = [1, 1]} : vector<4x256xbf16> to vector<4x128xbf16>
    %c92_568 = arith.constant 92 : index
    %c0_569 = arith.constant 0 : index
    %653 = vector.load %arg8[%c92_568, %c0_569] : memref<128x128xbf16, #tpu.memory_space<vmem>>, vector<4x128xbf16>
    tpu.vector_store %arg8[%c92_568, %c0_569], %652 {strides = array<i32>} : memref<128x128xbf16, #tpu.memory_space<vmem>>, vector<4x128xbf16>,
    %654 = vector.extract_strided_slice %641 {offsets = [0, 20], sizes = [4, 128], strides = [1, 1]} : vector<4x256xbf16> to vector<4x128xbf16>
    %c96_570 = arith.constant 96 : index
    %c0_571 = arith.constant 0 : index
    %655 = vector.load %arg8[%c96_570, %c0_571] : memref<128x128xbf16, #tpu.memory_space<vmem>>, vector<4x128xbf16>
    tpu.vector_store %arg8[%c96_570, %c0_571], %654 {strides = array<i32>} : memref<128x128xbf16, #tpu.memory_space<vmem>>, vector<4x128xbf16>,
    %656 = vector.extract_strided_slice %641 {offsets = [0, 21], sizes = [4, 128], strides = [1, 1]} : vector<4x256xbf16> to vector<4x128xbf16>
    %c100_572 = arith.constant 100 : index
    %c0_573 = arith.constant 0 : index
    %657 = vector.load %arg8[%c100_572, %c0_573] : memref<128x128xbf16, #tpu.memory_space<vmem>>, vector<4x128xbf16>
    tpu.vector_store %arg8[%c100_572, %c0_573], %656 {strides = array<i32>} : memref<128x128xbf16, #tpu.memory_space<vmem>>, vector<4x128xbf16>,
    %658 = vector.extract_strided_slice %641 {offsets = [0, 22], sizes = [4, 128], strides = [1, 1]} : vector<4x256xbf16> to vector<4x128xbf16>
    %c104_574 = arith.constant 104 : index
    %c0_575 = arith.constant 0 : index
    %659 = vector.load %arg8[%c104_574, %c0_575] : memref<128x128xbf16, #tpu.memory_space<vmem>>, vector<4x128xbf16>
    tpu.vector_store %arg8[%c104_574, %c0_575], %658 {strides = array<i32>} : memref<128x128xbf16, #tpu.memory_space<vmem>>, vector<4x128xbf16>,
    %c0_576 = arith.constant 0 : index
    %c0_577 = arith.constant 0 : index
    %660 = vector.load %arg8[%c0_576, %c0_577] : memref<128x128xbf16, #tpu.memory_space<vmem>>, vector<128x128xbf16>
    %cst_578 = arith.constant dense<0.000000e+00> : vector<8x128xf32>
    %661 = tpu.matmul %5, %660, %cst_578 {dimension_numbers = #tpu.dot_dimension_numbers<[1], [0], [0], [1], [0, 0, 1, 1], [], []>} : vector<8x128xbf16>, vector<128x128xbf16>, vector<8x128xf32> -> vector<8x128xf32>
    %c0_579 = arith.constant 0 : index
    %c0_580 = arith.constant 0 : index
    %c896 = arith.constant 896 : index
    %662 = vector.load %arg5[%c0_579, %c0_580, %c896] : memref<1x8x1024xf32, #tpu.memory_space<vmem>>, vector<1x8x128xf32>
    %663 = vector.shape_cast %662 : vector<1x8x128xf32> to vector<8x128xf32>
    %664 = vector.shape_cast %661 : vector<8x128xf32> to vector<1x8x128xf32>
    tpu.vector_store %arg5[%c0_579, %c0_580, %c896], %664 {strides = array<i32>} : memref<1x8x1024xf32, #tpu.memory_space<vmem>>, vector<1x8x128xf32>,
    %665 = vector.broadcast %6 : vector<1x128xf32> to vector<8x128xf32>
    %666 = arith.mulf %661, %665 : vector<8x128xf32>
    %cst_581 = arith.constant dense<0.000000e+00> : vector<8xf32>
    %667 = vector.multi_reduction <add>, %666, %cst_581 [1] : vector<8x128xf32> to vector<8xf32>
    %668 = vector.shape_cast %667 : vector<8xf32> to vector<8x1xf32>
    %669 = arith.addf %586, %668 : vector<8x1xf32>
    %670 = arith.mulf %661, %666 : vector<8x128xf32>
    %cst_582 = arith.constant dense<0.000000e+00> : vector<8xf32>
    %671 = vector.multi_reduction <add>, %670, %cst_582 [1] : vector<8x128xf32> to vector<8xf32>
    %672 = vector.shape_cast %671 : vector<8xf32> to vector<8x1xf32>
    %673 = arith.addf %590, %672 : vector<8x1xf32>
    %c0_583 = arith.constant 0 : index
    %c0_584 = arith.constant 0 : index
    %c0_585 = arith.constant 0 : index
    %674 = vector.load %arg6[%c0_583, %c0_584, %c0_585] : memref<1x8x1xf32, #tpu.memory_space<vmem>>, vector<1x8x1xf32>
    %675 = vector.shape_cast %674 : vector<1x8x1xf32> to vector<8x1xf32>
    %676 = arith.addf %675, %669 : vector<8x1xf32>
    %c0_586 = arith.constant 0 : index
    %c0_587 = arith.constant 0 : index
    %c0_588 = arith.constant 0 : index
    %677 = vector.load %arg6[%c0_586, %c0_587, %c0_588] : memref<1x8x1xf32, #tpu.memory_space<vmem>>, vector<1x8x1xf32>
    %678 = vector.shape_cast %677 : vector<1x8x1xf32> to vector<8x1xf32>
    %679 = vector.shape_cast %676 : vector<8x1xf32> to vector<1x8x1xf32>
    tpu.vector_store %arg6[%c0_586, %c0_587, %c0_588], %679 {strides = array<i32>} : memref<1x8x1xf32, #tpu.memory_space<vmem>>, vector<1x8x1xf32>,
    %c0_589 = arith.constant 0 : index
    %c0_590 = arith.constant 0 : index
    %c0_591 = arith.constant 0 : index
    %680 = vector.load %arg7[%c0_589, %c0_590, %c0_591] : memref<1x8x1xf32, #tpu.memory_space<vmem>>, vector<1x8x1xf32>
    %681 = vector.shape_cast %680 : vector<1x8x1xf32> to vector<8x1xf32>
    %682 = arith.addf %681, %673 : vector<8x1xf32>
    %c0_592 = arith.constant 0 : index
    %c0_593 = arith.constant 0 : index
    %c0_594 = arith.constant 0 : index
    %683 = vector.load %arg7[%c0_592, %c0_593, %c0_594] : memref<1x8x1xf32, #tpu.memory_space<vmem>>, vector<1x8x1xf32>
    %684 = vector.shape_cast %683 : vector<1x8x1xf32> to vector<8x1xf32>
    %685 = vector.shape_cast %682 : vector<8x1xf32> to vector<1x8x1xf32>
    tpu.vector_store %arg7[%c0_592, %c0_593, %c0_594], %685 {strides = array<i32>} : memref<1x8x1xf32, #tpu.memory_space<vmem>>, vector<1x8x1xf32>,
    return
  }
  func.func @transform_0(%arg0: i32, %arg1: i32) -> (i32, i32, i32, i32) {
    %c0_i32 = arith.constant 0 : i32
    %c0_i32_0 = arith.constant 0 : i32
    %c0_i32_1 = arith.constant 0 : i32
    %c0_i32_2 = arith.constant 0 : i32
    return %arg0, %c0_i32, %c0_i32_0, %c0_i32_1 : i32, i32, i32, i32
  }
  func.func @transform_1(%arg0: i32, %arg1: i32) -> (i32, i32) {
    %c0_i32 = arith.constant 0 : i32
    %c0_i32_0 = arith.constant 0 : i32
    %c0_i32_1 = arith.constant 0 : i32
    return %c0_i32, %c0_i32_0 : i32, i32
  }
  func.func @transform_2(%arg0: i32, %arg1: i32) -> (i32, i32) {
    %c0_i32 = arith.constant 0 : i32
    %c0_i32_0 = arith.constant 0 : i32
    %c0_i32_1 = arith.constant 0 : i32
    return %c0_i32, %c0_i32_0 : i32, i32
  }
  func.func @transform_3(%arg0: i32, %arg1: i32) -> (i32, i32, i32) {
    %c0_i32 = arith.constant 0 : i32
    %c0_i32_0 = arith.constant 0 : i32
    return %arg0, %c0_i32, %arg1 : i32, i32, i32
  }
  func.func @transform_4(%arg0: i32, %arg1: i32) -> (i32, i32, i32) {
    %c0_i32 = arith.constant 0 : i32
    %c0_i32_0 = arith.constant 0 : i32
    %c0_i32_1 = arith.constant 0 : i32
    return %arg0, %c0_i32, %c0_i32_0 : i32, i32, i32
  }
  func.func @transform_5(%arg0: i32, %arg1: i32) -> (i32, i32, i32) {
    %c0_i32 = arith.constant 0 : i32
    %c0_i32_0 = arith.constant 0 : i32
    %c0_i32_1 = arith.constant 0 : i32
    return %arg0, %c0_i32, %c0_i32_0 : i32, i32, i32
  }
}

</mosaic_0001>

<bundles_post_ra>
// kernel: tpu_custom_call.1
= control target key start
LH: loop header
LB: loop body
LE: loop exit
PB: predicated region body
PF: predicated region fallthrough
CT: control target
= control target key end

     0   :  { %s4729_s0 = inlined_call_operand.hbm [shape: bf16[2,10,4,256], index: 0, kind: input, shape index: {}]   ;;  %s4730_s1 = inlined_call_operand.hbm [shape: bf16[8,128], index: 1, kind: input, shape index: {}]   ;;  %s4731_s2 = inlined_call_operand.vmem [shape: f32[1,128], index: 2, kind: input, shape index: {}]   ;;  %s4732_s3 = inlined_call_operand.hbm [shape: f32[2,8,1024], index: 3, kind: output, shape index: {0}]   ;;  %s4733_s4 = inlined_call_operand.vmem [shape: f32[2,8,1], index: 4, kind: output, shape index: {1}]   ;;  %s4734_s5 = inlined_call_operand.vmem [shape: f32[2,8,1], index: 5, kind: output, shape index: {2}]  }
   0x1   :  { %4738 = sst [smem:[#allocation14_spill]] %s4730_s1 }
   0x2   :  { %11 = vsyncpa [#allocation4], 0 }
   0x3   :  { %13 = vsyncpa [#allocation4 + $0x1], 0 }
   0x4   :  { %14 = vsyncpa [#allocation7], 0 }
   0x5   :  { %15 = vsyncpa [#allocation5], 0 }
   0x6   :  { %17 = vsyncpa [#allocation5 + $0x1], 0  ;;  %s3837_s18 = smov 0   ;;  %s3839_s19 = smov 0  }
   0x7   :  { %s3841_s20 = smov 0   ;;  %s3843_s21 = smov 0  }
   0x8   :  { %s3845_s22 = smov 0   ;;  %s3847_s23 = smov 0  }
   0x9 LB: > { %4739 = sst [smem:[#allocation12_spill]] %s3792_s23  ;;  %s3193_s24 = sadd.s32 4294967295, %s3792_s23   ;;  %s3792_s23 = sphi %s3847_s23, %s23_s23   ;;  %s3788_s22 = sphi %s3845_s22, %s4755_s22   ;;  %s3784_s21 = sphi %s3843_s21, %s4754_s21   ;;  %s3780_s20 = sphi %s3841_s20, %s4753_s20   ;;  %s3776_s19 = sphi %s3839_s19, %s4752_s19   ;;  %s3772_s18 = sphi %s3837_s18, %s4751_s18  }
   0xa   : > { %s3194_s25 = sadd.s32 4294967294, %s3792_s23   ;;  %s42_s26 = sadd.s32 1, %s3780_s20 }
   0xb   : > { %p49_p0 = scmp.ne.s32.totalorder %s3780_s20, %s3776_s19  ;;  %p50_p1 = scmp.eq.s32.totalorder %s3792_s23, 0 }
   0xc   : > { %p55_p2 = scmp.ne.s32.totalorder %s3776_s19, %s3772_s18  ;;  %p3875_p3 = scmp.eq.s32.totalorder %s3193_s24, 0 }
   0xd   : > { %p123_p4 = scmp.eq.s32.totalorder %s3193_s24, 1  ;;  %p3879_p5 = por %p50_p1, %p49_p0 }
   0xe   : > { %p129_p6 = scmp.eq.s32.totalorder %s3194_s25, 1  ;;  %p3885_p7 = por %p3875_p3, %p55_p2 }
   0xf   : > { %p3889_p8 = por %p123_p4, %p49_p0  ;;  %p3195_p10 = scmp.ge.s32.totalorder %s3792_s23, 1 }
  0x10   : > { %p3893_p9 = por %p129_p6, %p55_p2  ;;  %p188_p11 = scmp.lt.s32.totalorder %s3792_s23, 3 }
  0x11   : > { %s4746_s1 = sld [smem:[#allocation14_spill]]  ;;  %s3794_s11 = smov [#allocation6]  }
  0x12   : > { %s4744_s6 = scalar_select %p3893_p9, 1, 0 }
  0x13   : > { %p3902_p12 = pnand %p3195_p10, %p188_p11  ;;  %s202_s12 = sshll.u32 %s3794_s11, 4  ;;  %s203_s12 = int_to_ptr.vmem [resolvable:$true] %s202_s12 }
  0x14   : > { %4745 = sst [smem:[#allocation13_spill]] %s4744_s6  ;;  %p3197_p13 = scmp.ge.s32.totalorder %s3792_s23, 2 }
  0x15   : > { %p3564_p0 = pneg %p3902_p12  ;;  %p3577_p1 = scmp.lt.s32.totalorder %s3792_s23, 2 }
  0x16   : > { %s35_s14 = sadd.s32 1, %s3788_s22  ;;  %s216_s15 = sand.u32 1, %s3780_s20  }
  0x17   : > { %s200_s9 = sshll.u32 %s4746_s1, 4  ;;  %p3565_p2 = pnand %p3564_p0, %p3875_p3  ;;  %s201_s9 = int_to_ptr.hbm [resolvable:$true] %s200_s9 }
  0x18   : > { %p3914_p4 = pnand %p3577_p1, %p3879_p5  ;;  %p37_p6 = scmp.ge.s32.totalorder %s35_s14, 2 }
  0x19   : > { %3567 = dma.hbm_to_vmem [thread:$0]  (!%p3565_p2), %s201_s9, 64, %s203_s12, [#allocation7]  }
  0x1a   : > { %s4757_s14 = smov (%p37_p6, %s35_s14), 0  ;;  %s3553_s16 = smul.u32 40, %s216_s15 }
  0x1b   : > { %s39_s17 = ssub.s32 %s3788_s22, %s4757_s14  ;;  %s3554_s24 = smul.u32 40, %s3788_s22 }
  0x1c   : > { %p40_p10 = scmp.eq.s32.totalorder %s39_s17, 0  ;;  %s220_s8 = scalar_lea.vmem [#allocation3], %s3553_s16 }
  0x1d   : > { %s225_s28 = scalar_lea.hbm %s4729_s0, %s3554_s24  ;;  %s228_s11 = sshll.u32 %s220_s8, 4  ;;  %s229_s11 = int_to_ptr.vmem [resolvable:$true] %s228_s11 }
  0x1e   : > { %s3931_s1 = scalar_select %p40_p10, %s3780_s20, %s42_s26  }
  0x1f   : > { %s226_s23 = sshll.u32 %s225_s28, 4  ;;  %s217_s9 = scalar_lea.sflag [#allocation4], %s216_s15  ;;  %s227_s23 = int_to_ptr.hbm [resolvable:$true] %s226_s23 }
  0x20   : > { %s3795_s12 = smov 64   ;;  %s3796_s6 = smov 4  }
  0x21   : > { %3571 = dma.hbm_to_vmem [thread:$0]  (!%p3914_p4), %s227_s23, 640, %s229_s11, %s217_s9, %s3795_s12, %s3795_s12, %s3796_s6  }
  0x22   : > { %240 = sbr.rel (%p3902_p12) target bundleno = 2048 (0x800), region = 32  ;;  %s3938_s17 = sand.u32 (!%p3902_p12), 1, %s3776_s19  }
  0x23   : > { %s3555_s16 = smul.u32 (!%p3902_p12), 40, %s3938_s17  ;;  %s243_s26 = scalar_lea.sflag (!%p3902_p12), [#allocation4], %s3938_s17 }
  0x25   : > { %s3942_s24 = scalar_lea.vmem (!%p3902_p12), [#allocation3], %s3555_s16 }
  0x27   : > { %3759 = dma.done.wait (%p3885_p7), %s243_s26, 640  }
  0x28   : > { %3761 = vsyncadd (%p3885_p7), %s243_s26, 4294966656 }
  0x29   : > { %3763 = dma.done.wait (%p3875_p3), [#allocation7], 64  }
  0x2a   : > { %3765 = vsyncadd (%p3875_p3), [#allocation7], 4294967232  ;;  %v313_v0 = vld [vmem:[%s3942_s24] sm:$0xf]  ;;  %s3797_s23 = smov 127   ;;  %s3798_s6 = smov 126  }
  0x2b   : > { %317 = vst [vmem:[#allocation1 + $0x1] ss:$2 sm:$0xff] %v313_v0  ;;  %s3799_s29 = smov 118   ;;  %s3800_s27 = smov 117   ;;  %v3204_v8 = vld [vmem:[%s3942_s24 + $0x4] sm:$0xf] }
  0x2c   : > { %314 = vst [vmem:[#allocation2] sm:$0x3] %v313_v0  ;;  %s3801_s10 = smov 116   ;;  %s3802_s13 = smov 108   ;;  %v3966_v15 = vld [vmem:[%s3942_s24 + $0x8] sm:$0xf] }
  0x2d   : > { %s3803_s15 = smov 107   ;;  %s3804_s25 = smov 106   ;;  %492 = vst [vmem:[#allocation2 + $0x24] sm:$0x3] %v3966_v15  ;;  %vm323_vm0 = vcmask 1039360   ;;  %vm344_vm1 = vcmask 965632  }
  0x2e   : > { %vm365_vm2 = vcmask 949248   ;;  %vm333_vm3 = vcmask 1031168   ;;  %vm354_vm4 = vcmask 957440   ;;  %vm375_vm5 = vcmask 883712   ;;  %v3994_v44 = vld [vmem:[%s3942_s24 + $0x4] sm:$0xf] }
  0x2f   : > { %vm386_vm6 = vcmask 875520   ;;  %vm396_vm7 = vcmask 867328   ;;  %s3201_s7 = sshll.u32 %s3938_s17, 6  ;;  %p288_p3 = scmp.lt.s32.totalorder %s3784_s21, 1  ;;  %vm301_vm8 = vcmask 7168  }
  0x30   : > { %s4124_s28 = scalar_lea.vmem [#allocation8], %s3201_s7  ;;  %s2984_s16 = scalar_lea.sflag [#allocation5], %s3938_s17 }
  0x31   : > { %s3007_s9 = sshll.u32 %s4124_s28, 4  ;;  %s3008_s9 = int_to_ptr.vmem [resolvable:$true] %s3007_s9 }
  0x32   : > { %v318_v1 = vld.sshfl [vmem:[#allocation1] sm:$0xff pattern:$0x75643120] }
  0x33   : > { %320 = vrot.lane.b32.xlu0 %v318_v1, %s3797_s23  ;;  %327 = vst [vmem:[#allocation1] ss:$2 sm:$0xff] %v313_v0 }
  0x3a   : > { %v328_v2 = vld.sshfl [vmem:[#allocation1] sm:$0xff pattern:$0x75643120] }
  0x3b   : > { %338 = vst [vmem:[#allocation1 + $0x1] ss:$2 sm:$0xff] %v313_v0  ;;  %330 = vrot.lane.b32.xlu0 %v328_v2, %s3798_s6 }
  0x42   : > { %v339_v3 = vld.sshfl [vmem:[#allocation1] sm:$0xff pattern:$0x75643120] }
  0x43   : > { %341 = vrot.lane.b32.xlu1 %v339_v3, %s3799_s29  ;;  %348 = vst [vmem:[#allocation1] ss:$2 sm:$0xff] %v313_v0 }
  0x4a   : > { %v349_v4 = vld.sshfl [vmem:[#allocation1] sm:$0xff pattern:$0x75643120] }
  0x4b   : > { %351 = vrot.lane.b32.xlu1 %v349_v4, %s3800_s27  ;;  %359 = vst [vmem:[#allocation1 + $0x1] ss:$2 sm:$0xff] %v313_v0 }
  0x52   : > { %v360_v5 = vld.sshfl [vmem:[#allocation1] sm:$0xff pattern:$0x75643120] }
  0x53   : > { %369 = vst [vmem:[#allocation1] ss:$2 sm:$0xff] %v313_v0  ;;  %362 = vrot.lane.b32.xlu2 %v360_v5, %s3801_s10 }
  0x5a   : > { %v370_v6 = vld.sshfl [vmem:[#allocation1] sm:$0xff pattern:$0x75643120] }
  0x5b   : > { %380 = vst [vmem:[#allocation1 + $0x1] ss:$2 sm:$0xff] %v313_v0  ;;  %372 = vrot.lane.b32.xlu2 %v370_v6, %s3802_s13 }
  0x62   : > { %v381_v7 = vld.sshfl [vmem:[#allocation1] sm:$0xff pattern:$0x75643120] }
  0x63   : > { %383 = vrot.lane.b32.xlu0 %v381_v7, %s3803_s15  ;;  %390 = vst [vmem:[#allocation1] ss:$2 sm:$0xff] %v313_v0 }
  0x6a   : > { %v391_v9 = vld.sshfl [vmem:[#allocation1] sm:$0xff pattern:$0x75643120] }
  0x6b   : > { %393 = vrot.lane.b32.xlu1 %v391_v9, %s3804_s25  ;;  %407 = vst [vmem:[#allocation1 + $0x1] ss:$2 sm:$0xff] %v3204_v8 }
  0x72   : > { %v408_v10 = vld.sshfl [vmem:[#allocation1] sm:$0xff pattern:$0x75643120] }
  0x73   : > { %411 = vst [vmem:[#allocation1] ss:$2 sm:$0xff] %v3204_v8 }
  0x74   : > { %410 = vst [vmem:[#allocation2 + $0x10] sm:$0xc] %v408_v10 }
  0x7a   : > { %v412_v11 = vld.sshfl [vmem:[#allocation1] sm:$0xff pattern:$0x75643120] }
  0x7b   : > { %421 = vst [vmem:[#allocation1 + $0x1] ss:$2 sm:$0xff] %v3204_v8  ;;  %414 = vrot.lane.b32.xlu2 %v412_v11, %s3797_s23 }
  0x82   : > { %v422_v12 = vld.sshfl [vmem:[#allocation1] sm:$0xff pattern:$0x75643120] }
  0x83   : > { %424 = vrot.lane.b32.xlu0 %v422_v12, %s3798_s6  ;;  %430 = vst [vmem:[#allocation1] ss:$2 sm:$0xff] %v3204_v8 }
  0x8a   : > { %v431_v13 = vld.sshfl [vmem:[#allocation1] sm:$0xff pattern:$0x75643120] }
  0x8b   : > { %433 = vrot.lane.b32.xlu1 %v431_v13, %s3799_s29  ;;  %440 = vst [vmem:[#allocation1 + $0x1] ss:$2 sm:$0xff] %v3204_v8 }
  0x92   : > { %v441_v14 = vld.sshfl [vmem:[#allocation1] sm:$0xff pattern:$0x75643120] }
  0x93   : > { %449 = vst [vmem:[#allocation1] ss:$2 sm:$0xff] %v3204_v8  ;;  %443 = vrot.lane.b32.xlu2 %v441_v14, %s3800_s27 }
  0x9a   : > { %v450_v16 = vld.sshfl [vmem:[#allocation1] sm:$0xff pattern:$0x75643120] }
  0x9b   : > { %452 = vrot.lane.b32.xlu0 %v450_v16, %s3801_s10  ;;  %459 = vst [vmem:[#allocation1 + $0x1] ss:$2 sm:$0xff] %v3204_v8 }
  0xa2   : > { %v460_v17 = vld.sshfl [vmem:[#allocation1] sm:$0xff pattern:$0x75643120] }
  0xa3   : > { %462 = vrot.lane.b32.xlu1 %v460_v17, %s3802_s13  ;;  %468 = vst [vmem:[#allocation1] ss:$2 sm:$0xff] %v3204_v8 }
  0xa5   : > { %v321_v24 = vpop.permute.xlu0 %320 }
  0xa6   : > { %v322_v26 = vrot.slane %v321_v24, 4 }
  0xa8   : > { %v324_v30 = vsel %vm323_vm0, %v321_v24, %v322_v26 }
  0xa9   : > { %326 = vst [vmem:[#allocation2] sm:$0xc] %v324_v30 }
  0xaa   : > { %v469_v18 = vld.sshfl [vmem:[#allocation1] sm:$0xff pattern:$0x75643120] }
  0xab   : > { %478 = vst [vmem:[#allocation1 + $0x1] ss:$2 sm:$0xff] %v3204_v8  ;;  %471 = vrot.lane.b32.xlu2 %v469_v18, %s3803_s15 }
  0xad   : > { %v363_v28 = vpop.permute.xlu2 %362  ;;  %v331_v34 = vpop.permute.xlu0 %330 }
  0xae   : > { %v364_v29 = vrot.slane %v363_v28, 4  ;;  %v332_v36 = vrot.slane %v331_v34, 4 }
  0xb0   : > { %v366_v32 = vsel %vm365_vm2, %v363_v28, %v364_v29  ;;  %v334_v40 = vsel %vm333_vm3, %v331_v34, %v332_v36  ;;  %v3991_v43 = vld [vmem:[#allocation2] sm:$0xf] }
  0xb1   : > { %368 = vst [vmem:[#allocation2 + $0x8] sm:$0xc] %v366_v32 }
  0xb2   : > { %v479_v19 = vld.sshfl [vmem:[#allocation1] sm:$0xff pattern:$0x75643120]  ;;  %336 = vst [vmem:[#allocation2 + $0x4] sm:$0x3] %v334_v40 }
  0xb3   : > { %481 = vrot.lane.b32.xlu0 %v479_v19, %s3804_s25  ;;  %495 = vst [vmem:[#allocation1 + $0x1] ss:$2 sm:$0xff] %v3966_v15 }
  0xb4   : > { %660 = vst [vmem:[#allocation2] sm:$0x3] %v3994_v44 }
  0xb5   : > { %v342_v25 = vpop.permute.xlu1 %341  ;;  %v373_v38 = vpop.permute.xlu2 %372 }
  0xb6   : > { %v343_v27 = vrot.slane %v342_v25, 4  ;;  %v374_v39 = vrot.slane %v373_v38, 4 }
  0xb8   : > { %v345_v31 = vsel %vm344_vm1, %v342_v25, %v343_v27  ;;  %v376_v42 = vsel %vm375_vm5, %v373_v38, %v374_v39  ;;  %v4030_v27 = vld [vmem:[%s3942_s24 + $0x8] sm:$0xf] }
  0xb9   : > { %347 = vst [vmem:[#allocation2 + $0x4] sm:$0xc] %v345_v31 }
  0xba   : > { %v496_v20 = vld.sshfl [vmem:[#allocation1] sm:$0xff pattern:$0x75643120]  ;;  %378 = vst [vmem:[#allocation2 + $0xc] sm:$0x3] %v376_v42 }
  0xbb   : > { %498 = vrot.lane.b32.xlu1 %v496_v20, %s3797_s23  ;;  %504 = vst [vmem:[#allocation1] ss:$2 sm:$0xff] %v3966_v15 }
  0xbd   : > { %v352_v35 = vpop.permute.xlu1 %351 }
  0xbe   : > { %v353_v37 = vrot.slane %v352_v35, 4 }
  0xc0   : > { %v355_v41 = vsel %vm354_vm4, %v352_v35, %v353_v37 }
  0xc1   : > { %357 = vst [vmem:[#allocation2 + $0x8] sm:$0x3] %v355_v41  ;;  %v3805_v41 = vmov 0  }
  0xc2   : > { %v505_v21 = vld.sshfl [vmem:[#allocation1] sm:$0xff pattern:$0x75643120]  ;;  %304 = vst [vmem:[#allocation2 + $0x34] sm:$0xc] %v3805_v41 }
  0xc3   : > { %514 = vst [vmem:[#allocation1 + $0x1] ss:$2 sm:$0xff] %v3966_v15  ;;  %507 = vrot.lane.b32.xlu2 %v505_v21, %s3798_s6 }
  0xc4   : > { %305 = vst [vmem:[#allocation2 + $0x38] sm:$0xf] %v3805_v41 }
  0xc5   : > { %306 = vst [vmem:[#allocation2 + $0x3c] sm:$0xf] %v3805_v41 }
  0xca   : > { %v515_v22 = vld.sshfl [vmem:[#allocation1] sm:$0xff pattern:$0x75643120] }
  0xcb   : > { %517 = vrot.lane.b32.xlu0 %v515_v22, %s3799_s29  ;;  %523 = vst [vmem:[#allocation1] ss:$2 sm:$0xff] %v3966_v15 }
  0xd2   : > { %v524_v23 = vld.sshfl [vmem:[#allocation1] sm:$0xff pattern:$0x75643120] }
  0xd3   : > { %526 = vrot.lane.b32.xlu1 %v524_v23, %s3800_s27  ;;  %533 = vst [vmem:[#allocation1 + $0x1] ss:$2 sm:$0xff] %v3966_v15 }
  0xd5   : > { %v384_v46 = vpop.permute.xlu0 %383  ;;  %v415_v50 = vpop.permute.xlu2 %414 }
  0xd6   : > { %v385_v48 = vrot.slane %v384_v46, 4  ;;  %v416_v51 = vrot.slane %v415_v50, 4 }
  0xd8   : > { %v387_v52 = vsel %vm386_vm6, %v384_v46, %v385_v48  ;;  %v417_v54 = vsel %vm323_vm0, %v415_v50, %v416_v51 }
  0xd9   : > { %389 = vst [vmem:[#allocation2 + $0xc] sm:$0xc] %v387_v52 }
  0xda   : > { %v534_v33 = vld.sshfl [vmem:[#allocation1] sm:$0xff pattern:$0x75643120]  ;;  %419 = vst [vmem:[#allocation2 + $0x14] sm:$0x3] %v417_v54 }
  0xdb   : > { %542 = vst [vmem:[#allocation1] ss:$2 sm:$0xff] %v3966_v15  ;;  %536 = vrot.lane.b32.xlu2 %v534_v33, %s3801_s10 }
  0xdd   : > { %v394_v47 = vpop.permute.xlu1 %393 }
  0xde   : > { %v395_v49 = vrot.slane %v394_v47, 4 }
  0xe0   : > { %v397_v53 = vsel %vm396_vm7, %v394_v47, %v395_v49  ;;  %v3495_v47 = vld [vmem:[#allocation2 + $0x38] sm:$0xff] }
  0xe1   : > { %399 = vst [vmem:[#allocation2 + $0x10] sm:$0x3] %v397_v53  ;;  %634 = vmatpush.bf16.msra.mxu0 %v3495_v47 }
  0xe2   : > { %v543_v45 = vld.sshfl [vmem:[#allocation1] sm:$0xff pattern:$0x75643120] }
  0xe3   : > { %545 = vrot.lane.b32.xlu0 %v543_v45, %s3802_s13  ;;  %552 = vst [vmem:[#allocation1 + $0x1] ss:$2 sm:$0xff] %v3966_v15 }
  0xe8   : > { %v4035_v33 = vld [vmem:[#allocation2 + $0x10] sm:$0xf] }
  0xea   : > { %v553_v55 = vld.sshfl [vmem:[#allocation1] sm:$0xff pattern:$0x75643120] }
  0xeb   : > { %555 = vrot.lane.b32.xlu1 %v553_v55, %s3803_s15  ;;  %561 = vst [vmem:[#allocation1] ss:$2 sm:$0xff] %v3966_v15  ;;  %v4050_v55 = vld [vmem:[%s3942_s24 + $0xc] sm:$0xf] }
  0xed   : > { %v444_v56 = vpop.permute.xlu2 %443 }
  0xee   : > { %v445_v57 = vrot.slane %v444_v56, 4 }
  0xf0   : > { %v446_v58 = vsel %vm354_vm4, %v444_v56, %v445_v57 }
  0xf1   : > { %448 = vst [vmem:[#allocation2 + $0x18] sm:$0xc] %v446_v58 }
  0xf2   : > { %v562_v59 = vld.sshfl [vmem:[#allocation1] sm:$0xff pattern:$0x75643120] }
  0xf3   : > { %564 = vrot.lane.b32.xlu2 %v562_v59, %s3804_s25  ;;  %663 = vst [vmem:[#allocation1 + $0x1] ss:$2 sm:$0xff] %v3994_v44 }
  0xf5   : > { %v425_v60 = vpop.permute.xlu0 %424 }
  0xf6   : > { %v426_v61 = vrot.slane %v425_v60, 4 }
  0xf8   : > { %v427_v62 = vsel %vm333_vm3, %v425_v60, %v426_v61 }
  0xf9   : > { %429 = vst [vmem:[#allocation2 + $0x14] sm:$0xc] %v427_v62 }
  0xfa   : > { %v664_v63 = vld.sshfl [vmem:[#allocation1] sm:$0xff pattern:$0x75643120] }
  0xfb   : > { %666 = vrot.lane.b32.xlu2 %v664_v63, %s3797_s23  ;;  %672 = vst [vmem:[#allocation1] ss:$2 sm:$0xff] %v3994_v44 }
  0xfd   : > { %v434_v0 = vpop.permute.xlu1 %433 }
  0xfe   : > { %v435_v1 = vrot.slane %v434_v0, 4 }
 0x100   : > { %v436_v2 = vsel %vm344_vm1, %v434_v0, %v435_v1 }
 0x101   : > { %438 = vst [vmem:[#allocation2 + $0x18] sm:$0x3] %v436_v2 }
 0x102   : > { %v673_v3 = vld.sshfl [vmem:[#allocation1] sm:$0xff pattern:$0x75643120] }
 0x103   : > { %675 = vrot.lane.b32.xlu2 %v673_v3, %s3798_s6  ;;  %682 = vst [vmem:[#allocation1 + $0x1] ss:$2 sm:$0xff] %v3994_v44 }
 0x105   : > { %v472_v4 = vpop.permute.xlu2 %471 }
 0x106   : > { %v473_v5 = vrot.slane %v472_v4, 4 }
 0x108   : > { %v474_v6 = vsel %vm386_vm6, %v472_v4, %v473_v5  ;;  %v3220_v4 = vld [vmem:[#allocation2 + $0x18] sm:$0xf] }
 0x109   : > { %476 = vst [vmem:[#allocation2 + $0x20] sm:$0x3] %v474_v6 }
 0x10a   : > { %v683_v7 = vld.sshfl [vmem:[#allocation1] sm:$0xff pattern:$0x75643120] }
 0x10b   : > { %685 = vrot.lane.b32.xlu2 %v683_v7, %s3799_s29  ;;  %691 = vst [vmem:[#allocation1] ss:$2 sm:$0xff] %v3994_v44  ;;  %v3490_v7 = vld [vmem:[#allocation2 + $0x10] sm:$0xf0] }
 0x10d   : > { %v453_v8 = vpop.permute.xlu0 %452 }
 0x10e   : > { %v454_v9 = vrot.slane %v453_v8, 4 }
 0x110   : > { %v455_v10 = vsel %vm365_vm2, %v453_v8, %v454_v9  ;;  %v3217_v9 = vor.u32 %v3490_v7, %v4035_v33 }
 0x111   : > { %457 = vst [vmem:[#allocation2 + $0x1c] sm:$0x3] %v455_v10  ;;  %v3212_v10 = vld [vmem:[#allocation2 + $0x8] sm:$0xf] }
 0x112   : > { %v692_v11 = vld.sshfl [vmem:[#allocation1] sm:$0xff pattern:$0x75643120] }
 0x113   : > { %694 = vrot.lane.b32.xlu2 %v692_v11, %s3800_s27  ;;  %701 = vst [vmem:[#allocation1 + $0x1] ss:$2 sm:$0xff] %v3994_v44  ;;  %v3489_v11 = vld [vmem:[#allocation2 + $0x8] sm:$0xf0] }
 0x115   : > { %v463_v12 = vpop.permute.xlu1 %462 }
 0x116   : > { %v464_v13 = vrot.slane %v463_v12, 4 }
 0x118   : > { %v465_v14 = vsel %vm375_vm5, %v463_v12, %v464_v13  ;;  %v3213_v12 = vor.u32 %v3489_v11, %v3212_v10  ;;  %v3488_v13 = vld [vmem:[#allocation2] sm:$0xf0] }
 0x119   : > { %467 = vst [vmem:[#allocation2 + $0x1c] sm:$0xc] %v465_v14 }
 0x11a   : > { %v702_v15 = vld.sshfl [vmem:[#allocation1] sm:$0xff pattern:$0x75643120] }
 0x11b   : > { %704 = vrot.lane.b32.xlu2 %v702_v15, %s3801_s10  ;;  %710 = vst [vmem:[#allocation1] ss:$2 sm:$0xff] %v3994_v44  ;;  %v3209_v15 = vor.u32 %v3488_v13, %v3991_v43 }
 0x11d   : > { %v508_v16 = vpop.permute.xlu2 %507 }
 0x11e   : > { %v509_v17 = vrot.slane %v508_v16, 4 }
 0x120   : > { %v510_v18 = vsel %vm333_vm3, %v508_v16, %v509_v17  ;;  %v3491_v5 = vld [vmem:[#allocation2 + $0x18] sm:$0xf0]  ;;  %v4065_v16 = vld [vmem:[#allocation6] sm:$0xf] }
 0x121   : > { %512 = vst [vmem:[#allocation2 + $0x28] sm:$0x3] %v510_v18  ;;  %v3221_v6 = vor.u32 %v3491_v5, %v3220_v4 }
 0x122   : > { %v711_v19 = vld.sshfl [vmem:[#allocation1] sm:$0xff pattern:$0x75643120] }
 0x123   : > { %720 = vst [vmem:[#allocation1 + $0x1] ss:$2 sm:$0xff] %v3994_v44  ;;  %713 = vrot.lane.b32.xlu2 %v711_v19, %s3802_s13 }
 0x125   : > { %v482_v20 = vpop.permute.xlu0 %481 }
 0x126   : > { %v483_v21 = vrot.slane %v482_v20, 4 }
 0x128   : > { %v484_v22 = vsel %vm396_vm7, %v482_v20, %v483_v21 }
 0x129   : > { %486 = vst [vmem:[#allocation2 + $0x20] sm:$0xc] %v484_v22 }
 0x12a   : > { %v721_v23 = vld.sshfl [vmem:[#allocation1] sm:$0xff pattern:$0x75643120] }
 0x12b   : > { %723 = vrot.lane.b32.xlu0 %v721_v23, %s3803_s15  ;;  %729 = vst [vmem:[#allocation1] ss:$2 sm:$0xff] %v3994_v44 }
 0x12d   : > { %v499_v24 = vpop.permute.xlu1 %498 }
 0x12e   : > { %v500_v25 = vrot.slane %v499_v24, 4 }
 0x130   : > { %v501_v26 = vsel %vm323_vm0, %v499_v24, %v500_v25  ;;  %v3224_v1 = vld [vmem:[#allocation2 + $0x20] sm:$0xf]  ;;  %v4080_v24 = vld [vmem:[%s3942_s24 + $0x8] sm:$0xf] }
 0x131   : > { %503 = vst [vmem:[#allocation2 + $0x24] sm:$0xc] %v501_v26 }
 0x132   : > { %v730_v28 = vld.sshfl [vmem:[#allocation1] sm:$0xff pattern:$0x75643120] }
 0x133   : > { %732 = vrot.lane.b32.xlu1 %v730_v28, %s3804_s25  ;;  %741 = vst [vmem:[#allocation1 + $0x1] ss:$2 sm:$0xff] %v4030_v27 }
 0x135   : > { %v537_v29 = vpop.permute.xlu2 %536 }
 0x136   : > { %v538_v30 = vrot.slane %v537_v29, 4 }
 0x138   : > { %v539_v31 = vsel %vm365_vm2, %v537_v29, %v538_v30  ;;  %v3492_v53 = vld [vmem:[#allocation2 + $0x20] sm:$0xf0] }
 0x139   : > { %541 = vst [vmem:[#allocation2 + $0x2c] sm:$0xc] %v539_v31  ;;  %v3225_v3 = vor.u32 %v3492_v53, %v3224_v1 }
 0x13a   : > { %v742_v32 = vld.sshfl [vmem:[#allocation1] sm:$0xff pattern:$0x75643120]  ;;  %826 = vst [vmem:[#allocation2 + $0x24] sm:$0x3] %v4050_v55 }
 0x13b   : > { %745 = vst [vmem:[#allocation1] ss:$2 sm:$0xff] %v4030_v27 }
 0x13c   : > { %744 = vst [vmem:[#allocation2 + $0x10] sm:$0xc] %v742_v32 }
 0x13d   : > { %v518_v34 = vpop.permute.xlu0 %517 }
 0x13e   : > { %v519_v35 = vrot.slane %v518_v34, 4 }
 0x140   : > { %v520_v36 = vsel %vm344_vm1, %v518_v34, %v519_v35 }
 0x141   : > { %522 = vst [vmem:[#allocation2 + $0x28] sm:$0xc] %v520_v36 }
 0x142   : > { %v746_v37 = vld.sshfl [vmem:[#allocation1] sm:$0xff pattern:$0x75643120] }
 0x143   : > { %755 = vst [vmem:[#allocation1 + $0x1] ss:$2 sm:$0xff] %v4030_v27  ;;  %748 = vrot.lane.b32.xlu2 %v746_v37, %s3797_s23 }
 0x145   : > { %v527_v38 = vpop.permute.xlu1 %526 }
 0x146   : > { %v528_v39 = vrot.slane %v527_v38, 4 }
 0x148   : > { %v529_v40 = vsel %vm354_vm4, %v527_v38, %v528_v39  ;;  %v3228_v60 = vld [vmem:[#allocation2 + $0x28] sm:$0xf] }
 0x149   : > { %531 = vst [vmem:[#allocation2 + $0x2c] sm:$0x3] %v529_v40 }
 0x14a   : > { %v756_v42 = vld.sshfl [vmem:[#allocation1] sm:$0xff pattern:$0x75643120] }
 0x14b   : > { %758 = vrot.lane.b32.xlu2 %v756_v42, %s3798_s6  ;;  %764 = vst [vmem:[#allocation1] ss:$2 sm:$0xff] %v4030_v27 }
 0x14d   : > { %v565_v44 = vpop.permute.xlu2 %564 }
 0x14e   : > { %v566_v45 = vrot.slane %v565_v44, 4 }
 0x150   : > { %v567_v46 = vsel %vm396_vm7, %v565_v44, %v566_v45  ;;  %v3493_v61 = vld [vmem:[#allocation2 + $0x28] sm:$0xf0] }
 0x151   : > { %569 = vst [vmem:[#allocation2 + $0x34] sm:$0x3] %v567_v46  ;;  %v3229_v0 = vor.u32 %v3493_v61, %v3228_v60 }
 0x152   : > { %v765_v48 = vld.sshfl [vmem:[#allocation1] sm:$0xff pattern:$0x75643120] }
 0x153   : > { %767 = vrot.lane.b32.xlu0 %v765_v48, %s3799_s29  ;;  %774 = vst [vmem:[#allocation1 + $0x1] ss:$2 sm:$0xff] %v4030_v27 }
 0x155   : > { %v546_v49 = vpop.permute.xlu0 %545  ;;  %v667_v43 = vpop.permute.xlu2 %666 }
 0x156   : > { %v547_v50 = vrot.slane %v546_v49, 4  ;;  %v668_v20 = vrot.slane %v667_v43, 4 }
 0x158   : > { %v548_v51 = vsel %vm375_vm5, %v546_v49, %v547_v50  ;;  %v3494_v59 = vld [vmem:[#allocation2 + $0x30] sm:$0xf0]  ;;  %v669_v21 = vsel %vm323_vm0, %v667_v43, %v668_v20 }
 0x159   : > { %550 = vst [vmem:[#allocation2 + $0x30] sm:$0x3] %v548_v51 }
 0x15a   : > { %v775_v52 = vld.sshfl [vmem:[#allocation1] sm:$0xff pattern:$0x75643120]  ;;  %671 = vst [vmem:[#allocation2] sm:$0xc] %v669_v21 }
 0x15b   : > { %783 = vst [vmem:[#allocation1] ss:$2 sm:$0xff] %v4030_v27  ;;  %777 = vrot.lane.b32.xlu2 %v775_v52, %s3800_s27 }
 0x15d   : > { %v556_v54 = vpop.permute.xlu1 %555  ;;  %v676_v26 = vpop.permute.xlu2 %675 }
 0x15e   : > { %v557_v56 = vrot.slane %v556_v54, 4 }
 0x160   : > { %v558_v57 = vsel %vm386_vm6, %v556_v54, %v557_v56 }
 0x161   : > { %560 = vst [vmem:[#allocation2 + $0x30] sm:$0xc] %v558_v57  ;;  %v4077_v23 = vld [vmem:[#allocation2] sm:$0xf] }
 0x162   : > { %v784_v58 = vld.sshfl [vmem:[#allocation1] sm:$0xff pattern:$0x75643120]  ;;  %991 = vst [vmem:[#allocation2] sm:$0x3] %v4080_v24 }
 0x163   : > { %786 = vrot.lane.b32.xlu1 %v784_v58, %s3801_s10  ;;  %793 = vst [vmem:[#allocation1 + $0x1] ss:$2 sm:$0xff] %v4030_v27 }
 0x165   : > { %v686_v30 = vpop.permute.xlu2 %685 }
 0x166   : > { %v687_v31 = vrot.slane %v686_v30, 4 }
 0x168   : > { %v3232_v62 = vld [vmem:[#allocation2 + $0x30] sm:$0xf]  ;;  %v688_v32 = vsel %vm344_vm1, %v686_v30, %v687_v31 }
 0x169   : > { %v3233_v63 = vor.u32 %v3494_v59, %v3232_v62  ;;  %690 = vst [vmem:[#allocation2 + $0x4] sm:$0xc] %v688_v32 }
 0x16a   : > { %v794_v2 = vld.sshfl [vmem:[#allocation1] sm:$0xff pattern:$0x75643120] }
 0x16b   : > { %635 = vmatpush.bf16.msra.mxu0 %v3233_v63  ;;  %796 = vrot.lane.b32.xlu0 %v794_v2, %s3802_s13  ;;  %802 = vst [vmem:[#allocation1] ss:$2 sm:$0xff] %v4030_v27 }
 0x16d   : > { %v695_v38 = vpop.permute.xlu2 %694 }
 0x16e   : > { %v696_v39 = vrot.slane %v695_v38, 4 }
 0x16f   : > { %636 = vmatpush.bf16.msra.mxu0 %v3229_v0 }
 0x170   : > { %v697_v40 = vsel %vm354_vm4, %v695_v38, %v696_v39 }
 0x171   : > { %699 = vst [vmem:[#allocation2 + $0x8] sm:$0x3] %v697_v40 }
 0x172   : > { %v803_v8 = vld.sshfl [vmem:[#allocation1] sm:$0xff pattern:$0x75643120] }
 0x173   : > { %637 = vmatpush.bf16.msra.mxu0 %v3225_v3  ;;  %812 = vst [vmem:[#allocation1 + $0x1] ss:$2 sm:$0xff] %v4030_v27  ;;  %805 = vrot.lane.b32.xlu2 %v803_v8, %s3803_s15  ;;  %v677_v27 = vrot.slane %v676_v26, 4  ;;  %v4116_v3 = vld [vmem:[%s3942_s24 + $0xc] sm:$0xf] }
 0x175   : > { %v678_v28 = vsel %vm333_vm3, %v676_v26, %v677_v27  ;;  %v705_v44 = vpop.permute.xlu2 %704  ;;  %v4136_v27 = vld [vmem:[%s4731_s2] ss:$0 sm:$0xff] }
 0x176   : > { %680 = vst [vmem:[#allocation2 + $0x4] sm:$0x3] %v678_v28  ;;  %v706_v46 = vrot.slane %v705_v44, 4 }
 0x177   : > { %638 = vmatpush.bf16.msra.mxu0 %v3221_v6 }
 0x178   : > { %v707_v48 = vsel %vm365_vm2, %v705_v44, %v706_v46 }
 0x179   : > { %709 = vst [vmem:[#allocation2 + $0x8] sm:$0xc] %v707_v48 }
 0x17a   : > { %v813_v14 = vld.sshfl [vmem:[#allocation1] sm:$0xff pattern:$0x75643120] }
 0x17b   : > { %639 = vmatpush.bf16.msra.mxu0 %v3217_v9  ;;  %815 = vrot.lane.b32.xlu1 %v813_v14, %s3804_s25  ;;  %829 = vst [vmem:[#allocation1 + $0x1] ss:$2 sm:$0xff] %v4050_v55 }
 0x17d   : > { %v714_v52 = vpop.permute.xlu2 %713 }
 0x17f   : > { %640 = vmatpush.bf16.msra.mxu0 %v3213_v12 }
 0x182   : > { %v830_v17 = vld.sshfl [vmem:[#allocation1] sm:$0xff pattern:$0x75643120] }
 0x183   : > { %641 = vmatpush.bf16.msra.mxu0 %v3209_v15  ;;  %832 = vrot.lane.b32.xlu0 %v830_v17, %s3797_s23  ;;  %838 = vst [vmem:[#allocation1] ss:$2 sm:$0xff] %v4050_v55 }
 0x186   : > { %642 = vmatmul.bf16.vlgmr.msra.gmra.mxu0 %v4065_v16 }
 0x18a   : > { %v839_v18 = vld.sshfl [vmem:[#allocation1] sm:$0xff pattern:$0x75643120] }
 0x18b   : > { %848 = vst [vmem:[#allocation1 + $0x1] ss:$2 sm:$0xff] %v4050_v55  ;;  %841 = vrot.lane.b32.xlu2 %v839_v18, %s3798_s6 }
 0x192   : > { %v849_v19 = vld.sshfl [vmem:[#allocation1] sm:$0xff pattern:$0x75643120] }
 0x193   : > { %851 = vrot.lane.b32.xlu1 %v849_v19, %s3799_s29  ;;  %857 = vst [vmem:[#allocation1] ss:$2 sm:$0xff] %v4050_v55 }
 0x19a   : > { %v858_v22 = vld.sshfl [vmem:[#allocation1] sm:$0xff pattern:$0x75643120] }
 0x19b   : > { %860 = vrot.lane.b32.xlu0 %v858_v22, %s3800_s27  ;;  %867 = vst [vmem:[#allocation1 + $0x1] ss:$2 sm:$0xff] %v4050_v55 }
 0x19d   : > { %v724_v42 = vpop.permute.xlu0 %723  ;;  %v749_v60 = vpop.permute.xlu2 %748 }
 0x19e   : > { %v725_v45 = vrot.slane %v724_v42, 4  ;;  %v750_v61 = vrot.slane %v749_v60, 4 }
 0x1a0   : > { %v726_v47 = vsel %vm386_vm6, %v724_v42, %v725_v45  ;;  %v751_v62 = vsel %vm323_vm0, %v749_v60, %v750_v61 }
 0x1a1   : > { %728 = vst [vmem:[#allocation2 + $0xc] sm:$0xc] %v726_v47 }
 0x1a2   : > { %v868_v25 = vld.sshfl [vmem:[#allocation1] sm:$0xff pattern:$0x75643120]  ;;  %753 = vst [vmem:[#allocation2 + $0x14] sm:$0x3] %v751_v62 }
 0x1a3   : > { %876 = vst [vmem:[#allocation1] ss:$2 sm:$0xff] %v4050_v55  ;;  %870 = vrot.lane.b32.xlu2 %v868_v25, %s3801_s10  ;;  %v3503_v62 = vld [vmem:[#allocation2 + $0x38] sm:$0xff] }
 0x1a4   : > { %968 = vmatpush.bf16.msra.mxu1 %v3503_v62 }
 0x1a5   : > { %v733_v50 = vpop.permute.xlu1 %732  ;;  %v759_v0 = vpop.permute.xlu2 %758 }
 0x1a6   : > { %v734_v53 = vrot.slane %v733_v50, 4  ;;  %v760_v1 = vrot.slane %v759_v0, 4 }
 0x1a8   : > { %v735_v56 = vsel %vm396_vm7, %v733_v50, %v734_v53  ;;  %v761_v2 = vsel %vm333_vm3, %v759_v0, %v760_v1 }
 0x1a9   : > { %737 = vst [vmem:[#allocation2 + $0x10] sm:$0x3] %v735_v56 }
 0x1aa   : > { %v877_v29 = vld.sshfl [vmem:[#allocation1] sm:$0xff pattern:$0x75643120]  ;;  %763 = vst [vmem:[#allocation2 + $0x14] sm:$0xc] %v761_v2 }
 0x1ab   : > { %879 = vrot.lane.b32.xlu1 %v877_v29, %s3802_s13  ;;  %886 = vst [vmem:[#allocation1 + $0x1] ss:$2 sm:$0xff] %v4050_v55 }
 0x1b0   : > { %v4127_v18 = vld [vmem:[#allocation2 + $0x10] sm:$0xf] }
 0x1b2   : > { %v887_v33 = vld.sshfl [vmem:[#allocation1] sm:$0xff pattern:$0x75643120] }
 0x1b3   : > { %889 = vrot.lane.b32.xlu0 %v887_v33, %s3803_s15  ;;  %895 = vst [vmem:[#allocation1] ss:$2 sm:$0xff] %v4050_v55  ;;  %v715_v55 = vrot.slane %v714_v52, 4 }
 0x1b5   : > { %v716_v58 = vsel %vm375_vm5, %v714_v52, %v715_v55  ;;  %v778_v5 = vpop.permute.xlu2 %777  ;;  %v4152_v55 = vld [vmem:[%s3942_s24 + $0x10] sm:$0xf] }
 0x1b6   : > { %718 = vst [vmem:[#allocation2 + $0xc] sm:$0x3] %v716_v58  ;;  %v779_v6 = vrot.slane %v778_v5, 4 }
 0x1b8   : > { %v780_v9 = vsel %vm354_vm4, %v778_v5, %v779_v6 }
 0x1b9   : > { %782 = vst [vmem:[#allocation2 + $0x18] sm:$0xc] %v780_v9 }
 0x1ba   : > { %v896_v34 = vld.sshfl [vmem:[#allocation1] sm:$0xff pattern:$0x75643120] }
 0x1bb   : > { %898 = vrot.lane.b32.xlu2 %v896_v34, %s3804_s25  ;;  %994 = vst [vmem:[#allocation1 + $0x1] ss:$2 sm:$0xff] %v4080_v24 }
 0x1c2   : > { %v995_v35 = vld.sshfl [vmem:[#allocation1] sm:$0xff pattern:$0x75643120] }
 0x1c3   : > { %1003 = vst [vmem:[#allocation1] ss:$2 sm:$0xff] %v4080_v24  ;;  %997 = vrot.lane.b32.xlu2 %v995_v35, %s3797_s23 }
 0x1c5   : > { %v768_v51 = vpop.permute.xlu0 %767 }
 0x1c6   : > { %v769_v54 = vrot.slane %v768_v51, 4 }
 0x1c8   : > { %v770_v57 = vsel %vm344_vm1, %v768_v51, %v769_v54 }
 0x1c9   : > { %772 = vst [vmem:[#allocation2 + $0x18] sm:$0x3] %v770_v57 }
 0x1ca   : > { %v1004_v36 = vld.sshfl [vmem:[#allocation1] sm:$0xff pattern:$0x75643120] }
 0x1cb   : > { %1013 = vst [vmem:[#allocation1 + $0x1] ss:$2 sm:$0xff] %v4080_v24  ;;  %1006 = vrot.lane.b32.xlu2 %v1004_v36, %s3798_s6 }
 0x1cd   : > { %v806_v17 = vpop.permute.xlu2 %805 }
 0x1ce   : > { %v807_v19 = vrot.slane %v806_v17, 4 }
 0x1d0   : > { %v808_v21 = vsel %vm386_vm6, %v806_v17, %v807_v19  ;;  %v4175_v19 = vld [vmem:[%s3942_s24 + $0xc] sm:$0xf] }
 0x1d1   : > { %810 = vst [vmem:[#allocation2 + $0x20] sm:$0x3] %v808_v21  ;;  %v3247_v21 = vld [vmem:[#allocation2 + $0x8] sm:$0xf] }
 0x1d2   : > { %v1014_v37 = vld.sshfl [vmem:[#allocation1] sm:$0xff pattern:$0x75643120]  ;;  %1322 = vst [vmem:[#allocation2] sm:$0x3] %v4175_v19 }
 0x1d3   : > { %1022 = vst [vmem:[#allocation1] ss:$2 sm:$0xff] %v4080_v24  ;;  %1016 = vrot.lane.b32.xlu2 %v1014_v37, %s3799_s29 }
 0x1d5   : > { %v787_v7 = vpop.permute.xlu1 %786 }
 0x1d6   : > { %v788_v10 = vrot.slane %v787_v7, 4 }
 0x1d8   : > { %v789_v12 = vsel %vm365_vm2, %v787_v7, %v788_v10 }
 0x1d9   : > { %791 = vst [vmem:[#allocation2 + $0x1c] sm:$0x3] %v789_v12 }
 0x1da   : > { %v1023_v41 = vld.sshfl [vmem:[#allocation1] sm:$0xff pattern:$0x75643120] }
 0x1db   : > { %1032 = vst [vmem:[#allocation1 + $0x1] ss:$2 sm:$0xff] %v4080_v24  ;;  %1025 = vrot.lane.b32.xlu2 %v1023_v41, %s3800_s27 }
 0x1dd   : > { %v797_v8 = vpop.permute.xlu0 %796 }
 0x1de   : > { %v798_v11 = vrot.slane %v797_v8, 4 }
 0x1e0   : > { %v799_v13 = vsel %vm375_vm5, %v797_v8, %v798_v11  ;;  %v3255_v11 = vld [vmem:[#allocation2 + $0x18] sm:$0xf] }
 0x1e1   : > { %801 = vst [vmem:[#allocation2 + $0x1c] sm:$0xc] %v799_v13  ;;  %v3498_v13 = vld [vmem:[#allocation2 + $0x10] sm:$0xf0] }
 0x1e2   : > { %v1033_v49 = vld.sshfl [vmem:[#allocation1] sm:$0xff pattern:$0x75643120] }
 0x1e3   : > { %1041 = vst [vmem:[#allocation1] ss:$2 sm:$0xff] %v4080_v24  ;;  %1035 = vrot.lane.b32.xlu2 %v1033_v49, %s3801_s10 }
 0x1e5   : > { %v842_v29 = vpop.permute.xlu2 %841 }
 0x1e6   : > { %v843_v31 = vrot.slane %v842_v29, 4 }
 0x1e8   : > { %v844_v35 = vsel %vm333_vm3, %v842_v29, %v843_v31  ;;  %v3499_v12 = vld [vmem:[#allocation2 + $0x18] sm:$0xf0] }
 0x1e9   : > { %846 = vst [vmem:[#allocation2 + $0x28] sm:$0x3] %v844_v35 }
 0x1ea   : > { %v1042_v59 = vld.sshfl [vmem:[#allocation1] sm:$0xff pattern:$0x75643120] }
 0x1eb   : > { %1044 = vrot.lane.b32.xlu1 %v1042_v59, %s3802_s13  ;;  %1051 = vst [vmem:[#allocation1 + $0x1] ss:$2 sm:$0xff] %v4080_v24 }
 0x1ed   : > { %v816_v43 = vpop.permute.xlu1 %815 }
 0x1ee   : > { %v817_v22 = vrot.slane %v816_v43, 4 }
 0x1f0   : > { %v818_v25 = vsel %vm396_vm7, %v816_v43, %v817_v22  ;;  %v3497_v22 = vld [vmem:[#allocation2 + $0x8] sm:$0xf0] }
 0x1f1   : > { %820 = vst [vmem:[#allocation2 + $0x20] sm:$0xc] %v818_v25  ;;  %v3248_v25 = vor.u32 %v3497_v22, %v3247_v21 }
 0x1f2   : > { %v1052_v63 = vld.sshfl [vmem:[#allocation1] sm:$0xff pattern:$0x75643120] }
 0x1f3   : > { %1060 = vst [vmem:[#allocation1] ss:$2 sm:$0xff] %v4080_v24  ;;  %1054 = vrot.lane.b32.xlu0 %v1052_v63, %s3803_s15 }
 0x1f5   : > { %v833_v20 = vpop.permute.xlu0 %832 }
 0x1f6   : > { %v834_v24 = vrot.slane %v833_v20, 4 }
 0x1f8   : > { %v835_v26 = vsel %vm323_vm0, %v833_v20, %v834_v24  ;;  %v3259_v6 = vld [vmem:[#allocation2 + $0x20] sm:$0xf]  ;;  %v3252_v20 = vor.u32 %v3498_v13, %v4127_v18 }
 0x1f9   : > { %837 = vst [vmem:[#allocation2 + $0x24] sm:$0xc] %v835_v26  ;;  %v3496_v26 = vld [vmem:[#allocation2] sm:$0xf0] }
 0x1fa   : > { %v1061_v4 = vld.sshfl [vmem:[#allocation1] sm:$0xff pattern:$0x75643120]  ;;  %v3244_v31 = vor.u32 %v3496_v26, %v4077_v23 }
 0x1fb   : > { %1072 = vst [vmem:[#allocation1 + $0x1] ss:$2 sm:$0xff] %v4116_v3  ;;  %1063 = vrot.lane.b32.xlu2 %v1061_v4, %s3804_s25 }
 0x1fd   : > { %v871_v41 = vpop.permute.xlu2 %870 }
 0x1fe   : > { %v872_v44 = vrot.slane %v871_v41, 4 }
 0x200   : > { %v873_v45 = vsel %vm365_vm2, %v871_v41, %v872_v44  ;;  %v3500_v54 = vld [vmem:[#allocation2 + $0x20] sm:$0xf0] }
 0x201   : > { %875 = vst [vmem:[#allocation2 + $0x2c] sm:$0xc] %v873_v45  ;;  %v3260_v9 = vor.u32 %v3500_v54, %v3259_v6 }
 0x202   : > { %v1073_v15 = vld.sshfl [vmem:[#allocation1] sm:$0xff pattern:$0x75643120]  ;;  %1157 = vst [vmem:[#allocation2 + $0x24] sm:$0x3] %v4152_v55 }
 0x203   : > { %v643_v14 = vpop.f32.mrf.mxu0  ;;  %1076 = vst [vmem:[#allocation1] ss:$2 sm:$0xff] %v4116_v3 }
 0x204   : > { %647 = vst [vmem:[%s4124_s28] sm:$0xff] %v643_v14  ;;  %v651_v32 = vmul.f32 %v4136_v27, %v643_v14 }
 0x205   : > { %1075 = vst [vmem:[#allocation2 + $0x10] sm:$0xc] %v1073_v15  ;;  %v852_v33 = vpop.permute.xlu1 %851  ;;  %v3256_v15 = vor.u32 %v3499_v12, %v3255_v11 }
 0x206   : > { %v853_v36 = vrot.slane %v852_v33, 4  ;;  %v655_v40 = vmul.f32 %v651_v32, %v643_v14 }
 0x208   : > { %v854_v38 = vsel %vm344_vm1, %v852_v33, %v853_v36 }
 0x209   : > { %856 = vst [vmem:[#allocation2 + $0x28] sm:$0xc] %v854_v38 }
 0x20a   : > { %v1077_v30 = vld.sshfl [vmem:[#allocation1] sm:$0xff pattern:$0x75643120] }
 0x20b   : > { %v645_v28 = vpop.f32.mrf.mxu0  ;;  %1086 = vst [vmem:[#allocation1 + $0x1] ss:$2 sm:$0xff] %v4116_v3  ;;  %1079 = vrot.lane.b32.xlu2 %v1077_v30, %s3797_s23 }
 0x20d   : > { %v861_v34 = vpop.permute.xlu0 %860 }
 0x20e   : > { %v862_v37 = vrot.slane %v861_v34, 4 }
 0x210   : > { %v863_v39 = vsel %vm354_vm4, %v861_v34, %v862_v37  ;;  %v3263_v4 = vld [vmem:[#allocation2 + $0x28] sm:$0xf] }
 0x211   : > { %865 = vst [vmem:[#allocation2 + $0x2c] sm:$0x3] %v863_v39 }
 0x212   : > { %v1087_v42 = vld.sshfl [vmem:[#allocation1] sm:$0xff pattern:$0x75643120] }
 0x213   : > { %1095 = vst [vmem:[#allocation1] ss:$2 sm:$0xff] %v4116_v3  ;;  %1089 = vrot.lane.b32.xlu2 %v1087_v42, %s3798_s6 }
 0x215   : > { %656 = vadd.xlane.f32.xlu1 %v655_v40  ;;  %v899_v47 = vpop.permute.xlu2 %898 }
 0x216   : > { %v900_v48 = vrot.slane %v899_v47, 4 }
 0x218   : > { %v901_v51 = vsel %vm396_vm7, %v899_v47, %v900_v48  ;;  %v3501_v5 = vld [vmem:[#allocation2 + $0x28] sm:$0xf0] }
 0x219   : > { %903 = vst [vmem:[#allocation2 + $0x34] sm:$0x3] %v901_v51  ;;  %v3264_v8 = vor.u32 %v3501_v5, %v3263_v4 }
 0x21a   : > { %v1096_v46 = vld.sshfl [vmem:[#allocation1] sm:$0xff pattern:$0x75643120] }
 0x21b   : > { %1105 = vst [vmem:[#allocation1 + $0x1] ss:$2 sm:$0xff] %v4116_v3 }
 0x21d   : > { %652 = vadd.xlane.f32.xlu0 %v651_v32  ;;  %v880_v49 = vpop.permute.xlu1 %879  ;;  %v998_v17 = vpop.permute.xlu2 %997 }
 0x21e   : > { %v881_v50 = vrot.slane %v880_v49, 4  ;;  %v999_v43 = vrot.slane %v998_v17, 4 }
 0x220   : > { %v882_v52 = vsel %vm375_vm5, %v880_v49, %v881_v50  ;;  %v3502_v63 = vld [vmem:[#allocation2 + $0x30] sm:$0xf0]  ;;  %v1000_v24 = vsel %vm323_vm0, %v998_v17, %v999_v43 }
 0x221   : > { %884 = vst [vmem:[#allocation2 + $0x30] sm:$0x3] %v882_v52 }
 0x222   : > { %v1106_v53 = vld.sshfl [vmem:[#allocation1] sm:$0xff pattern:$0x75643120]  ;;  %1002 = vst [vmem:[#allocation2] sm:$0xc] %v1000_v24 }
 0x223   : > { %1114 = vst [vmem:[#allocation1] ss:$2 sm:$0xff] %v4116_v3 }
 0x225   : > { %v890_v56 = vpop.permute.xlu0 %889  ;;  %v1007_v29 = vpop.permute.xlu2 %1006 }
 0x226   : > { %v891_v57 = vrot.slane %v890_v56, 4  ;;  %v1008_v30 = vrot.slane %v1007_v29, 4 }
 0x228   : > { %v892_v58 = vsel %vm386_vm6, %v890_v56, %v891_v57  ;;  %v1009_v18 = vsel %vm333_vm3, %v1007_v29, %v1008_v30 }
 0x229   : > { %894 = vst [vmem:[#allocation2 + $0x30] sm:$0xc] %v892_v58 }
 0x22a   : > { %v1115_v59 = vld.sshfl [vmem:[#allocation1] sm:$0xff pattern:$0x75643120]  ;;  %1011 = vst [vmem:[#allocation2 + $0x4] sm:$0x3] %v1009_v18 }
 0x22b   : > { %1124 = vst [vmem:[#allocation1 + $0x1] ss:$2 sm:$0xff] %v4116_v3  ;;  %1117 = vrot.lane.b32.xlu2 %v1115_v59, %s3801_s10  ;;  %v3309_v18 = vld [vmem:[%s3942_s24 + $0x10] sm:$0xf] }
 0x22d   : > { %v1017_v33 = vpop.permute.xlu2 %1016 }
 0x22e   : > { %1108 = vrot.lane.b32.xlu1 %v1106_v53, %s3800_s27  ;;  %v1018_v35 = vrot.slane %v1017_v33, 4 }
 0x230   : > { %v3267_v60 = vld [vmem:[#allocation2 + $0x30] sm:$0xf]  ;;  %v1019_v39 = vsel %vm344_vm1, %v1017_v33, %v1018_v35 }
 0x231   : > { %1098 = vrot.lane.b32.xlu0 %v1096_v46, %s3799_s29  ;;  %v3268_v0 = vor.u32 %v3502_v63, %v3267_v60  ;;  %1021 = vst [vmem:[#allocation2 + $0x4] sm:$0xc] %v1019_v39 }
 0x232   : > { %v1125_v61 = vld.sshfl [vmem:[#allocation1] sm:$0xff pattern:$0x75643120] }
 0x233   : > { %1133 = vst [vmem:[#allocation1] ss:$2 sm:$0xff] %v4116_v3  ;;  %969 = vmatpush.bf16.msra.mxu1 %v3268_v0 }
 0x235   : > { %v1026_v42 = vpop.permute.xlu2 %1025 }
 0x236   : > { %v1027_v44 = vrot.slane %v1026_v42, 4 }
 0x237   : > { %970 = vmatpush.bf16.msra.mxu1 %v3264_v8 }
 0x238   : > { %v1028_v45 = vsel %vm354_vm4, %v1026_v42, %v1027_v44  ;;  %v3511_v42 = vld [vmem:[#allocation2 + $0x38] sm:$0xff] }
 0x239   : > { %1127 = vrot.lane.b32.xlu0 %v1125_v61, %s3802_s13  ;;  %1030 = vst [vmem:[#allocation2 + $0x8] sm:$0x3] %v1028_v45  ;;  %1299 = vmatpush.bf16.msra.mxu2 %v3511_v42 }
 0x23a   : > { %v1134_v1 = vld.sshfl [vmem:[#allocation1] sm:$0xff pattern:$0x75643120] }
 0x23b   : > { %1143 = vst [vmem:[#allocation1 + $0x1] ss:$2 sm:$0xff] %v4116_v3  ;;  %1136 = vrot.lane.b32.xlu1 %v1134_v1, %s3803_s15  ;;  %971 = vmatpush.bf16.msra.mxu1 %v3260_v9 }
 0x23d   : > { %v1036_v47 = vpop.permute.xlu2 %1035 }
 0x23e   : > { %v1037_v48 = vrot.slane %v1036_v47, 4 }
 0x23f   : > { %972 = vmatpush.bf16.msra.mxu1 %v3256_v15 }
 0x240   : > { %v1038_v49 = vsel %vm365_vm2, %v1036_v47, %v1037_v48 }
 0x241   : > { %1040 = vst [vmem:[#allocation2 + $0x8] sm:$0xc] %v1038_v49 }
 0x242   : > { %v1144_v2 = vld.sshfl [vmem:[#allocation1] sm:$0xff pattern:$0x75643120] }
 0x243   : > { %1160 = vst [vmem:[#allocation1 + $0x1] ss:$2 sm:$0xff] %v4152_v55  ;;  %1146 = vrot.lane.b32.xlu2 %v1144_v2, %s3804_s25  ;;  %973 = vmatpush.bf16.msra.mxu1 %v3252_v20 }
 0x247   : > { %974 = vmatpush.bf16.msra.mxu1 %v3248_v25 }
 0x24a   : > { %v1161_v7 = vld.sshfl [vmem:[#allocation1] sm:$0xff pattern:$0x75643120] }
 0x24b   : > { %1163 = vrot.lane.b32.xlu0 %v1161_v7, %s3797_s23  ;;  %1169 = vst [vmem:[#allocation1] ss:$2 sm:$0xff] %v4152_v55  ;;  %975 = vmatpush.bf16.msra.mxu1 %v3244_v31 }
 0x24e   : > { %976 = vmatmul.bf16.vlgmr.msra.gmra.mxu1 %v4065_v16 }
 0x252   : > { %v1170_v3 = vld.sshfl [vmem:[#allocation1] sm:$0xff pattern:$0x75643120] }
 0x253   : > { %1172 = vrot.lane.b32.xlu1 %v1170_v3, %s3798_s6  ;;  %1179 = vst [vmem:[#allocation1 + $0x1] ss:$2 sm:$0xff] %v4152_v55 }
 0x255   : > { %v1064_v51 = vpop.permute.xlu2 %1063 }
 0x256   : > { %v1065_v52 = vrot.slane %v1064_v51, 4 }
 0x258   : > { %v1066_v53 = vsel %vm396_vm7, %v1064_v51, %v1065_v52  ;;  %v4234_v51 = vld [vmem:[%s3942_s24 + $0x14] sm:$0xf] }
 0x259   : > { %1068 = vst [vmem:[#allocation2 + $0x10] sm:$0x3] %v1066_v53 }
 0x25a   : > { %v1180_v10 = vld.sshfl [vmem:[#allocation1] sm:$0xff pattern:$0x75643120] }
 0x25b   : > { %1188 = vst [vmem:[#allocation1] ss:$2 sm:$0xff] %v4152_v55  ;;  %1182 = vrot.lane.b32.xlu2 %v1180_v10, %s3799_s29 }
 0x25d   : > { %v1045_v34 = vpop.permute.xlu1 %1044 }
 0x25e   : > { %v1046_v36 = vrot.slane %v1045_v34, 4 }
 0x260   : > { %v1047_v23 = vsel %vm375_vm5, %v1045_v34, %v1046_v36 }
 0x261   : > { %1049 = vst [vmem:[#allocation2 + $0xc] sm:$0x3] %v1047_v23 }
 0x262   : > { %v1189_v14 = vld.sshfl [vmem:[#allocation1] sm:$0xff pattern:$0x75643120] }
 0x263   : > { %1191 = vrot.lane.b32.xlu0 %v1189_v14, %s3800_s27  ;;  %1198 = vst [vmem:[#allocation1 + $0x1] ss:$2 sm:$0xff] %v4152_v55 }
 0x265   : > { %v1055_v37 = vpop.permute.xlu0 %1054 }
 0x266   : > { %v1056_v38 = vrot.slane %v1055_v37, 4 }
 0x268   : > { %v1057_v40 = vsel %vm386_vm6, %v1055_v37, %v1056_v38 }
 0x269   : > { %1059 = vst [vmem:[#allocation2 + $0xc] sm:$0xc] %v1057_v40 }
 0x26a   : > { %v1199_v28 = vld.sshfl [vmem:[#allocation1] sm:$0xff pattern:$0x75643120] }
 0x26b   : > { %1201 = vrot.lane.b32.xlu1 %v1199_v28, %s3801_s10  ;;  %1207 = vst [vmem:[#allocation1] ss:$2 sm:$0xff] %v4152_v55 }
 0x272   : > { %v1208_v32 = vld.sshfl [vmem:[#allocation1] sm:$0xff pattern:$0x75643120] }
 0x273   : > { %1217 = vst [vmem:[#allocation1 + $0x1] ss:$2 sm:$0xff] %v4152_v55  ;;  %1210 = vrot.lane.b32.xlu2 %v1208_v32, %s3802_s13 }
 0x27a   : > { %v1218_v41 = vld.sshfl [vmem:[#allocation1] sm:$0xff pattern:$0x75643120] }
 0x27b   : > { %1220 = vrot.lane.b32.xlu0 %v1218_v41, %s3803_s15  ;;  %1226 = vst [vmem:[#allocation1] ss:$2 sm:$0xff] %v4152_v55  ;;  %v1080_v55 = vpop.permute.xlu2 %1079 }
 0x27c   : > { %v1081_v56 = vrot.slane %v1080_v55, 4 }
 0x27e   : > { %v1082_v58 = vsel %vm323_vm0, %v1080_v55, %v1081_v56 }
 0x27f   : > { %1084 = vst [vmem:[#allocation2 + $0x14] sm:$0x3] %v1082_v58 }
 0x282   : > { %v1227_v46 = vld.sshfl [vmem:[#allocation1] sm:$0xff pattern:$0x75643120] }
 0x283   : > { %1229 = vrot.lane.b32.xlu1 %v1227_v46, %s3804_s25  ;;  %1325 = vst [vmem:[#allocation1 + $0x1] ss:$2 sm:$0xff] %v4175_v19  ;;  %v1090_v61 = vpop.permute.xlu2 %1089 }
 0x284   : > { %v1091_v62 = vrot.slane %v1090_v61, 4 }
 0x286   : > { %v1092_v63 = vsel %vm333_vm3, %v1090_v61, %v1091_v62 }
 0x287   : > { %1094 = vst [vmem:[#allocation2 + $0x14] sm:$0xc] %v1092_v63 }
 0x288   : > { %v4201_v57 = vpop.xlane.xlu1 %656 }
 0x28a   : > { %v1326_v50 = vld.sshfl [vmem:[#allocation1] sm:$0xff pattern:$0x75643120] }
 0x28b   : > { %1328 = vrot.lane.b32.xlu1 %v1326_v50, %s3797_s23  ;;  %1334 = vst [vmem:[#allocation1] ss:$2 sm:$0xff] %v4175_v19  ;;  %v1118_v7 = vpop.permute.xlu2 %1117 }
 0x28c   : > { %v1119_v8 = vrot.slane %v1118_v7, 4 }
 0x28e   : > { %v1120_v3 = vsel %vm365_vm2, %v1118_v7, %v1119_v8 }
 0x28f   : > { %1122 = vst [vmem:[#allocation2 + $0x1c] sm:$0x3] %v1120_v3 }
 0x290   : > { %v4204_v59 = vpop.xlane.xlu0 %652 }
 0x292   : > { %v1335_v54 = vld.sshfl [vmem:[#allocation1] sm:$0xff pattern:$0x75643120] }
 0x293   : > { %1337 = vrot.lane.b32.xlu1 %v1335_v54, %s3798_s6  ;;  %1344 = vst [vmem:[#allocation1 + $0x1] ss:$2 sm:$0xff] %v4175_v19 }
 0x29a   : > { %v1345_v60 = vld.sshfl [vmem:[#allocation1] sm:$0xff pattern:$0x75643120] }
 0x29b   : > { %1347 = vrot.lane.b32.xlu1 %v1345_v60, %s3799_s29  ;;  %1353 = vst [vmem:[#allocation1] ss:$2 sm:$0xff] %v4175_v19 }
 0x29d   : > { %v1147_v13 = vpop.permute.xlu2 %1146 }
 0x29e   : > { %v1148_v14 = vrot.slane %v1147_v13, 4 }
 0x2a0   : > { %v1109_v0 = vpop.permute.xlu1 %1108  ;;  %v1149_v20 = vsel %vm396_vm7, %v1147_v13, %v1148_v14  ;;  %v4256_v14 = vld [vmem:[%s3942_s24 + $0x10] sm:$0xf] }
 0x2a1   : > { %v1110_v1 = vrot.slane %v1109_v0, 4  ;;  %1151 = vst [vmem:[#allocation2 + $0x20] sm:$0xc] %v1149_v20 }
 0x2a2   : > { %v1354_v2 = vld.sshfl [vmem:[#allocation1] sm:$0xff pattern:$0x75643120] }
 0x2a3   : > { %v1099_v4 = vpop.permute.xlu0 %1098  ;;  %v1111_v5 = vsel %vm354_vm4, %v1109_v0, %v1110_v1  ;;  %1356 = vrot.lane.b32.xlu1 %v1354_v2, %s3800_s27  ;;  %1363 = vst [vmem:[#allocation1 + $0x1] ss:$2 sm:$0xff] %v4175_v19 }
 0x2a4   : > { %v1100_v6 = vrot.slane %v1099_v4, 4  ;;  %1113 = vst [vmem:[#allocation2 + $0x18] sm:$0xc] %v1111_v5 }
 0x2a6   : > { %v1101_v9 = vsel %vm344_vm1, %v1099_v4, %v1100_v6 }
 0x2a7   : > { %1103 = vst [vmem:[#allocation2 + $0x18] sm:$0x3] %v1101_v9  ;;  %v3505_v9 = vld [vmem:[#allocation2 + $0x8] sm:$0xff] }
 0x2aa   : > { %v1364_v10 = vld.sshfl [vmem:[#allocation1] sm:$0xff pattern:$0x75643120] }
 0x2ab   : > { %v1128_v11 = vpop.permute.xlu0 %1127  ;;  %1372 = vst [vmem:[#allocation1] ss:$2 sm:$0xff] %v4175_v19  ;;  %1366 = vrot.lane.b32.xlu1 %v1364_v10, %s3801_s10  ;;  %v3504_v10 = vld [vmem:[#allocation2] sm:$0xff] }
 0x2ac   : > { %v1129_v12 = vrot.slane %v1128_v11, 4  ;;  %1653 = vst [vmem:[#allocation2] sm:$0x3] %v4256_v14 }
 0x2ad   : > { %v1137_v17 = vpop.permute.xlu1 %1136 }
 0x2ae   : > { %v1130_v15 = vsel %vm375_vm5, %v1128_v11, %v1129_v12  ;;  %v1138_v43 = vrot.slane %v1137_v17, 4 }
 0x2af   : > { %1132 = vst [vmem:[#allocation2 + $0x1c] sm:$0xc] %v1130_v15 }
 0x2b0   : > { %v1139_v21 = vsel %vm386_vm6, %v1137_v17, %v1138_v43 }
 0x2b1   : > { %1141 = vst [vmem:[#allocation2 + $0x20] sm:$0x3] %v1139_v21 }
 0x2b2   : > { %v1373_v22 = vld.sshfl [vmem:[#allocation1] sm:$0xff pattern:$0x75643120] }
 0x2b3   : > { %1382 = vst [vmem:[#allocation1 + $0x1] ss:$2 sm:$0xff] %v4175_v19  ;;  %1375 = vrot.lane.b32.xlu2 %v1373_v22, %s3802_s13 }
 0x2b5   : > { %v1183_v25 = vpop.permute.xlu2 %1182 }
 0x2b6   : > { %v1184_v26 = vrot.slane %v1183_v25, 4  ;;  %v3507_v6 = vld [vmem:[#allocation2 + $0x18] sm:$0xff] }
 0x2b8   : > { %v1185_v30 = vsel %vm344_vm1, %v1183_v25, %v1184_v26 }
 0x2b9   : > { %1187 = vst [vmem:[#allocation2 + $0x28] sm:$0xc] %v1185_v30 }
 0x2ba   : > { %v1383_v24 = vld.sshfl [vmem:[#allocation1] sm:$0xff pattern:$0x75643120] }
 0x2bb   : > { %1391 = vst [vmem:[#allocation1] ss:$2 sm:$0xff] %v4175_v19  ;;  %1385 = vrot.lane.b32.xlu0 %v1383_v24, %s3803_s15 }
 0x2bd   : > { %v1164_v28 = vpop.permute.xlu0 %1163 }
 0x2be   : > { %v1165_v29 = vrot.slane %v1164_v28, 4 }
 0x2c0   : > { %v1166_v31 = vsel %vm323_vm0, %v1164_v28, %v1165_v29 }
 0x2c1   : > { %1168 = vst [vmem:[#allocation2 + $0x24] sm:$0xc] %v1166_v31 }
 0x2c2   : > { %v1392_v32 = vld.sshfl [vmem:[#allocation1] sm:$0xff pattern:$0x75643120] }
 0x2c3   : > { %1394 = vrot.lane.b32.xlu1 %v1392_v32, %s3804_s25  ;;  %1403 = vst [vmem:[#allocation1 + $0x1] ss:$2 sm:$0xff] %v3309_v18 }
 0x2c5   : > { %v1173_v33 = vpop.permute.xlu1 %1172 }
 0x2c6   : > { %v1174_v34 = vrot.slane %v1173_v33, 4 }
 0x2c8   : > { %v1175_v19 = vsel %vm333_vm3, %v1173_v33, %v1174_v34  ;;  %v3508_v50 = vld [vmem:[#allocation2 + $0x20] sm:$0xff] }
 0x2c9   : > { %1177 = vst [vmem:[#allocation2 + $0x28] sm:$0x3] %v1175_v19 }
 0x2ca   : > { %v1404_v35 = vld.sshfl [vmem:[#allocation1] sm:$0xff pattern:$0x75643120]  ;;  %1488 = vst [vmem:[#allocation2 + $0x24] sm:$0x3] %v4234_v51 }
 0x2cb   : > { %1407 = vst [vmem:[#allocation1] ss:$2 sm:$0xff] %v3309_v18  ;;  %v977_v55 = vpop.f32.mrf.mxu1 }
 0x2cc   : > { %1406 = vst [vmem:[#allocation2 + $0x10] sm:$0xc] %v1404_v35  ;;  %v982_v58 = vmul.f32 %v4136_v27, %v977_v55 }
 0x2cd   : > { %v1211_v36 = vpop.permute.xlu2 %1210  ;;  %981 = vst [vmem:[%s4124_s28 + $0x8] sm:$0xff] %v977_v55 }
 0x2ce   : > { %v1212_v37 = vrot.slane %v1211_v36, 4  ;;  %v986_v62 = vmul.f32 %v982_v58, %v977_v55 }
 0x2d0   : > { %v1213_v38 = vsel %vm375_vm5, %v1211_v36, %v1212_v37 }
 0x2d1   : > { %1215 = vst [vmem:[#allocation2 + $0x30] sm:$0x3] %v1213_v38 }
 0x2d2   : > { %v1408_v39 = vld.sshfl [vmem:[#allocation1] sm:$0xff pattern:$0x75643120] }
 0x2d3   : > { %1417 = vst [vmem:[#allocation1 + $0x1] ss:$2 sm:$0xff] %v3309_v18  ;;  %1410 = vrot.lane.b32.xlu1 %v1408_v39, %s3797_s23  ;;  %v979_v0 = vpop.f32.mrf.mxu1  ;;  %v3506_v8 = vld [vmem:[#allocation2 + $0x10] sm:$0xff] }
 0x2d5   : > { %v1192_v23 = vpop.permute.xlu0 %1191 }
 0x2d6   : > { %v1193_v40 = vrot.slane %v1192_v23, 4 }
 0x2d8   : > { %v1194_v41 = vsel %vm354_vm4, %v1192_v23, %v1193_v40 }
 0x2d9   : > { %1196 = vst [vmem:[#allocation2 + $0x2c] sm:$0x3] %v1194_v41 }
 0x2da   : > { %v1418_v44 = vld.sshfl [vmem:[#allocation1] sm:$0xff pattern:$0x75643120] }
 0x2db   : > { %1426 = vst [vmem:[#allocation1] ss:$2 sm:$0xff] %v3309_v18 }
 0x2dd   : > { %v1202_v45 = vpop.permute.xlu1 %1201 }
 0x2de   : > { %v1203_v46 = vrot.slane %v1202_v45, 4 }
 0x2e0   : > { %v1204_v47 = vsel %vm365_vm2, %v1202_v45, %v1203_v46 }
 0x2e1   : > { %1206 = vst [vmem:[#allocation2 + $0x2c] sm:$0xc] %v1204_v47 }
 0x2e2   : > { %v1427_v48 = vld.sshfl [vmem:[#allocation1] sm:$0xff pattern:$0x75643120] }
 0x2e3   : > { %1436 = vst [vmem:[#allocation1 + $0x1] ss:$2 sm:$0xff] %v3309_v18  ;;  %1429 = vrot.lane.b32.xlu2 %v1427_v48, %s3799_s29 }
 0x2e5   : > { %987 = vadd.xlane.f32.xlu0 %v986_v62 }
 0x2e8   : > { %v3509_v4 = vld [vmem:[#allocation2 + $0x28] sm:$0xff] }
 0x2ea   : > { %v1437_v49 = vld.sshfl [vmem:[#allocation1] sm:$0xff pattern:$0x75643120] }
 0x2eb   : > { %1445 = vst [vmem:[#allocation1] ss:$2 sm:$0xff] %v3309_v18 }
 0x2ed   : > { %v1221_v52 = vpop.permute.xlu0 %1220 }
 0x2ee   : > { %v1222_v53 = vrot.slane %v1221_v52, 4 }
 0x2f0   : > { %v1223_v54 = vsel %vm386_vm6, %v1221_v52, %v1222_v53 }
 0x2f1   : > { %1225 = vst [vmem:[#allocation2 + $0x30] sm:$0xc] %v1223_v54 }
 0x2f2   : > { %v1446_v56 = vld.sshfl [vmem:[#allocation1] sm:$0xff pattern:$0x75643120] }
 0x2f3   : > { %1455 = vst [vmem:[#allocation1 + $0x1] ss:$2 sm:$0xff] %v3309_v18 }
 0x2f5   : > { %v1230_v60 = vpop.permute.xlu1 %1229 }
 0x2f6   : > { %v1231_v61 = vrot.slane %v1230_v60, 4 }
 0x2f8   : > { %v1232_v63 = vsel %vm396_vm7, %v1230_v60, %v1231_v61 }
 0x2f9   : > { %1234 = vst [vmem:[#allocation2 + $0x34] sm:$0x3] %v1232_v63  ;;  %1439 = vrot.lane.b32.xlu0 %v1437_v49, %s3800_s27 }
 0x2fa   : > { %v1456_v1 = vld.sshfl [vmem:[#allocation1] sm:$0xff pattern:$0x75643120] }
 0x2fb   : > { %1464 = vst [vmem:[#allocation1] ss:$2 sm:$0xff] %v3309_v18  ;;  %1458 = vrot.lane.b32.xlu2 %v1456_v1, %s3802_s13 }
 0x2fd   : > { %983 = vadd.xlane.f32.xlu1 %v982_v58 }
 0x300   : > { %v3510_v2 = vld [vmem:[#allocation2 + $0x30] sm:$0xff] }
 0x301   : > { %1300 = vmatpush.bf16.msra.mxu2 %v3510_v2 }
 0x302   : > { %v1465_v5 = vld.sshfl [vmem:[#allocation1] sm:$0xff pattern:$0x75643120] }
 0x303   : > { %1474 = vst [vmem:[#allocation1 + $0x1] ss:$2 sm:$0xff] %v3309_v18  ;;  %1467 = vrot.lane.b32.xlu0 %v1465_v5, %s3803_s15 }
 0x305   : > { %1301 = vmatpush.bf16.msra.mxu2 %v3509_v4 }
 0x309   : > { %1302 = vmatpush.bf16.msra.mxu2 %v3508_v50 }
 0x30a   : > { %v1475_v7 = vld.sshfl [vmem:[#allocation1] sm:$0xff pattern:$0x75643120] }
 0x30b   : > { %1491 = vst [vmem:[#allocation1 + $0x1] ss:$2 sm:$0xff] %v4234_v51 }
 0x30d   : > { %1303 = vmatpush.bf16.msra.mxu2 %v3507_v6 }
 0x311   : > { %1304 = vmatpush.bf16.msra.mxu2 %v3506_v8 }
 0x312   : > { %v1492_v3 = vld.sshfl [vmem:[#allocation1] sm:$0xff pattern:$0x75643120] }
 0x313   : > { %1500 = vst [vmem:[#allocation1] ss:$2 sm:$0xff] %v4234_v51  ;;  %1494 = vrot.lane.b32.xlu2 %v1492_v3, %s3797_s23 }
 0x315   : > { %1305 = vmatpush.bf16.msra.mxu2 %v3505_v9 }
 0x316   : > { %1420 = vrot.lane.b32.xlu1 %v1418_v44, %s3798_s6 }
 0x319   : > { %1306 = vmatpush.bf16.msra.mxu2 %v3504_v10 }
 0x31a   : > { %v1501_v11 = vld.sshfl [vmem:[#allocation1] sm:$0xff pattern:$0x75643120] }
 0x31b   : > { %1510 = vst [vmem:[#allocation1 + $0x1] ss:$2 sm:$0xff] %v4234_v51  ;;  %1503 = vrot.lane.b32.xlu0 %v1501_v11, %s3798_s6 }
 0x31c   : > { %1307 = vmatmul.bf16.vlgmr.msra.gmra.mxu2 %v4065_v16  ;;  %v1329_v16 = vpop.permute.xlu1 %1328 }
 0x31d   : > { %v1330_v17 = vrot.slane %v1329_v16, 4 }
 0x31e   : > { %1448 = vrot.lane.b32.xlu1 %v1446_v56, %s3801_s10  ;;  %v4297_v56 = vld [vmem:[%s3942_s24 + $0x14] sm:$0xf] }
 0x31f   : > { %v1331_v43 = vsel %vm323_vm0, %v1329_v16, %v1330_v17 }
 0x320   : > { %1333 = vst [vmem:[#allocation2] sm:$0xc] %v1331_v43 }
 0x322   : > { %v1511_v12 = vld.sshfl [vmem:[#allocation1] sm:$0xff pattern:$0x75643120] }
 0x323   : > { %1519 = vst [vmem:[#allocation1] ss:$2 sm:$0xff] %v4234_v51 }
 0x324   : > { %v1338_v21 = vpop.permute.xlu1 %1337 }
 0x325   : > { %v1339_v22 = vrot.slane %v1338_v21, 4 }
 0x326   : > { %1477 = vrot.lane.b32.xlu1 %v1475_v7, %s3804_s25 }
 0x327   : > { %v1340_v24 = vsel %vm333_vm3, %v1338_v21, %v1339_v22 }
 0x328   : > { %1342 = vst [vmem:[#allocation2 + $0x4] sm:$0x3] %v1340_v24 }
 0x32a   : > { %v1520_v13 = vld.sshfl [vmem:[#allocation1] sm:$0xff pattern:$0x75643120] }
 0x32b   : > { %1529 = vst [vmem:[#allocation1 + $0x1] ss:$2 sm:$0xff] %v4234_v51  ;;  %1522 = vrot.lane.b32.xlu2 %v1520_v13, %s3800_s27 }
 0x32c   : > { %v1348_v26 = vpop.permute.xlu1 %1347 }
 0x32d   : > { %v1349_v28 = vrot.slane %v1348_v26, 4  ;;  %v1386_v44 = vpop.permute.xlu0 %1385 }
 0x32e   : > { %1513 = vrot.lane.b32.xlu1 %v1511_v12, %s3799_s29  ;;  %v1387_v46 = vrot.slane %v1386_v44, 4 }
 0x32f   : > { %v1350_v29 = vsel %vm344_vm1, %v1348_v26, %v1349_v28 }
 0x330   : > { %1352 = vst [vmem:[#allocation2 + $0x4] sm:$0xc] %v1350_v29  ;;  %v1388_v48 = vsel %vm386_vm6, %v1386_v44, %v1387_v46 }
 0x331   : > { %1390 = vst [vmem:[#allocation2 + $0xc] sm:$0xc] %v1388_v48  ;;  %v4325_v48 = vld [vmem:[%s3942_s24 + $0x18] sm:$0xf] }
 0x332   : > { %v1530_v15 = vld.sshfl [vmem:[#allocation1] sm:$0xff pattern:$0x75643120] }
 0x333   : > { %1538 = vst [vmem:[#allocation1] ss:$2 sm:$0xff] %v4234_v51  ;;  %1532 = vrot.lane.b32.xlu0 %v1530_v15, %s3801_s10 }
 0x334   : > { %v1357_v18 = vpop.permute.xlu1 %1356 }
 0x335   : > { %v1358_v32 = vrot.slane %v1357_v18, 4 }
 0x337   : > { %v1359_v33 = vsel %vm354_vm4, %v1357_v18, %v1358_v32 }
 0x338   : > { %1361 = vst [vmem:[#allocation2 + $0x8] sm:$0x3] %v1359_v33 }
 0x33a   : > { %v1539_v20 = vld.sshfl [vmem:[#allocation1] sm:$0xff pattern:$0x75643120] }
 0x33b   : > { %1548 = vst [vmem:[#allocation1 + $0x1] ss:$2 sm:$0xff] %v4234_v51  ;;  %1541 = vrot.lane.b32.xlu1 %v1539_v20, %s3802_s13 }
 0x33c   : > { %v1367_v36 = vpop.permute.xlu1 %1366 }
 0x33d   : > { %v1368_v37 = vrot.slane %v1367_v36, 4 }
 0x33f   : > { %v1369_v38 = vsel %vm365_vm2, %v1367_v36, %v1368_v37 }
 0x340   : > { %1371 = vst [vmem:[#allocation2 + $0x8] sm:$0xc] %v1369_v38 }
 0x342   : > { %v1549_v25 = vld.sshfl [vmem:[#allocation1] sm:$0xff pattern:$0x75643120] }
 0x343   : > { %1557 = vst [vmem:[#allocation1] ss:$2 sm:$0xff] %v4234_v51  ;;  %1551 = vrot.lane.b32.xlu2 %v1549_v25, %s3803_s15  ;;  %v1376_v51 = vpop.permute.xlu2 %1375 }
 0x344   : > { %v1395_v23 = vpop.permute.xlu1 %1394  ;;  %v1377_v53 = vrot.slane %v1376_v51, 4 }
 0x345   : > { %v1396_v40 = vrot.slane %v1395_v23, 4 }
 0x346   : > { %v1378_v55 = vsel %vm375_vm5, %v1376_v51, %v1377_v53 }
 0x347   : > { %v1397_v41 = vsel %vm396_vm7, %v1395_v23, %v1396_v40  ;;  %1380 = vst [vmem:[#allocation2 + $0xc] sm:$0x3] %v1378_v55  ;;  %v3519_v40 = vld [vmem:[#allocation2 + $0x38] sm:$0xff] }
 0x348   : > { %1399 = vst [vmem:[#allocation2 + $0x10] sm:$0x3] %v1397_v41  ;;  %1630 = vmatpush.bf16.msra.mxu3 %v3519_v40 }
 0x34a   : > { %v1558_v30 = vld.sshfl [vmem:[#allocation1] sm:$0xff pattern:$0x75643120] }
 0x34b   : > { %1560 = vrot.lane.b32.xlu0 %v1558_v30, %s3804_s25  ;;  %1656 = vst [vmem:[#allocation1 + $0x1] ss:$2 sm:$0xff] %v4256_v14  ;;  %v1430_v60 = vpop.permute.xlu2 %1429 }
 0x34c   : > { %v1411_v45 = vpop.permute.xlu1 %1410  ;;  %v1431_v62 = vrot.slane %v1430_v60, 4 }
 0x34d   : > { %v1412_v47 = vrot.slane %v1411_v45, 4 }
 0x34e   : > { %v1432_v2 = vsel %vm344_vm1, %v1430_v60, %v1431_v62 }
 0x34f   : > { %v1413_v49 = vsel %vm323_vm0, %v1411_v45, %v1412_v47  ;;  %1434 = vst [vmem:[#allocation2 + $0x18] sm:$0x3] %v1432_v2 }
 0x350   : > { %1415 = vst [vmem:[#allocation2 + $0x14] sm:$0x3] %v1413_v49 }
 0x352   : > { %v1657_v31 = vld.sshfl [vmem:[#allocation1] sm:$0xff pattern:$0x75643120] }
 0x353   : > { %1659 = vrot.lane.b32.xlu0 %v1657_v31, %s3797_s23  ;;  %1665 = vst [vmem:[#allocation1] ss:$2 sm:$0xff] %v4256_v14 }
 0x355   : > { %v1459_v7 = vpop.permute.xlu2 %1458 }
 0x356   : > { %v1460_v9 = vrot.slane %v1459_v7, 4 }
 0x358   : > { %v4291_v52 = vpop.xlane.xlu0 %987  ;;  %v1461_v12 = vsel %vm375_vm5, %v1459_v7, %v1460_v9 }
 0x359   : > { %1463 = vst [vmem:[#allocation2 + $0x1c] sm:$0xc] %v1461_v12 }
 0x35a   : > { %v1666_v34 = vld.sshfl [vmem:[#allocation1] sm:$0xff pattern:$0x75643120] }
 0x35b   : > { %1668 = vrot.lane.b32.xlu0 %v1666_v34, %s3798_s6  ;;  %1675 = vst [vmem:[#allocation1 + $0x1] ss:$2 sm:$0xff] %v4256_v14 }
 0x362   : > { %v1676_v19 = vld.sshfl [vmem:[#allocation1] sm:$0xff pattern:$0x75643120] }
 0x363   : > { %1678 = vrot.lane.b32.xlu0 %v1676_v19, %s3799_s29  ;;  %1684 = vst [vmem:[#allocation1] ss:$2 sm:$0xff] %v4256_v14 }
 0x36a   : > { %v1685_v35 = vld.sshfl [vmem:[#allocation1] sm:$0xff pattern:$0x75643120] }
 0x36b   : > { %1694 = vst [vmem:[#allocation1 + $0x1] ss:$2 sm:$0xff] %v4256_v14  ;;  %1687 = vrot.lane.b32.xlu0 %v1685_v35, %s3800_s27  ;;  %v1440_v61 = vpop.permute.xlu0 %1439 }
 0x36c   : > { %v1441_v63 = vrot.slane %v1440_v61, 4 }
 0x36d   : > { %v1495_v16 = vpop.permute.xlu2 %1494 }
 0x36e   : > { %v1442_v4 = vsel %vm354_vm4, %v1440_v61, %v1441_v63  ;;  %v1496_v43 = vrot.slane %v1495_v16, 4 }
 0x36f   : > { %1444 = vst [vmem:[#allocation2 + $0x18] sm:$0xc] %v1442_v4 }
 0x370   : > { %v4293_v54 = vpop.xlane.xlu1 %983  ;;  %v1497_v24 = vsel %vm323_vm0, %v1495_v16, %v1496_v43 }
 0x371   : > { %1499 = vst [vmem:[#allocation2 + $0x24] sm:$0xc] %v1497_v24 }
 0x372   : > { %v1695_v39 = vld.sshfl [vmem:[#allocation1] sm:$0xff pattern:$0x75643120] }
 0x373   : > { %1703 = vst [vmem:[#allocation1] ss:$2 sm:$0xff] %v4256_v14  ;;  %1697 = vrot.lane.b32.xlu0 %v1695_v39, %s3801_s10 }
 0x375   : > { %v1468_v8 = vpop.permute.xlu0 %1467 }
 0x376   : > { %v1469_v3 = vrot.slane %v1468_v8, 4 }
 0x378   : > { %v1470_v13 = vsel %vm386_vm6, %v1468_v8, %v1469_v3 }
 0x379   : > { %1472 = vst [vmem:[#allocation2 + $0x20] sm:$0x3] %v1470_v13 }
 0x37a   : > { %v1704_v42 = vld.sshfl [vmem:[#allocation1] sm:$0xff pattern:$0x75643120] }
 0x37b   : > { %1713 = vst [vmem:[#allocation1 + $0x1] ss:$2 sm:$0xff] %v4256_v14  ;;  %1706 = vrot.lane.b32.xlu1 %v1704_v42, %s3802_s13 }
 0x382   : > { %v1714_v50 = vld.sshfl [vmem:[#allocation1] sm:$0xff pattern:$0x75643120] }
 0x383   : > { %1722 = vst [vmem:[#allocation1] ss:$2 sm:$0xff] %v4256_v14  ;;  %1716 = vrot.lane.b32.xlu0 %v1714_v50, %s3803_s15 }
 0x385   : > { %v1523_v30 = vpop.permute.xlu2 %1522 }
 0x386   : > { %v1524_v31 = vrot.slane %v1523_v30, 4 }
 0x388   : > { %v1421_v0 = vpop.permute.xlu1 %1420  ;;  %v1525_v19 = vsel %vm354_vm4, %v1523_v30, %v1524_v31 }
 0x389   : > { %v1422_v1 = vrot.slane %v1421_v0, 4  ;;  %1527 = vst [vmem:[#allocation2 + $0x2c] sm:$0x3] %v1525_v19 }
 0x38a   : > { %v1723_v58 = vld.sshfl [vmem:[#allocation1] sm:$0xff pattern:$0x75643120] }
 0x38b   : > { %1725 = vrot.lane.b32.xlu2 %v1723_v58, %s3804_s25  ;;  %1734 = vst [vmem:[#allocation1 + $0x1] ss:$2 sm:$0xff] %v4297_v56  ;;  %v1423_v5 = vsel %vm333_vm3, %v1421_v0, %v1422_v1 }
 0x38c   : > { %1425 = vst [vmem:[#allocation2 + $0x14] sm:$0xc] %v1423_v5 }
 0x38d   : > { %v1504_v17 = vpop.permute.xlu0 %1503 }
 0x38e   : > { %v1505_v20 = vrot.slane %v1504_v17, 4 }
 0x390   : > { %v1449_v10 = vpop.permute.xlu1 %1448  ;;  %v1506_v25 = vsel %vm333_vm3, %v1504_v17, %v1505_v20  ;;  %v4345_v17 = vld [vmem:[#allocation6] sm:$0xf] }
 0x391   : > { %v1450_v11 = vrot.slane %v1449_v10, 4  ;;  %1508 = vst [vmem:[#allocation2 + $0x28] sm:$0x3] %v1506_v25 }
 0x392   : > { %v1735_v6 = vld.sshfl [vmem:[#allocation1] sm:$0xff pattern:$0x75643120] }
 0x393   : > { %1738 = vst [vmem:[#allocation1] ss:$2 sm:$0xff] %v4297_v56  ;;  %v1451_v14 = vsel %vm365_vm2, %v1449_v10, %v1450_v11  ;;  %v3513_v11 = vld [vmem:[#allocation2 + $0x8] sm:$0xff] }
 0x394   : > { %1737 = vst [vmem:[#allocation2 + $0x10] sm:$0xc] %v1735_v6 }
 0x395   : > { %1453 = vst [vmem:[#allocation2 + $0x1c] sm:$0x3] %v1451_v14 }
 0x398   : > { %v1478_v21 = vpop.permute.xlu1 %1477 }
 0x399   : > { %v1479_v22 = vrot.slane %v1478_v21, 4 }
 0x39a   : > { %v1739_v15 = vld.sshfl [vmem:[#allocation1] sm:$0xff pattern:$0x75643120] }
 0x39b   : > { %1741 = vrot.lane.b32.xlu0 %v1739_v15, %s3797_s23  ;;  %1748 = vst [vmem:[#allocation1 + $0x1] ss:$2 sm:$0xff] %v4297_v56  ;;  %v1480_v28 = vsel %vm396_vm7, %v1478_v21, %v1479_v22 }
 0x39c   : > { %1482 = vst [vmem:[#allocation2 + $0x20] sm:$0xc] %v1480_v28  ;;  %v3515_v7 = vld [vmem:[#allocation2 + $0x18] sm:$0xff] }
 0x39d   : > { %v1552_v39 = vpop.permute.xlu2 %1551 }
 0x39e   : > { %v1553_v41 = vrot.slane %v1552_v39, 4 }
 0x39f   : > { %v1308_v26 = vpop.f32.mrf.mxu2 }
 0x3a0   : > { %1312 = vst [vmem:[%s4124_s28 + $0x10] sm:$0xff] %v1308_v26  ;;  %v1514_v32 = vpop.permute.xlu1 %1513  ;;  %v1313_v44 = vmul.f32 %v4136_v27, %v1308_v26  ;;  %v1554_v45 = vsel %vm386_vm6, %v1552_v39, %v1553_v41 }
 0x3a1   : > { %v1515_v34 = vrot.slane %v1514_v32, 4  ;;  %1556 = vst [vmem:[#allocation2 + $0x30] sm:$0xc] %v1554_v45 }
 0x3a2   : > { %v1749_v29 = vld.sshfl [vmem:[#allocation1] sm:$0xff pattern:$0x75643120]  ;;  %v1317_v63 = vmul.f32 %v1313_v44, %v1308_v26 }
 0x3a3   : > { %1751 = vrot.lane.b32.xlu0 %v1749_v29, %s3798_s6  ;;  %1757 = vst [vmem:[#allocation1] ss:$2 sm:$0xff] %v4297_v56  ;;  %v1516_v36 = vsel %vm344_vm1, %v1514_v32, %v1515_v34  ;;  %v3516_v47 = vld [vmem:[#allocation2 + $0x20] sm:$0xff]  ;;  %v3378_v29 = vld [vmem:[%s3942_s24 + $0x14] sm:$0xf] }
 0x3a4   : > { %1518 = vst [vmem:[#allocation2 + $0x28] sm:$0xc] %v1516_v36 }
 0x3a5   : > { %v1533_v18 = vpop.permute.xlu0 %1532  ;;  %1819 = vst [vmem:[#allocation2 + $0x24] sm:$0x3] %v4325_v48 }
 0x3a6   : > { %v1534_v33 = vrot.slane %v1533_v18, 4 }
 0x3a7   : > { %v1310_v37 = vpop.f32.mrf.mxu2 }
 0x3a8   : > { %v1535_v35 = vsel %vm365_vm2, %v1533_v18, %v1534_v33 }
 0x3a9   : > { %1537 = vst [vmem:[#allocation2 + $0x2c] sm:$0xc] %v1535_v35 }
 0x3aa   : > { %v1758_v38 = vld.sshfl [vmem:[#allocation1] sm:$0xff pattern:$0x75643120] }
 0x3ab   : > { %1760 = vrot.lane.b32.xlu1 %v1758_v38, %s3799_s29  ;;  %1767 = vst [vmem:[#allocation1 + $0x1] ss:$2 sm:$0xff] %v4297_v56 }
 0x3ad   : > { %v1542_v23 = vpop.permute.xlu1 %1541 }
 0x3ae   : > { %v1543_v42 = vrot.slane %v1542_v23, 4 }
 0x3b0   : > { %v1544_v46 = vsel %vm375_vm5, %v1542_v23, %v1543_v42  ;;  %v3517_v0 = vld [vmem:[#allocation2 + $0x28] sm:$0xff]  ;;  %v985_v42 = vadd.f32 %v4293_v54, %v4204_v59 }
 0x3b1   : > { %1546 = vst [vmem:[#allocation2 + $0x30] sm:$0x3] %v1544_v46 }
 0x3b2   : > { %v1768_v49 = vld.sshfl [vmem:[#allocation1] sm:$0xff pattern:$0x75643120] }
 0x3b3   : > { %1776 = vst [vmem:[#allocation1] ss:$2 sm:$0xff] %v4297_v56 }
 0x3b4   : > { %1314 = vadd.xlane.f32.xlu2 %v1313_v44 }
 0x3ba   : > { %v1777_v50 = vld.sshfl [vmem:[#allocation1] sm:$0xff pattern:$0x75643120] }
 0x3bb   : > { %1786 = vst [vmem:[#allocation1 + $0x1] ss:$2 sm:$0xff] %v4297_v56 }
 0x3bd   : > { %v1561_v51 = vpop.permute.xlu0 %1560 }
 0x3be   : > { %v1562_v27 = vrot.slane %v1561_v51, 4 }
 0x3c0   : > { %v1563_v53 = vsel %vm396_vm7, %v1561_v51, %v1562_v27 }
 0x3c1   : > { %1565 = vst [vmem:[#allocation2 + $0x34] sm:$0x3] %v1563_v53  ;;  %v4382_v53 = vld [vmem:[%s3942_s24 + $0x18] sm:$0xf] }
 0x3c2   : > { %v1787_v55 = vld.sshfl [vmem:[#allocation1] sm:$0xff pattern:$0x75643120] }
 0x3c3   : > { %1789 = vrot.lane.b32.xlu1 %v1787_v55, %s3802_s13  ;;  %1795 = vst [vmem:[#allocation1] ss:$2 sm:$0xff] %v4297_v56 }
 0x3c5   : > { %v1660_v58 = vpop.permute.xlu0 %1659 }
 0x3c6   : > { %v1661_v60 = vrot.slane %v1660_v58, 4 }
 0x3c8   : > { %v3518_v61 = vld [vmem:[#allocation2 + $0x30] sm:$0xff]  ;;  %v1662_v62 = vsel %vm323_vm0, %v1660_v58, %v1661_v60 }
 0x3c9   : > { %1664 = vst [vmem:[#allocation2] sm:$0xc] %v1662_v62  ;;  %1631 = vmatpush.bf16.msra.mxu3 %v3518_v61 }
 0x3ca   : > { %v1796_v1 = vld.sshfl [vmem:[#allocation1] sm:$0xff pattern:$0x75643120] }
 0x3cb   : > { %1805 = vst [vmem:[#allocation1 + $0x1] ss:$2 sm:$0xff] %v4297_v56  ;;  %v3514_v56 = vld [vmem:[#allocation2 + $0x10] sm:$0xff] }
 0x3cc   : > { %1779 = vrot.lane.b32.xlu2 %v1777_v50, %s3801_s10 }
 0x3cd   : > { %1318 = vadd.xlane.f32.xlu0 %v1317_v63  ;;  %v1669_v2 = vpop.permute.xlu0 %1668  ;;  %1632 = vmatpush.bf16.msra.mxu3 %v3517_v0 }
 0x3ce   : > { %v1670_v4 = vrot.slane %v1669_v2, 4 }
 0x3d0   : > { %v3512_v5 = vld [vmem:[#allocation2] sm:$0xff]  ;;  %v1671_v6 = vsel %vm333_vm3, %v1669_v2, %v1670_v4 }
 0x3d1   : > { %1673 = vst [vmem:[#allocation2 + $0x4] sm:$0x3] %v1671_v6  ;;  %1633 = vmatpush.bf16.msra.mxu3 %v3516_v47 }
 0x3d2   : > { %v1806_v8 = vld.sshfl [vmem:[#allocation1] sm:$0xff pattern:$0x75643120]  ;;  %1984 = vst [vmem:[#allocation2] sm:$0x3] %v3378_v29 }
 0x3d3   : > { %1822 = vst [vmem:[#allocation1 + $0x1] ss:$2 sm:$0xff] %v4325_v48 }
 0x3d4   : > { %1808 = vrot.lane.b32.xlu2 %v1806_v8, %s3804_s25 }
 0x3d5   : > { %v1679_v9 = vpop.permute.xlu0 %1678  ;;  %1634 = vmatpush.bf16.msra.mxu3 %v3515_v7 }
 0x3d6   : > { %v1680_v3 = vrot.slane %v1679_v9, 4 }
 0x3d8   : > { %v1681_v10 = vsel %vm344_vm1, %v1679_v9, %v1680_v3 }
 0x3d9   : > { %1683 = vst [vmem:[#allocation2 + $0x4] sm:$0xc] %v1681_v10  ;;  %1635 = vmatpush.bf16.msra.mxu3 %v3514_v56 }
 0x3da   : > { %v1823_v12 = vld.sshfl [vmem:[#allocation1] sm:$0xff pattern:$0x75643120] }
 0x3db   : > { %1825 = vrot.lane.b32.xlu1 %v1823_v12, %s3797_s23  ;;  %1831 = vst [vmem:[#allocation1] ss:$2 sm:$0xff] %v4325_v48 }
 0x3dd   : > { %v1688_v13 = vpop.permute.xlu0 %1687  ;;  %1636 = vmatpush.bf16.msra.mxu3 %v3513_v11 }
 0x3de   : > { %v1689_v14 = vrot.slane %v1688_v13, 4 }
 0x3e0   : > { %v1690_v15 = vsel %vm354_vm4, %v1688_v13, %v1689_v14 }
 0x3e1   : > { %1770 = vrot.lane.b32.xlu0 %v1768_v49, %s3800_s27  ;;  %1692 = vst [vmem:[#allocation2 + $0x8] sm:$0x3] %v1690_v15  ;;  %1637 = vmatpush.bf16.msra.mxu3 %v3512_v5 }
 0x3e2   : > { %v1832_v16 = vld.sshfl [vmem:[#allocation1] sm:$0xff pattern:$0x75643120] }
 0x3e3   : > { %1841 = vst [vmem:[#allocation1 + $0x1] ss:$2 sm:$0xff] %v4325_v48 }
 0x3e4   : > { %1638 = vmatmul.bf16.vlgmr.msra.gmra.mxu3 %v4345_v17 }
 0x3e5   : > { %v1726_v43 = vpop.permute.xlu2 %1725  ;;  %v1698_v20 = vpop.permute.xlu0 %1697 }
 0x3e6   : > { %v1727_v21 = vrot.slane %v1726_v43, 4  ;;  %v1699_v22 = vrot.slane %v1698_v20, 4 }
 0x3e8   : > { %v1728_v24 = vsel %vm396_vm7, %v1726_v43, %v1727_v21  ;;  %v1700_v25 = vsel %vm365_vm2, %v1698_v20, %v1699_v22 }
 0x3e9   : > { %1798 = vrot.lane.b32.xlu0 %v1796_v1, %s3803_s15  ;;  %1730 = vst [vmem:[#allocation2 + $0x10] sm:$0x3] %v1728_v24 }
 0x3ea   : > { %1702 = vst [vmem:[#allocation2 + $0x8] sm:$0xc] %v1700_v25  ;;  %v1842_v26 = vld.sshfl [vmem:[#allocation1] sm:$0xff pattern:$0x75643120] }
 0x3eb   : > { %1850 = vst [vmem:[#allocation1] ss:$2 sm:$0xff] %v4325_v48  ;;  %1844 = vrot.lane.b32.xlu2 %v1842_v26, %s3799_s29 }
 0x3ed   : > { %v1707_v50 = vpop.permute.xlu1 %1706 }
 0x3ee   : > { %v1708_v51 = vrot.slane %v1707_v50, 4 }
 0x3f0   : > { %v1709_v27 = vsel %vm375_vm5, %v1707_v50, %v1708_v51 }
 0x3f1   : > { %1834 = vrot.lane.b32.xlu0 %v1832_v16, %s3798_s6  ;;  %1711 = vst [vmem:[#allocation2 + $0xc] sm:$0x3] %v1709_v27 }
 0x3f2   : > { %v1851_v28 = vld.sshfl [vmem:[#allocation1] sm:$0xff pattern:$0x75643120] }
 0x3f3   : > { %1853 = vrot.lane.b32.xlu1 %v1851_v28, %s3800_s27  ;;  %1860 = vst [vmem:[#allocation1 + $0x1] ss:$2 sm:$0xff] %v4325_v48 }
 0x3f5   : > { %v1717_v18 = vpop.permute.xlu0 %1716 }
 0x3f6   : > { %v1718_v32 = vrot.slane %v1717_v18, 4 }
 0x3f8   : > { %v1719_v33 = vsel %vm386_vm6, %v1717_v18, %v1718_v32 }
 0x3f9   : > { %1721 = vst [vmem:[#allocation2 + $0xc] sm:$0xc] %v1719_v33 }
 0x3fa   : > { %v1861_v30 = vld.sshfl [vmem:[#allocation1] sm:$0xff pattern:$0x75643120] }
 0x3fb   : > { %1863 = vrot.lane.b32.xlu0 %v1861_v30, %s3801_s10  ;;  %1869 = vst [vmem:[#allocation1] ss:$2 sm:$0xff] %v4325_v48 }
 0x402   : > { %v1870_v31 = vld.sshfl [vmem:[#allocation1] sm:$0xff pattern:$0x75643120] }
 0x403   : > { %1879 = vst [vmem:[#allocation1 + $0x1] ss:$2 sm:$0xff] %v4325_v48  ;;  %1872 = vrot.lane.b32.xlu2 %v1870_v31, %s3802_s13 }
 0x40a   : > { %v1880_v34 = vld.sshfl [vmem:[#allocation1] sm:$0xff pattern:$0x75643120] }
 0x40b   : > { %1882 = vrot.lane.b32.xlu1 %v1880_v34, %s3803_s15  ;;  %1888 = vst [vmem:[#allocation1] ss:$2 sm:$0xff] %v4325_v48 }
 0x40d   : > { %v1742_v19 = vpop.permute.xlu0 %1741 }
 0x40e   : > { %v1743_v35 = vrot.slane %v1742_v19, 4 }
 0x410   : > { %v1744_v36 = vsel %vm323_vm0, %v1742_v19, %v1743_v35  ;;  %v3527_v35 = vld [vmem:[#allocation2 + $0x38] sm:$0xff] }
 0x411   : > { %1746 = vst [vmem:[#allocation2 + $0x14] sm:$0x3] %v1744_v36  ;;  %1961 = vmatpush.bf16.msrb.mxu0 %v3527_v35 }
 0x412   : > { %v1889_v37 = vld.sshfl [vmem:[#allocation1] sm:$0xff pattern:$0x75643120] }
 0x413   : > { %1891 = vrot.lane.b32.xlu0 %v1889_v37, %s3804_s25  ;;  %1987 = vst [vmem:[#allocation1 + $0x1] ss:$2 sm:$0xff] %v3378_v29 }
 0x415   : > { %v1752_v38 = vpop.permute.xlu0 %1751 }
 0x416   : > { %v1753_v39 = vrot.slane %v1752_v38, 4 }
 0x418   : > { %v1754_v23 = vsel %vm333_vm3, %v1752_v38, %v1753_v39  ;;  %v4409_v39 = vld [vmem:[%s4731_s2] ss:$0 sm:$0xff] }
 0x419   : > { %1756 = vst [vmem:[#allocation2 + $0x14] sm:$0xc] %v1754_v23 }
 0x41a   : > { %v1988_v40 = vld.sshfl [vmem:[#allocation1] sm:$0xff pattern:$0x75643120] }
 0x41b   : > { %1996 = vst [vmem:[#allocation1] ss:$2 sm:$0xff] %v3378_v29  ;;  %1990 = vrot.lane.b32.xlu0 %v1988_v40, %s3797_s23 }
 0x41d   : > { %v1761_v61 = vpop.permute.xlu1 %1760 }
 0x41e   : > { %v1762_v63 = vrot.slane %v1761_v61, 4 }
 0x420   : > { %v1763_v0 = vsel %vm344_vm1, %v1761_v61, %v1762_v63  ;;  %v3520_v63 = vld [vmem:[#allocation2] sm:$0xff] }
 0x421   : > { %1765 = vst [vmem:[#allocation2 + $0x18] sm:$0x3] %v1763_v0 }
 0x422   : > { %v1997_v41 = vld.sshfl [vmem:[#allocation1] sm:$0xff pattern:$0x75643120] }
 0x423   : > { %1999 = vrot.lane.b32.xlu1 %v1997_v41, %s3798_s6  ;;  %2006 = vst [vmem:[#allocation1 + $0x1] ss:$2 sm:$0xff] %v3378_v29  ;;  %v4413_v41 = vld [vmem:[%s3942_s24 + $0x1c] sm:$0xf] }
 0x427   : > { %v1315_v44 = vpop.xlane.xlu2 %1314 }
 0x428   : > { %v4371_v45 = vadd.f32 %v1315_v44, %v985_v42 }
 0x42a   : > { %v2007_v46 = vld.sshfl [vmem:[#allocation1] sm:$0xff pattern:$0x75643120] }
 0x42b   : > { %2015 = vst [vmem:[#allocation1] ss:$2 sm:$0xff] %v3378_v29  ;;  %2009 = vrot.lane.b32.xlu0 %v2007_v46, %s3799_s29 }
 0x42f   : > { %v1780_v2 = vpop.permute.xlu2 %1779 }
 0x430   : > { %v1781_v5 = vrot.slane %v1780_v2, 4 }
 0x432   : > { %v2016_v47 = vld.sshfl [vmem:[#allocation1] sm:$0xff pattern:$0x75643120]  ;;  %v1782_v9 = vsel %vm365_vm2, %v1780_v2, %v1781_v5 }
 0x433   : > { %2025 = vst [vmem:[#allocation1 + $0x1] ss:$2 sm:$0xff] %v3378_v29  ;;  %2018 = vrot.lane.b32.xlu1 %v2016_v47, %s3800_s27 }
 0x434   : > { %1784 = vst [vmem:[#allocation2 + $0x1c] sm:$0x3] %v1782_v9 }
 0x435   : > { %v1790_v7 = vpop.permute.xlu1 %1789 }
 0x436   : > { %v1791_v8 = vrot.slane %v1790_v7, 4 }
 0x437   : > { %v1809_v11 = vpop.permute.xlu2 %1808 }
 0x438   : > { %v1792_v3 = vsel %vm375_vm5, %v1790_v7, %v1791_v8  ;;  %v1810_v14 = vrot.slane %v1809_v11, 4 }
 0x439   : > { %1794 = vst [vmem:[#allocation2 + $0x1c] sm:$0xc] %v1792_v3 }
 0x43a   : > { %v2026_v48 = vld.sshfl [vmem:[#allocation1] sm:$0xff pattern:$0x75643120]  ;;  %v1811_v20 = vsel %vm396_vm7, %v1809_v11, %v1810_v14 }
 0x43b   : > { %2034 = vst [vmem:[#allocation1] ss:$2 sm:$0xff] %v3378_v29  ;;  %2028 = vrot.lane.b32.xlu0 %v2026_v48, %s3801_s10 }
 0x43c   : > { %1813 = vst [vmem:[#allocation2 + $0x20] sm:$0xc] %v1811_v20 }
 0x440   : > { %v4377_v59 = vpop.xlane.xlu0 %1318 }
 0x442   : > { %v2035_v49 = vld.sshfl [vmem:[#allocation1] sm:$0xff pattern:$0x75643120] }
 0x443   : > { %2044 = vst [vmem:[#allocation1 + $0x1] ss:$2 sm:$0xff] %v3378_v29  ;;  %2037 = vrot.lane.b32.xlu2 %v2035_v49, %s3802_s13 }
 0x445   : > { %v1845_v25 = vpop.permute.xlu2 %1844 }
 0x446   : > { %v1846_v28 = vrot.slane %v1845_v25, 4 }
 0x448   : > { %v1847_v32 = vsel %vm344_vm1, %v1845_v25, %v1846_v28 }
 0x449   : > { %1849 = vst [vmem:[#allocation2 + $0x28] sm:$0xc] %v1847_v32 }
 0x44a   : > { %v2045_v54 = vld.sshfl [vmem:[#allocation1] sm:$0xff pattern:$0x75643120] }
 0x44b   : > { %2047 = vrot.lane.b32.xlu1 %v2045_v54, %s3803_s15  ;;  %2053 = vst [vmem:[#allocation1] ss:$2 sm:$0xff] %v3378_v29 }
 0x44d   : > { %v1826_v16 = vpop.permute.xlu1 %1825 }
 0x44e   : > { %v1827_v43 = vrot.slane %v1826_v16, 4 }
 0x450   : > { %v1828_v22 = vsel %vm323_vm0, %v1826_v16, %v1827_v43 }
 0x451   : > { %1830 = vst [vmem:[#allocation2 + $0x24] sm:$0xc] %v1828_v22 }
 0x452   : > { %v2054_v58 = vld.sshfl [vmem:[#allocation1] sm:$0xff pattern:$0x75643120] }
 0x453   : > { %v1771_v55 = vpop.permute.xlu0 %1770  ;;  %2065 = vst [vmem:[#allocation1 + $0x1] ss:$2 sm:$0xff] %v4382_v53  ;;  %2056 = vrot.lane.b32.xlu1 %v2054_v58, %s3804_s25 }
 0x454   : > { %v1772_v60 = vrot.slane %v1771_v55, 4 }
 0x456   : > { %v1773_v62 = vsel %vm354_vm4, %v1771_v55, %v1772_v60 }
 0x457   : > { %1775 = vst [vmem:[#allocation2 + $0x18] sm:$0xc] %v1773_v62 }
 0x45a   : > { %v2066_v1 = vld.sshfl [vmem:[#allocation1] sm:$0xff pattern:$0x75643120] }
 0x45b   : > { %2069 = vst [vmem:[#allocation1] ss:$2 sm:$0xff] %v4382_v53  ;;  %v1799_v4 = vpop.permute.xlu0 %1798 }
 0x45c   : > { %2068 = vst [vmem:[#allocation2 + $0x10] sm:$0xc] %v2066_v1  ;;  %v1800_v6 = vrot.slane %v1799_v4, 4 }
 0x45d   : > { %v1873_v36 = vpop.permute.xlu2 %1872 }
 0x45e   : > { %v1801_v56 = vsel %vm386_vm6, %v1799_v4, %v1800_v6  ;;  %v1874_v37 = vrot.slane %v1873_v36, 4  ;;  %v3523_v1 = vld [vmem:[#allocation2 + $0x18] sm:$0xff]  ;;  %v3521_v4 = vld [vmem:[#allocation2 + $0x8] sm:$0xff] }
 0x45f   : > { %1803 = vst [vmem:[#allocation2 + $0x20] sm:$0x3] %v1801_v56 }
 0x460   : > { %v1875_v38 = vsel %vm375_vm5, %v1873_v36, %v1874_v37 }
 0x461   : > { %1877 = vst [vmem:[#allocation2 + $0x30] sm:$0x3] %v1875_v38 }
 0x462   : > { %v2070_v10 = vld.sshfl [vmem:[#allocation1] sm:$0xff pattern:$0x75643120] }
 0x463   : > { %2079 = vst [vmem:[#allocation1 + $0x1] ss:$2 sm:$0xff] %v4382_v53  ;;  %2072 = vrot.lane.b32.xlu0 %v2070_v10, %s3797_s23  ;;  %v1835_v12 = vpop.permute.xlu0 %1834  ;;  %v3413_v10 = vld [vmem:[%s3942_s24 + $0x18] sm:$0xf] }
 0x464   : > { %v1836_v15 = vrot.slane %v1835_v12, 4  ;;  %2315 = vst [vmem:[#allocation2] sm:$0x3] %v3413_v10 }
 0x465   : > { %v1854_v30 = vpop.permute.xlu1 %1853 }
 0x466   : > { %v1837_v21 = vsel %vm333_vm3, %v1835_v12, %v1836_v15  ;;  %v1855_v18 = vrot.slane %v1854_v30, 4  ;;  %v3524_v40 = vld [vmem:[#allocation2 + $0x20] sm:$0xff] }
 0x467   : > { %v1639_v13 = vpop.f32.mrf.mxu3  ;;  %1839 = vst [vmem:[#allocation2 + $0x28] sm:$0x3] %v1837_v21 }
 0x468   : > { %1643 = vst [vmem:[%s4124_s28 + $0x18] sm:$0xff] %v1639_v13  ;;  %v1856_v34 = vsel %vm354_vm4, %v1854_v30, %v1855_v18  ;;  %v1644_v23 = vmul.f32 %v4409_v39, %v1639_v13 }
 0x469   : > { %1858 = vst [vmem:[#allocation2 + $0x2c] sm:$0x3] %v1856_v34 }
 0x46a   : > { %v2080_v24 = vld.sshfl [vmem:[#allocation1] sm:$0xff pattern:$0x75643120]  ;;  %2150 = vst [vmem:[#allocation2 + $0x24] sm:$0x3] %v4413_v41  ;;  %v1648_v27 = vmul.f32 %v1644_v23, %v1639_v13 }
 0x46b   : > { %2082 = vrot.lane.b32.xlu2 %v2080_v24, %s3798_s6  ;;  %2088 = vst [vmem:[#allocation1] ss:$2 sm:$0xff] %v4382_v53 }
 0x46d   : > { %v1864_v26 = vpop.permute.xlu0 %1863 }
 0x46e   : > { %v1865_v29 = vrot.slane %v1864_v26, 4 }
 0x46f   : > { %v1641_v31 = vpop.f32.mrf.mxu3 }
 0x470   : > { %v1866_v33 = vsel %vm365_vm2, %v1864_v26, %v1865_v29 }
 0x471   : > { %1868 = vst [vmem:[#allocation2 + $0x2c] sm:$0xc] %v1866_v33 }
 0x472   : > { %v2089_v19 = vld.sshfl [vmem:[#allocation1] sm:$0xff pattern:$0x75643120] }
 0x473   : > { %2091 = vrot.lane.b32.xlu0 %v2089_v19, %s3799_s29  ;;  %2098 = vst [vmem:[#allocation1 + $0x1] ss:$2 sm:$0xff] %v4382_v53  ;;  %v989_v19 = vadd.f32 %v4291_v52, %v4201_v57 }
 0x475   : > { %v1320_v35 = vadd.f32 %v4377_v59, %v989_v19 }
 0x478   : > { %v3525_v58 = vld [vmem:[#allocation2 + $0x28] sm:$0xff] }
 0x47a   : > { %v2099_v42 = vld.sshfl [vmem:[#allocation1] sm:$0xff pattern:$0x75643120] }
 0x47b   : > { %2107 = vst [vmem:[#allocation1] ss:$2 sm:$0xff] %v4382_v53 }
 0x47d   : > { %v1883_v44 = vpop.permute.xlu1 %1882  ;;  %1645 = vadd.xlane.f32.xlu1 %v1644_v23 }
 0x47e   : > { %v1884_v46 = vrot.slane %v1883_v44, 4 }
 0x480   : > { %v1885_v47 = vsel %vm386_vm6, %v1883_v44, %v1884_v46 }
 0x481   : > { %1887 = vst [vmem:[#allocation2 + $0x30] sm:$0xc] %v1885_v47 }
 0x482   : > { %v2108_v48 = vld.sshfl [vmem:[#allocation1] sm:$0xff pattern:$0x75643120] }
 0x483   : > { %2117 = vst [vmem:[#allocation1 + $0x1] ss:$2 sm:$0xff] %v4382_v53 }
 0x485   : > { %v1892_v49 = vpop.permute.xlu0 %1891 }
 0x486   : > { %v1893_v54 = vrot.slane %v1892_v49, 4 }
 0x488   : > { %v1894_v50 = vsel %vm396_vm7, %v1892_v49, %v1893_v54 }
 0x489   : > { %1896 = vst [vmem:[#allocation2 + $0x34] sm:$0x3] %v1894_v50 }
 0x48a   : > { %v2118_v51 = vld.sshfl [vmem:[#allocation1] sm:$0xff pattern:$0x75643120] }
 0x48b   : > { %2126 = vst [vmem:[#allocation1] ss:$2 sm:$0xff] %v4382_v53  ;;  %2120 = vrot.lane.b32.xlu0 %v2118_v51, %s3802_s13 }
 0x48d   : > { %v1991_v59 = vpop.permute.xlu0 %1990 }
 0x490   : > { %v3526_v55 = vld [vmem:[#allocation2 + $0x30] sm:$0xff] }
 0x491   : > { %1962 = vmatpush.bf16.msrb.mxu0 %v3526_v55 }
 0x492   : > { %v2127_v60 = vld.sshfl [vmem:[#allocation1] sm:$0xff pattern:$0x75643120] }
 0x493   : > { %2136 = vst [vmem:[#allocation1 + $0x1] ss:$2 sm:$0xff] %v4382_v53  ;;  %2129 = vrot.lane.b32.xlu0 %v2127_v60, %s3803_s15  ;;  %v3522_v53 = vld [vmem:[#allocation2 + $0x10] sm:$0xff] }
 0x494   : > { %1649 = vadd.xlane.f32.xlu2 %v1648_v27 }
 0x495   : > { %v2000_v61 = vpop.permute.xlu1 %1999  ;;  %1963 = vmatpush.bf16.msrb.mxu0 %v3525_v58 }
 0x496   : > { %v2001_v62 = vrot.slane %v2000_v61, 4  ;;  %2110 = vrot.lane.b32.xlu1 %v2108_v48, %s3801_s10 }
 0x498   : > { %v2002_v0 = vsel %vm333_vm3, %v2000_v61, %v2001_v62 }
 0x499   : > { %2004 = vst [vmem:[#allocation2 + $0x4] sm:$0x3] %v2002_v0  ;;  %1964 = vmatpush.bf16.msrb.mxu0 %v3524_v40  ;;  %v4464_v40 = vld [vmem:[%s3942_s24 + $0x1c] sm:$0xf] }
 0x49a   : > { %v2137_v2 = vld.sshfl [vmem:[#allocation1] sm:$0xff pattern:$0x75643120] }
 0x49b   : > { %2153 = vst [vmem:[#allocation1 + $0x1] ss:$2 sm:$0xff] %v4413_v41  ;;  %2139 = vrot.lane.b32.xlu0 %v2137_v2, %s3804_s25 }
 0x49d   : > { %1965 = vmatpush.bf16.msrb.mxu0 %v3523_v1  ;;  %v2038_v21 = vpop.permute.xlu2 %2037  ;;  %v2010_v49 = vpop.permute.xlu0 %2009 }
 0x49e   : > { %v2039_v22 = vrot.slane %v2038_v21, 4  ;;  %v2011_v54 = vrot.slane %v2010_v49, 4 }
 0x4a0   : > { %v2040_v25 = vsel %vm375_vm5, %v2038_v21, %v2039_v22  ;;  %v2012_v50 = vsel %vm344_vm1, %v2010_v49, %v2011_v54 }
 0x4a1   : > { %1966 = vmatpush.bf16.msrb.mxu0 %v3522_v53  ;;  %2042 = vst [vmem:[#allocation2 + $0xc] sm:$0x3] %v2040_v25 }
 0x4a2   : > { %v2154_v5 = vld.sshfl [vmem:[#allocation1] sm:$0xff pattern:$0x75643120]  ;;  %2014 = vst [vmem:[#allocation2 + $0x4] sm:$0xc] %v2012_v50 }
 0x4a3   : > { %2162 = vst [vmem:[#allocation1] ss:$2 sm:$0xff] %v4413_v41 }
 0x4a5   : > { %v2019_v6 = vpop.permute.xlu1 %2018  ;;  %1967 = vmatpush.bf16.msrb.mxu0 %v3521_v4 }
 0x4a6   : > { %v2020_v7 = vrot.slane %v2019_v6, 4 }
 0x4a8   : > { %v2021_v8 = vsel %vm354_vm4, %v2019_v6, %v2020_v7 }
 0x4a9   : > { %2023 = vst [vmem:[#allocation2 + $0x8] sm:$0x3] %v2021_v8  ;;  %1968 = vmatpush.bf16.msrb.mxu0 %v3520_v63 }
 0x4aa   : > { %v2163_v9 = vld.sshfl [vmem:[#allocation1] sm:$0xff pattern:$0x75643120] }
 0x4ab   : > { %2172 = vst [vmem:[#allocation1 + $0x1] ss:$2 sm:$0xff] %v4413_v41  ;;  %2165 = vrot.lane.b32.xlu0 %v2163_v9, %s3798_s6 }
 0x4ac   : > { %2101 = vrot.lane.b32.xlu2 %v2099_v42, %s3800_s27  ;;  %1969 = vmatmul.bf16.vlgmr.msrb.gmra.mxu0 %v4345_v17 }
 0x4ad   : > { %v2029_v60 = vpop.permute.xlu0 %2028 }
 0x4ae   : > { %v2030_v61 = vrot.slane %v2029_v60, 4 }
 0x4b0   : > { %v2031_v63 = vsel %vm365_vm2, %v2029_v60, %v2030_v61 }
 0x4b1   : > { %2033 = vst [vmem:[#allocation2 + $0x8] sm:$0xc] %v2031_v63 }
 0x4b2   : > { %v2173_v56 = vld.sshfl [vmem:[#allocation1] sm:$0xff pattern:$0x75643120] }
 0x4b3   : > { %2181 = vst [vmem:[#allocation1] ss:$2 sm:$0xff] %v4413_v41 }
 0x4b4   : > { %2156 = vrot.lane.b32.xlu2 %v2154_v5, %s3797_s23 }
 0x4ba   : > { %v2182_v3 = vld.sshfl [vmem:[#allocation1] sm:$0xff pattern:$0x75643120] }
 0x4bb   : > { %2191 = vst [vmem:[#allocation1 + $0x1] ss:$2 sm:$0xff] %v4413_v41  ;;  %2184 = vrot.lane.b32.xlu0 %v2182_v3, %s3800_s27 }
 0x4bc   : > { %2175 = vrot.lane.b32.xlu2 %v2173_v56, %s3799_s29 }
 0x4bd   : > { %v2048_v11 = vpop.permute.xlu1 %2047 }
 0x4be   : > { %v2049_v12 = vrot.slane %v2048_v11, 4 }
 0x4c0   : > { %v2050_v13 = vsel %vm386_vm6, %v2048_v11, %v2049_v12 }
 0x4c1   : > { %2052 = vst [vmem:[#allocation2 + $0xc] sm:$0xc] %v2050_v13 }
 0x4c2   : > { %v2192_v14 = vld.sshfl [vmem:[#allocation1] sm:$0xff pattern:$0x75643120] }
 0x4c3   : > { %2200 = vst [vmem:[#allocation1] ss:$2 sm:$0xff] %v4413_v41  ;;  %2194 = vrot.lane.b32.xlu1 %v2192_v14, %s3801_s10 }
 0x4c5   : > { %v2057_v15 = vpop.permute.xlu1 %2056  ;;  %v2083_v26 = vpop.permute.xlu2 %2082 }
 0x4c6   : > { %v2058_v16 = vrot.slane %v2057_v15, 4  ;;  %v2084_v28 = vrot.slane %v2083_v26, 4 }
 0x4c8   : > { %v2059_v43 = vsel %vm396_vm7, %v2057_v15, %v2058_v16  ;;  %v2085_v30 = vsel %vm333_vm3, %v2083_v26, %v2084_v28  ;;  %v4498_v26 = vld [vmem:[%s3942_s24 + $0x20] sm:$0xf] }
 0x4c9   : > { %2061 = vst [vmem:[#allocation2 + $0x10] sm:$0x3] %v2059_v43 }
 0x4ca   : > { %v2201_v20 = vld.sshfl [vmem:[#allocation1] sm:$0xff pattern:$0x75643120]  ;;  %2087 = vst [vmem:[#allocation2 + $0x14] sm:$0xc] %v2085_v30 }
 0x4cb   : > { %2210 = vst [vmem:[#allocation1 + $0x1] ss:$2 sm:$0xff] %v4413_v41  ;;  %2203 = vrot.lane.b32.xlu0 %v2201_v20, %s3802_s13 }
 0x4d2   : > { %v2211_v24 = vld.sshfl [vmem:[#allocation1] sm:$0xff pattern:$0x75643120] }
 0x4d3   : > { %2219 = vst [vmem:[#allocation1] ss:$2 sm:$0xff] %v4413_v41  ;;  %2213 = vrot.lane.b32.xlu0 %v2211_v24, %s3803_s15  ;;  %v1992_v41 = vrot.slane %v1991_v59, 4 }
 0x4d5   : > { %v1993_v42 = vsel %vm323_vm0, %v1991_v59, %v1992_v41  ;;  %v2073_v4 = vpop.permute.xlu0 %2072 }
 0x4d6   : > { %1995 = vst [vmem:[#allocation2] sm:$0xc] %v1993_v42  ;;  %v2074_v5 = vrot.slane %v2073_v4, 4 }
 0x4d8   : > { %v2075_v6 = vsel %vm323_vm0, %v2073_v4, %v2074_v5 }
 0x4d9   : > { %2077 = vst [vmem:[#allocation2 + $0x14] sm:$0x3] %v2075_v6 }
 0x4da   : > { %v2220_v29 = vld.sshfl [vmem:[#allocation1] sm:$0xff pattern:$0x75643120] }
 0x4db   : > { %2318 = vst [vmem:[#allocation1 + $0x1] ss:$2 sm:$0xff] %v3413_v10  ;;  %2222 = vrot.lane.b32.xlu0 %v2220_v29, %s3804_s25 }
 0x4e2   : > { %v2319_v31 = vld.sshfl [vmem:[#allocation1] sm:$0xff pattern:$0x75643120] }
 0x4e3   : > { %2327 = vst [vmem:[#allocation1] ss:$2 sm:$0xff] %v3413_v10  ;;  %2321 = vrot.lane.b32.xlu0 %v2319_v31, %s3797_s23 }
 0x4e5   : > { %v2092_v8 = vpop.permute.xlu0 %2091 }
 0x4e6   : > { %v2093_v9 = vrot.slane %v2092_v8, 4 }
 0x4ea   : > { %v2328_v18 = vld.sshfl [vmem:[#allocation1] sm:$0xff pattern:$0x75643120] }
 0x4eb   : > { %2330 = vrot.lane.b32.xlu2 %v2328_v18, %s3798_s6  ;;  %2337 = vst [vmem:[#allocation1 + $0x1] ss:$2 sm:$0xff] %v3413_v10 }
 0x4f0   : > { %v4492_v21 = vpop.xlane.xlu1 %1645 }
 0x4f2   : > { %v2338_v32 = vld.sshfl [vmem:[#allocation1] sm:$0xff pattern:$0x75643120] }
 0x4f3   : > { %2346 = vst [vmem:[#allocation1] ss:$2 sm:$0xff] %v3413_v10  ;;  %2340 = vrot.lane.b32.xlu1 %v2338_v32, %s3799_s29 }
 0x4fa   : > { %v2347_v33 = vld.sshfl [vmem:[#allocation1] sm:$0xff pattern:$0x75643120] }
 0x4fb   : > { %2356 = vst [vmem:[#allocation1 + $0x1] ss:$2 sm:$0xff] %v3413_v10  ;;  %2349 = vrot.lane.b32.xlu2 %v2347_v33, %s3800_s27 }
 0x4fd   : > { %v2121_v14 = vpop.permute.xlu0 %2120 }
 0x4fe   : > { %v2122_v15 = vrot.slane %v2121_v14, 4 }
 0x500   : > { %v2123_v16 = vsel %vm375_vm5, %v2121_v14, %v2122_v15 }
 0x501   : > { %2125 = vst [vmem:[#allocation2 + $0x1c] sm:$0xc] %v2123_v16 }
 0x502   : > { %v2357_v34 = vld.sshfl [vmem:[#allocation1] sm:$0xff pattern:$0x75643120] }
 0x503   : > { %2365 = vst [vmem:[#allocation1] ss:$2 sm:$0xff] %v3413_v10  ;;  %2359 = vrot.lane.b32.xlu1 %v2357_v34, %s3801_s10 }
 0x505   : > { %v2130_v22 = vpop.permute.xlu0 %2129 }
 0x506   : > { %v2131_v24 = vrot.slane %v2130_v22, 4 }
 0x507   : > { %v1650_v36 = vpop.xlane.xlu2 %1649 }
 0x508   : > { %v4459_v37 = vadd.f32 %v1650_v36, %v1320_v35  ;;  %v2132_v25 = vsel %vm386_vm6, %v2130_v22, %v2131_v24  ;;  %v2111_v30 = vpop.permute.xlu1 %2110 }
 0x509   : > { %2134 = vst [vmem:[#allocation2 + $0x20] sm:$0x3] %v2132_v25  ;;  %v2112_v18 = vrot.slane %v2111_v30, 4 }
 0x50a   : > { %v2366_v38 = vld.sshfl [vmem:[#allocation1] sm:$0xff pattern:$0x75643120] }
 0x50b   : > { %2375 = vst [vmem:[#allocation1 + $0x1] ss:$2 sm:$0xff] %v3413_v10  ;;  %2368 = vrot.lane.b32.xlu0 %v2366_v38, %s3802_s13  ;;  %v2113_v19 = vsel %vm365_vm2, %v2111_v30, %v2112_v18 }
 0x50c   : > { %2115 = vst [vmem:[#allocation2 + $0x1c] sm:$0x3] %v2113_v19 }
 0x50d   : > { %v2140_v32 = vpop.permute.xlu0 %2139 }
 0x50e   : > { %v2141_v33 = vrot.slane %v2140_v32, 4 }
 0x50f   : > { %v2102_v51 = vpop.permute.xlu2 %2101 }
 0x510   : > { %v2103_v55 = vrot.slane %v2102_v51, 4  ;;  %v2142_v35 = vsel %vm396_vm7, %v2140_v32, %v2141_v33 }
 0x511   : > { %2144 = vst [vmem:[#allocation2 + $0x20] sm:$0xc] %v2142_v35 }
 0x512   : > { %v2376_v23 = vld.sshfl [vmem:[#allocation1] sm:$0xff pattern:$0x75643120]  ;;  %v2104_v58 = vsel %vm354_vm4, %v2102_v51, %v2103_v55 }
 0x513   : > { %2378 = vrot.lane.b32.xlu2 %v2376_v23, %s3803_s15  ;;  %2384 = vst [vmem:[#allocation1] ss:$2 sm:$0xff] %v3413_v10  ;;  %v2094_v10 = vsel %vm344_vm1, %v2092_v8, %v2093_v9 }
 0x514   : > { %2106 = vst [vmem:[#allocation2 + $0x18] sm:$0xc] %v2104_v58 }
 0x515   : > { %2096 = vst [vmem:[#allocation2 + $0x18] sm:$0x3] %v2094_v10 }
 0x517   : > { %v2157_v0 = vpop.permute.xlu2 %2156 }
 0x518   : > { %v2158_v2 = vrot.slane %v2157_v0, 4 }
 0x51a   : > { %v2385_v57 = vld.sshfl [vmem:[#allocation1] sm:$0xff pattern:$0x75643120]  ;;  %v2159_v53 = vsel %vm323_vm0, %v2157_v0, %v2158_v2 }
 0x51b   : > { %2387 = vrot.lane.b32.xlu2 %v2385_v57, %s3804_s25  ;;  %2396 = vst [vmem:[#allocation1 + $0x1] ss:$2 sm:$0xff] %v4464_v40 }
 0x51c   : > { %2161 = vst [vmem:[#allocation2 + $0x24] sm:$0xc] %v2159_v53  ;;  %v3531_v18 = vld [vmem:[#allocation2 + $0x18] sm:$0xff] }
 0x51d   : > { %v2166_v38 = vpop.permute.xlu0 %2165 }
 0x51e   : > { %v2167_v23 = vrot.slane %v2166_v38, 4 }
 0x51f   : > { %v2176_v56 = vpop.permute.xlu2 %2175 }
 0x520   : > { %v2177_v3 = vrot.slane %v2176_v56, 4 }
 0x522   : > { %v2397_v52 = vld.sshfl [vmem:[#allocation1] sm:$0xff pattern:$0x75643120]  ;;  %v2178_v12 = vsel %vm344_vm1, %v2176_v56, %v2177_v3 }
 0x523   : > { %2400 = vst [vmem:[#allocation1] ss:$2 sm:$0xff] %v4464_v40 }
 0x524   : > { %2399 = vst [vmem:[#allocation2 + $0x10] sm:$0xc] %v2397_v52 }
 0x525   : > { %2180 = vst [vmem:[#allocation2 + $0x28] sm:$0xc] %v2178_v12 }
 0x529   : > { %v1970_v44 = vpop.f32.mrf.mxu0 }
 0x52a   : > { %v2401_v46 = vld.sshfl [vmem:[#allocation1] sm:$0xff pattern:$0x75643120]  ;;  %1974 = vst [vmem:[%s4124_s28 + $0x20] sm:$0xff] %v1970_v44  ;;  %v1975_v62 = vmul.f32 %v4409_v39, %v1970_v44 }
 0x52b   : > { %2403 = vrot.lane.b32.xlu1 %v2401_v46, %s3797_s23  ;;  %2410 = vst [vmem:[#allocation1 + $0x1] ss:$2 sm:$0xff] %v4464_v40  ;;  %v4518_v46 = vld [vmem:[%s3942_s24 + $0x1c] sm:$0xf] }
 0x52c   : > { %v1979_v11 = vmul.f32 %v1975_v62, %v1970_v44  ;;  %2646 = vst [vmem:[#allocation2] sm:$0x3] %v4518_v46 }
 0x52d   : > { %v2185_v52 = vpop.permute.xlu0 %2184 }
 0x52e   : > { %v2186_v59 = vrot.slane %v2185_v52, 4 }
 0x530   : > { %v2187_v41 = vsel %vm354_vm4, %v2185_v52, %v2186_v59 }
 0x531   : > { %v1972_v47 = vpop.f32.mrf.mxu0  ;;  %2189 = vst [vmem:[#allocation2 + $0x2c] sm:$0x3] %v2187_v41 }
 0x532   : > { %v2411_v48 = vld.sshfl [vmem:[#allocation1] sm:$0xff pattern:$0x75643120] }
 0x533   : > { %2419 = vst [vmem:[#allocation1] ss:$2 sm:$0xff] %v4464_v40  ;;  %2413 = vrot.lane.b32.xlu0 %v2411_v48, %s3798_s6 }
 0x535   : > { %v2195_v48 = vpop.permute.xlu1 %2194 }
 0x536   : > { %v2196_v2 = vrot.slane %v2195_v48, 4 }
 0x538   : > { %v2197_v5 = vsel %vm365_vm2, %v2195_v48, %v2196_v2 }
 0x539   : > { %2199 = vst [vmem:[#allocation2 + $0x2c] sm:$0xc] %v2197_v5 }
 0x53a   : > { %v2420_v27 = vld.sshfl [vmem:[#allocation1] sm:$0xff pattern:$0x75643120] }
 0x53b   : > { %2429 = vst [vmem:[#allocation1 + $0x1] ss:$2 sm:$0xff] %v4464_v40  ;;  %2422 = vrot.lane.b32.xlu0 %v2420_v27, %s3799_s29 }
 0x53d   : > { %v2204_v47 = vpop.permute.xlu0 %2203 }
 0x53e   : > { %v2205_v58 = vrot.slane %v2204_v47, 4 }
 0x542   : > { %v2430_v1 = vld.sshfl [vmem:[#allocation1] sm:$0xff pattern:$0x75643120] }
 0x543   : > { %2438 = vst [vmem:[#allocation1] ss:$2 sm:$0xff] %v4464_v40 }
 0x544   : > { %1976 = vadd.xlane.f32.xlu2 %v1975_v62  ;;  %v2206_v62 = vsel %vm375_vm5, %v2204_v47, %v2205_v58 }
 0x545   : > { %v4490_v43 = vpop.permute.xlu2 %2330  ;;  %v2214_v54 = vpop.permute.xlu0 %2213  ;;  %2208 = vst [vmem:[#allocation2 + $0x30] sm:$0x3] %v2206_v62 }
 0x546   : > { %v2215_v60 = vrot.slane %v2214_v54, 4  ;;  %v2332_v15 = vrot.slane %v4490_v43, 4 }
 0x548   : > { %v2216_v63 = vsel %vm386_vm6, %v2214_v54, %v2215_v60 }
 0x549   : > { %2218 = vst [vmem:[#allocation2 + $0x30] sm:$0xc] %v2216_v63 }
 0x54a   : > { %v2439_v7 = vld.sshfl [vmem:[#allocation1] sm:$0xff pattern:$0x75643120] }
 0x54b   : > { %2448 = vst [vmem:[#allocation1 + $0x1] ss:$2 sm:$0xff] %v4464_v40 }
 0x54d   : > { %v2223_v55 = vpop.permute.xlu0 %2222 }
 0x54e   : > { %v2224_v61 = vrot.slane %v2223_v55, 4 }
 0x550   : > { %v2225_v0 = vsel %vm396_vm7, %v2223_v55, %v2224_v61 }
 0x551   : > { %2227 = vst [vmem:[#allocation2 + $0x34] sm:$0x3] %v2225_v0 }
 0x552   : > { %v2449_v13 = vld.sshfl [vmem:[#allocation1] sm:$0xff pattern:$0x75643120] }
 0x553   : > { %2451 = vrot.lane.b32.xlu0 %v2449_v13, %s3802_s13  ;;  %2457 = vst [vmem:[#allocation1] ss:$2 sm:$0xff] %v4464_v40 }
 0x555   : > { %1980 = vadd.xlane.f32.xlu1 %v1979_v11  ;;  %v2350_v29 = vpop.permute.xlu2 %2349 }
 0x556   : > { %v2351_v31 = vrot.slane %v2350_v29, 4 }
 0x558   : > { %v2352_v34 = vsel %vm354_vm4, %v2350_v29, %v2351_v31  ;;  %v3534_v3 = vld [vmem:[#allocation2 + $0x30] sm:$0xff]  ;;  %v2333_v31 = vsel %vm333_vm3, %v4490_v43, %v2332_v15 }
 0x559   : > { %2354 = vst [vmem:[#allocation2 + $0x8] sm:$0x3] %v2352_v34  ;;  %v3528_v34 = vld [vmem:[#allocation2] sm:$0xff] }
 0x55a   : > { %v2458_v20 = vld.sshfl [vmem:[#allocation1] sm:$0xff pattern:$0x75643120]  ;;  %2335 = vst [vmem:[#allocation2 + $0x4] sm:$0x3] %v2333_v31 }
 0x55b   : > { %2467 = vst [vmem:[#allocation1 + $0x1] ss:$2 sm:$0xff] %v4464_v40  ;;  %v2168_v40 = vsel %vm333_vm3, %v2166_v38, %v2167_v23  ;;  %v1647_v38 = vadd.f32 %v4492_v21, %v4371_v45 }
 0x55c   : > { %2432 = vrot.lane.b32.xlu2 %v2430_v1, %s3800_s27  ;;  %2170 = vst [vmem:[#allocation2 + $0x28] sm:$0x3] %v2168_v40 }
 0x562   : > { %v2468_v28 = vld.sshfl [vmem:[#allocation1] sm:$0xff pattern:$0x75643120] }
 0x563   : > { %2484 = vst [vmem:[#allocation1 + $0x1] ss:$2 sm:$0xff] %v4498_v26  ;;  %2470 = vrot.lane.b32.xlu0 %v2468_v28, %s3804_s25  ;;  %v3533_v13 = vld [vmem:[#allocation2 + $0x28] sm:$0xff]  ;;  %v2322_v28 = vpop.permute.xlu0 %2321 }
 0x564   : > { %v2323_v30 = vrot.slane %v2322_v28, 4 }
 0x565   : > { %v2341_v51 = vpop.permute.xlu1 %2340 }
 0x566   : > { %v2342_v22 = vrot.slane %v2341_v51, 4 }
 0x568   : > { %v2343_v33 = vsel %vm344_vm1, %v2341_v51, %v2342_v22 }
 0x569   : > { %2345 = vst [vmem:[#allocation2 + $0x4] sm:$0xc] %v2343_v33 }
 0x56a   : > { %v2485_v36 = vld.sshfl [vmem:[#allocation1] sm:$0xff pattern:$0x75643120] }
 0x56b   : > { %2493 = vst [vmem:[#allocation1] ss:$2 sm:$0xff] %v4498_v26  ;;  %2487 = vrot.lane.b32.xlu2 %v2485_v36, %s3797_s23 }
 0x56d   : > { %v2379_v50 = vpop.permute.xlu2 %2378 }
 0x56e   : > { %2441 = vrot.lane.b32.xlu1 %v2439_v7, %s3801_s10  ;;  %v3535_v7 = vld [vmem:[#allocation2 + $0x38] sm:$0xff]  ;;  %v2380_v14 = vrot.slane %v2379_v50, 4 }
 0x56f   : > { %2292 = vmatpush.bf16.msrb.mxu1 %v3535_v7  ;;  %v3449_v7 = vld [vmem:[%s3942_s24 + $0x20] sm:$0xf] }
 0x570   : > { %v2381_v24 = vsel %vm386_vm6, %v2379_v50, %v2380_v14 }
 0x572   : > { %v2494_v57 = vld.sshfl [vmem:[#allocation1] sm:$0xff pattern:$0x75643120] }
 0x573   : > { %2503 = vst [vmem:[#allocation1 + $0x1] ss:$2 sm:$0xff] %v4498_v26  ;;  %2496 = vrot.lane.b32.xlu2 %v2494_v57, %s3798_s6  ;;  %2293 = vmatpush.bf16.msrb.mxu1 %v3534_v3 }
 0x575   : > { %v2360_v1 = vpop.permute.xlu1 %2359  ;;  %v2388_v4 = vpop.permute.xlu2 %2387 }
 0x576   : > { %2460 = vrot.lane.b32.xlu1 %v2458_v20, %s3803_s15  ;;  %v2389_v6 = vrot.slane %v2388_v4, 4  ;;  %v2361_v8 = vrot.slane %v2360_v1, 4  ;;  %v3532_v20 = vld [vmem:[#allocation2 + $0x20] sm:$0xff] }
 0x577   : > { %2294 = vmatpush.bf16.msrb.mxu1 %v3533_v13  ;;  %2481 = vst [vmem:[#allocation2 + $0x24] sm:$0x3] %v4498_v26 }
 0x578   : > { %v2390_v9 = vsel %vm396_vm7, %v2388_v4, %v2389_v6  ;;  %v2362_v56 = vsel %vm365_vm2, %v2360_v1, %v2361_v8 }
 0x579   : > { %2392 = vst [vmem:[#allocation2 + $0x10] sm:$0x3] %v2390_v9 }
 0x57a   : > { %v2504_v42 = vld.sshfl [vmem:[#allocation1] sm:$0xff pattern:$0x75643120]  ;;  %2364 = vst [vmem:[#allocation2 + $0x8] sm:$0xc] %v2362_v56 }
 0x57b   : > { %2512 = vst [vmem:[#allocation1] ss:$2 sm:$0xff] %v4498_v26  ;;  %2295 = vmatpush.bf16.msrb.mxu1 %v3532_v20 }
 0x57d   : > { %v2369_v19 = vpop.permute.xlu0 %2368 }
 0x57e   : > { %2506 = vrot.lane.b32.xlu1 %v2504_v42, %s3799_s29  ;;  %v2370_v36 = vrot.slane %v2369_v19, 4 }
 0x57f   : > { %2296 = vmatpush.bf16.msrb.mxu1 %v3531_v18  ;;  %v3543_v18 = vld [vmem:[#allocation2 + $0x38] sm:$0xff] }
 0x580   : > { %v3530_v25 = vld [vmem:[#allocation2 + $0x10] sm:$0xff]  ;;  %v2371_v43 = vsel %vm375_vm5, %v2369_v19, %v2370_v36  ;;  %2623 = vmatpush.bf16.msrb.mxu2 %v3543_v18 }
 0x581   : > { %v3529_v32 = vld [vmem:[#allocation2 + $0x8] sm:$0xff] }
 0x582   : > { %v2513_v44 = vld.sshfl [vmem:[#allocation1] sm:$0xff pattern:$0x75643120]  ;;  %2383 = vst [vmem:[#allocation2 + $0xc] sm:$0xc] %v2381_v24 }
 0x583   : > { %2515 = vrot.lane.b32.xlu0 %v2513_v44, %s3800_s27  ;;  %2522 = vst [vmem:[#allocation1 + $0x1] ss:$2 sm:$0xff] %v4498_v26  ;;  %2297 = vmatpush.bf16.msrb.mxu1 %v3530_v25 }
 0x584   : > { %2373 = vst [vmem:[#allocation2 + $0xc] sm:$0x3] %v2371_v43  ;;  %v3450_v43 = vld [vmem:[%s3942_s24 + $0x24] sm:$0xf]  ;;  %s289_s24 = scalar_select %p288_p3, %s3784_s21, 1 }
 0x587   : > { %2298 = vmatpush.bf16.msrb.mxu1 %v3529_v32 }
 0x58a   : > { %v2523_v49 = vld.sshfl [vmem:[#allocation1] sm:$0xff pattern:$0x75643120] }
 0x58b   : > { %2531 = vst [vmem:[#allocation1] ss:$2 sm:$0xff] %v4498_v26  ;;  %2525 = vrot.lane.b32.xlu2 %v2523_v49, %s3801_s10  ;;  %2299 = vmatpush.bf16.msrb.mxu1 %v3528_v34 }
 0x58e   : > { %2300 = vmatmul.bf16.vlgmr.msrb.gmra.mxu1 %v4345_v17 }
 0x592   : > { %v2532_v27 = vld.sshfl [vmem:[#allocation1] sm:$0xff pattern:$0x75643120] }
 0x593   : > { %2534 = vrot.lane.b32.xlu0 %v2532_v27, %s3802_s13  ;;  %2541 = vst [vmem:[#allocation1 + $0x1] ss:$2 sm:$0xff] %v4498_v26 }
 0x59a   : > { %v2542_v53 = vld.sshfl [vmem:[#allocation1] sm:$0xff pattern:$0x75643120] }
 0x59b   : > { %2550 = vst [vmem:[#allocation1] ss:$2 sm:$0xff] %v4498_v26  ;;  %2544 = vrot.lane.b32.xlu2 %v2542_v53, %s3803_s15  ;;  %v2324_v26 = vsel %vm323_vm0, %v2322_v28, %v2323_v30 }
 0x59c   : > { %2326 = vst [vmem:[#allocation2] sm:$0xc] %v2324_v26 }
 0x59d   : > { %v2404_v11 = vpop.permute.xlu1 %2403 }
 0x59e   : > { %v2405_v12 = vrot.slane %v2404_v11, 4 }
 0x5a0   : > { %v2406_v16 = vsel %vm323_vm0, %v2404_v11, %v2405_v12 }
 0x5a1   : > { %2408 = vst [vmem:[#allocation2 + $0x14] sm:$0x3] %v2406_v16 }
 0x5a2   : > { %v2551_v10 = vld.sshfl [vmem:[#allocation1] sm:$0xff pattern:$0x75643120] }
 0x5a3   : > { %2649 = vst [vmem:[#allocation1 + $0x1] ss:$2 sm:$0xff] %v4518_v46  ;;  %2553 = vrot.lane.b32.xlu1 %v2551_v10, %s3804_s25 }
 0x5a5   : > { %v2414_v57 = vpop.permute.xlu0 %2413 }
 0x5a6   : > { %v2415_v59 = vrot.slane %v2414_v57, 4 }
 0x5a8   : > { %v2416_v41 = vsel %vm333_vm3, %v2414_v57, %v2415_v59 }
 0x5a9   : > { %2418 = vst [vmem:[#allocation2 + $0x14] sm:$0xc] %v2416_v41 }
 0x5aa   : > { %v4539_v29 = vld.sshfl [vmem:[#allocation1] sm:$0xff pattern:$0x75643120] }
 0x5ab   : > { %2658 = vst [vmem:[#allocation1] ss:$2 sm:$0xff] %v4518_v46 }
 0x5ad   : > { %v2423_v47 = vpop.permute.xlu0 %2422 }
 0x5ae   : > { %v2424_v45 = vrot.slane %v2423_v47, 4 }
 0x5b0   : > { %v2425_v49 = vsel %vm344_vm1, %v2423_v47, %v2424_v45 }
 0x5b1   : > { %2427 = vst [vmem:[#allocation2 + $0x18] sm:$0x3] %v2425_v49 }
 0x5b2   : > { %v4546_v35 = vld.sshfl [vmem:[#allocation1] sm:$0xff pattern:$0x75643120] }
 0x5b3   : > { %2668 = vst [vmem:[#allocation1 + $0x1] ss:$2 sm:$0xff] %v4518_v46 }
 0x5b7   : > { %v1977_v23 = vpop.xlane.xlu2 %1976 }
 0x5b8   : > { %v4552_v40 = vadd.f32 %v1977_v23, %v1647_v38 }
 0x5ba   : > { %v4554_v52 = vld.sshfl [vmem:[#allocation1] sm:$0xff pattern:$0x75643120] }
 0x5bb   : > { %2677 = vst [vmem:[#allocation1] ss:$2 sm:$0xff] %v4518_v46 }
 0x5bf   : > { %v2433_v42 = vpop.permute.xlu2 %2432 }
 0x5c0   : > { %v2434_v44 = vrot.slane %v2433_v42, 4 }
 0x5c2   : > { %v2435_v21 = vsel %vm354_vm4, %v2433_v42, %v2434_v44  ;;  %v4560_v48 = vld.sshfl [vmem:[#allocation1] sm:$0xff pattern:$0x75643120] }
 0x5c3   : > { %2437 = vst [vmem:[#allocation2 + $0x18] sm:$0xc] %v2435_v21 }
 0x5c4   : > { %2687 = vst [vmem:[#allocation1 + $0x1] ss:$2 sm:$0xff] %v4518_v46 }
 0x5c5   : > { %v2452_v17 = vpop.permute.xlu0 %2451 }
 0x5c6   : > { %v2453_v55 = vrot.slane %v2452_v17, 4 }
 0x5c7   : > { %v2488_v54 = vpop.permute.xlu2 %2487 }
 0x5c8   : > { %v1981_v50 = vpop.xlane.xlu1 %1980  ;;  %v2489_v51 = vrot.slane %v2488_v54, 4  ;;  %v2454_v61 = vsel %vm375_vm5, %v2452_v17, %v2453_v55  ;;  %v3536_v17 = vld [vmem:[#allocation2] sm:$0xff]  ;;  %v4602_v55 = vld [vmem:[#allocation6] sm:$0xf] }
 0x5c9   : > { %v4565_v27 = vadd.f32 %v1981_v50, %v4459_v37  ;;  %2456 = vst [vmem:[#allocation2 + $0x1c] sm:$0xc] %v2454_v61  ;;  %v3537_v50 = vld [vmem:[#allocation2 + $0x8] sm:$0xff] }
 0x5ca   : > { %v2490_v58 = vsel %vm323_vm0, %v2488_v54, %v2489_v51 }
 0x5cb   : > { %2492 = vst [vmem:[#allocation2 + $0x24] sm:$0xc] %v2490_v58  ;;  %v4568_v60 = vld.sshfl [vmem:[#allocation1] sm:$0xff pattern:$0x75643120] }
 0x5cc   : > { %2696 = vst [vmem:[#allocation1] ss:$2 sm:$0xff] %v4518_v46 }
 0x5cf   : > { %v2497_v62 = vpop.permute.xlu2 %2496 }
 0x5d0   : > { %v2498_v63 = vrot.slane %v2497_v62, 4 }
 0x5d2   : > { %v2499_v0 = vsel %vm333_vm3, %v2497_v62, %v2498_v63 }
 0x5d3   : > { %2501 = vst [vmem:[#allocation2 + $0x28] sm:$0x3] %v2499_v0  ;;  %v4573_v37 = vld.sshfl [vmem:[#allocation1] sm:$0xff pattern:$0x75643120] }
 0x5d4   : > { %2706 = vst [vmem:[#allocation1 + $0x1] ss:$2 sm:$0xff] %v4518_v46 }
 0x5d5   : > { %v2471_v1 = vpop.permute.xlu0 %2470 }
 0x5d6   : > { %v2472_v2 = vrot.slane %v2471_v1, 4 }
 0x5d8   : > { %v2473_v53 = vsel %vm396_vm7, %v2471_v1, %v2472_v2 }
 0x5d9   : > { %2475 = vst [vmem:[#allocation2 + $0x20] sm:$0xc] %v2473_v53 }
 0x5db   : > { %v4577_v4 = vld.sshfl [vmem:[#allocation1] sm:$0xff pattern:$0x75643120] }
 0x5dc   : > { %2715 = vst [vmem:[#allocation1] ss:$2 sm:$0xff] %v4518_v46 }
 0x5e0   : > { %v2442_v5 = vpop.permute.xlu1 %2441 }
 0x5e1   : > { %v2443_v6 = vrot.slane %v2442_v5, 4 }
 0x5e3   : > { %v2444_v8 = vsel %vm365_vm2, %v2442_v5, %v2443_v6  ;;  %v2716_v9 = vld.sshfl [vmem:[#allocation1] sm:$0xff pattern:$0x75643120] }
 0x5e4   : > { %2446 = vst [vmem:[#allocation2 + $0x1c] sm:$0x3] %v2444_v8  ;;  %2718 = vrot.lane.b32.xlu0 %v2716_v9, %s3804_s25 }
 0x5e5   : > { %v2526_v56 = vpop.permute.xlu2 %2525  ;;  %2727 = vst [vmem:[#allocation1 + $0x1] ss:$2 sm:$0xff] %v3449_v7 }
 0x5e6   : > { %v2527_v3 = vrot.slane %v2526_v56, 4 }
 0x5e8   : > { %v2461_v10 = vpop.permute.xlu1 %2460  ;;  %v2528_v11 = vsel %vm365_vm2, %v2526_v56, %v2527_v3 }
 0x5e9   : > { %v2462_v12 = vrot.slane %v2461_v10, 4  ;;  %2530 = vst [vmem:[#allocation2 + $0x2c] sm:$0xc] %v2528_v11 }
 0x5eb   : > { %v2463_v13 = vsel %vm386_vm6, %v2461_v10, %v2462_v12  ;;  %v3539_v21 = vld [vmem:[#allocation2 + $0x18] sm:$0xff] }
 0x5ec   : > { %2465 = vst [vmem:[#allocation2 + $0x20] sm:$0x3] %v2463_v13  ;;  %v2728_v46 = vld.sshfl [vmem:[#allocation1] sm:$0xff pattern:$0x75643120] }
 0x5ed   : > { %2730 = vst [vmem:[#allocation2 + $0x10] sm:$0xc] %v2728_v46 }
 0x5ee   : > { %2731 = vst [vmem:[#allocation1] ss:$2 sm:$0xff] %v3449_v7 }
 0x5f0   : > { %v2507_v14 = vpop.permute.xlu1 %2506 }
 0x5f1   : > { %v2508_v15 = vrot.slane %v2507_v14, 4 }
 0x5f3   : > { %v2509_v16 = vsel %vm344_vm1, %v2507_v14, %v2508_v15  ;;  %v3540_v36 = vld [vmem:[#allocation2 + $0x20] sm:$0xff] }
 0x5f4   : > { %2511 = vst [vmem:[#allocation2 + $0x28] sm:$0xc] %v2509_v16  ;;  %v3538_v54 = vld [vmem:[#allocation2 + $0x10] sm:$0xff] }
 0x5f5   : > { %v2516_v20 = vpop.permute.xlu0 %2515  ;;  %v2545_v22 = vpop.permute.xlu2 %2544  ;;  %v4586_v24 = vld.sshfl [vmem:[#allocation1] sm:$0xff pattern:$0x75643120]  ;;  %2812 = vst [vmem:[#allocation2 + $0x24] sm:$0x3] %v3450_v43 }
 0x5f6   : > { %v2517_v25 = vrot.slane %v2516_v20, 4  ;;  %v2546_v28 = vrot.slane %v2545_v22, 4  ;;  %2741 = vst [vmem:[#allocation1 + $0x1] ss:$2 sm:$0xff] %v3449_v7 }
 0x5f8   : > { %v2518_v30 = vsel %vm354_vm4, %v2516_v20, %v2517_v25  ;;  %v2547_v31 = vsel %vm386_vm6, %v2545_v22, %v2546_v28 }
 0x5f9   : > { %2520 = vst [vmem:[#allocation2 + $0x2c] sm:$0x3] %v2518_v30 }
 0x5fa   : > { %2549 = vst [vmem:[#allocation2 + $0x30] sm:$0xc] %v2547_v31 }
 0x5fd   : > { %v4590_v32 = vld.sshfl [vmem:[#allocation1] sm:$0xff pattern:$0x75643120] }
 0x5fe   : > { %2750 = vst [vmem:[#allocation1] ss:$2 sm:$0xff] %v3449_v7 }
 0x600   : > { %v3541_v47 = vld [vmem:[#allocation2 + $0x28] sm:$0xff] }
 0x605   : > { %v2535_v33 = vpop.permute.xlu0 %2534  ;;  %v2751_v26 = vld.sshfl [vmem:[#allocation1] sm:$0xff pattern:$0x75643120] }
 0x606   : > { %v2536_v34 = vrot.slane %v2535_v33, 4  ;;  %2753 = vrot.lane.b32.xlu1 %v2751_v26, %s3799_s29  ;;  %2760 = vst [vmem:[#allocation1 + $0x1] ss:$2 sm:$0xff] %v3449_v7 }
 0x608   : > { %v2537_v19 = vsel %vm375_vm5, %v2535_v33, %v2536_v34 }
 0x609   : > { %2539 = vst [vmem:[#allocation2 + $0x30] sm:$0x3] %v2537_v19 }
 0x60b   : > { %v2301_v2 = vpop.f32.mrf.mxu1 }
 0x60c   : > { %2305 = vst [vmem:[%s4124_s28 + $0x28] sm:$0xff] %v2301_v2 }
 0x60d   : > { %v2761_v38 = vld.sshfl [vmem:[#allocation1] sm:$0xff pattern:$0x75643120] }
 0x60e   : > { %2769 = vst [vmem:[#allocation1] ss:$2 sm:$0xff] %v3449_v7  ;;  %2763 = vrot.lane.b32.xlu0 %v2761_v38, %s3800_s27  ;;  %v3551_v38 = vld [vmem:[#allocation2 + $0x38] sm:$0xff] }
 0x60f   : > { %2954 = vmatpush.bf16.msrb.mxu3 %v3551_v38 }
 0x613   : > { %v2303_v5 = vpop.f32.mrf.mxu1 }
 0x615   : > { %v2554_v23 = vpop.permute.xlu1 %2553  ;;  %v2770_v57 = vld.sshfl [vmem:[#allocation1] sm:$0xff pattern:$0x75643120] }
 0x616   : > { %v2555_v59 = vrot.slane %v2554_v23, 4  ;;  %2779 = vst [vmem:[#allocation1 + $0x1] ss:$2 sm:$0xff] %v3449_v7  ;;  %2772 = vrot.lane.b32.xlu2 %v2770_v57, %s3801_s10 }
 0x618   : > { %v2556_v41 = vsel %vm396_vm7, %v2554_v23, %v2555_v59  ;;  %v4647_v23 = vld [vmem:[%s4731_s2] ss:$0 sm:$0xff] }
 0x619   : > { %2558 = vst [vmem:[#allocation2 + $0x34] sm:$0x3] %v2556_v41 }
 0x61d   : > { %v2780_v42 = vld.sshfl [vmem:[#allocation1] sm:$0xff pattern:$0x75643120] }
 0x61e   : > { %2788 = vst [vmem:[#allocation1] ss:$2 sm:$0xff] %v3449_v7  ;;  %2782 = vrot.lane.b32.xlu1 %v2780_v42, %s3802_s13 }
 0x620   : > { %v3542_v44 = vld [vmem:[#allocation2 + $0x30] sm:$0xff] }
 0x621   : > { %2624 = vmatpush.bf16.msrb.mxu2 %v3542_v44 }
 0x625   : > { %v2789_v45 = vld.sshfl [vmem:[#allocation1] sm:$0xff pattern:$0x75643120]  ;;  %2625 = vmatpush.bf16.msrb.mxu2 %v3541_v47 }
 0x626   : > { %2798 = vst [vmem:[#allocation1 + $0x1] ss:$2 sm:$0xff] %v3449_v7  ;;  %2791 = vrot.lane.b32.xlu2 %v2789_v45, %s3803_s15 }
 0x629   : > { %2626 = vmatpush.bf16.msrb.mxu2 %v3540_v36 }
 0x62d   : > { %v2799_v49 = vld.sshfl [vmem:[#allocation1] sm:$0xff pattern:$0x75643120]  ;;  %2627 = vmatpush.bf16.msrb.mxu2 %v3539_v21 }
 0x62e   : > { %2815 = vst [vmem:[#allocation1 + $0x1] ss:$2 sm:$0xff] %v3450_v43  ;;  %2801 = vrot.lane.b32.xlu1 %v2799_v49, %s3804_s25 }
 0x631   : > { %2628 = vmatpush.bf16.msrb.mxu2 %v3538_v54 }
 0x635   : > { %v2816_v51 = vld.sshfl [vmem:[#allocation1] sm:$0xff pattern:$0x75643120]  ;;  %2629 = vmatpush.bf16.msrb.mxu2 %v3537_v50 }
 0x636   : > { %2824 = vst [vmem:[#allocation1] ss:$2 sm:$0xff] %v3450_v43  ;;  %2818 = vrot.lane.b32.xlu0 %v2816_v51, %s3797_s23 }
 0x639   : > { %2630 = vmatpush.bf16.msrb.mxu2 %v3536_v17 }
 0x63c   : > { %2631 = vmatmul.bf16.vlgmr.msrb.gmra.mxu2 %v4602_v55 }
 0x63d   : > { %v2825_v58 = vld.sshfl [vmem:[#allocation1] sm:$0xff pattern:$0x75643120] }
 0x63e   : > { %2834 = vst [vmem:[#allocation1 + $0x1] ss:$2 sm:$0xff] %v3450_v43  ;;  %2827 = vrot.lane.b32.xlu2 %v2825_v58, %s3798_s6 }
 0x645   : > { %v2835_v61 = vld.sshfl [vmem:[#allocation1] sm:$0xff pattern:$0x75643120] }
 0x646   : > { %2843 = vst [vmem:[#allocation1] ss:$2 sm:$0xff] %v3450_v43  ;;  %2837 = vrot.lane.b32.xlu1 %v2835_v61, %s3799_s29 }
 0x64d   : > { %v2844_v62 = vld.sshfl [vmem:[#allocation1] sm:$0xff pattern:$0x75643120] }
 0x64e   : > { %2846 = vrot.lane.b32.xlu0 %v2844_v62, %s3800_s27  ;;  %2853 = vst [vmem:[#allocation1 + $0x1] ss:$2 sm:$0xff] %v3450_v43 }
 0x655   : > { %v2854_v63 = vld.sshfl [vmem:[#allocation1] sm:$0xff pattern:$0x75643120] }
 0x656   : > { %2862 = vst [vmem:[#allocation1] ss:$2 sm:$0xff] %v3450_v43  ;;  %2856 = vrot.lane.b32.xlu2 %v2854_v63, %s3801_s10 }
 0x65d   : > { %v2863_v0 = vld.sshfl [vmem:[#allocation1] sm:$0xff pattern:$0x75643120] }
 0x65e   : > { %2865 = vrot.lane.b32.xlu1 %v2863_v0, %s3802_s13  ;;  %2872 = vst [vmem:[#allocation1 + $0x1] ss:$2 sm:$0xff] %v3450_v43 }
 0x665   : > { %v2873_v1 = vld.sshfl [vmem:[#allocation1] sm:$0xff pattern:$0x75643120] }
 0x666   : > { %2875 = vrot.lane.b32.xlu0 %v2873_v1, %s3803_s15  ;;  %2881 = vst [vmem:[#allocation1] ss:$2 sm:$0xff] %v3450_v43  ;;  %2744 = vrot.lane.b32.xlu1 %v4590_v32, %s3798_s6 }
 0x66d   : > { %v2882_v53 = vld.sshfl [vmem:[#allocation1] sm:$0xff pattern:$0x75643120] }
 0x66e   : > { %2680 = vrot.lane.b32.xlu0 %v4560_v48, %s3800_s27  ;;  %2884 = vrot.lane.b32.xlu2 %v2882_v53, %s3804_s25  ;;  %v2719_v48 = vpop.permute.xlu0 %2718  ;;  %s3552_s25 = sshll.u32 %s3784_s21, 6 }
 0x66f   : > { %2699 = vrot.lane.b32.xlu1 %v4573_v37, %s3802_s13  ;;  %v2720_v7 = vrot.slane %v2719_v48, 4  ;;  %s3005_s11 = scalar_lea.hbm %s4732_s3, %s3552_s25 }
 0x670   : > { %v2773_v6 = vpop.permute.xlu2 %2772  ;;  %s3009_s12 = sshll.u32 %s3005_s11, 4  ;;  %s3010_s12 = int_to_ptr.hbm [resolvable:$true] %s3009_s12 }
 0x671   : > { %v2774_v8 = vrot.slane %v2773_v6, 4  ;;  %s3720_s26 = sshra.s32 %s3010_s12, 4  ;;  %s3721_s26 = int_to_ptr.hbm [resolvable:$true] %s3720_s26 }
 0x672   : > { %p3727_p12 = scmp.lt.s32.totalorder %s3721_s26, %s4732_s3 }
 0x673   : > { %v2775_v56 = vsel %vm365_vm2, %v2773_v6, %v2774_v8 }
 0x674   : > { %2777 = vst [vmem:[#allocation2 + $0x1c] sm:$0x3] %v2775_v56 }
 0x676   : > { %2709 = vrot.lane.b32.xlu0 %v4577_v4, %s3803_s15  ;;  %2734 = vrot.lane.b32.xlu2 %v4586_v24, %s3797_s23  ;;  %v2721_v4 = vsel %vm396_vm7, %v2719_v48, %v2720_v7 }
 0x677   : > { %2661 = vrot.lane.b32.xlu1 %v4546_v35, %s3798_s6  ;;  %2723 = vst [vmem:[#allocation2 + $0x10] sm:$0x3] %v2721_v4  ;;  %s3726_s6 = scalar_lea.hbm %s4732_s3, 128 }
 0x678   : > { %v2754_v37 = vpop.permute.xlu1 %2753 }
 0x679   : > { %v2755_v9 = vrot.slane %v2754_v37, 4 }
 0x67b   : > { %v2756_v3 = vsel %vm344_vm1, %v2754_v37, %v2755_v9 }
 0x67c   : > { %2758 = vst [vmem:[#allocation2 + $0x18] sm:$0x3] %v2756_v3 }
 0x67e   : > { %2671 = vrot.lane.b32.xlu0 %v4554_v52, %s3799_s29  ;;  %2690 = vrot.lane.b32.xlu2 %v4568_v60, %s3801_s10 }
 0x680   : > { %v2764_v35 = vpop.permute.xlu0 %2763  ;;  %v2792_v52 = vpop.permute.xlu2 %2791 }
 0x681   : > { %v2765_v60 = vrot.slane %v2764_v35, 4  ;;  %v2793_v10 = vrot.slane %v2792_v52, 4 }
 0x683   : > { %v2766_v13 = vsel %vm354_vm4, %v2764_v35, %v2765_v60  ;;  %v2794_v46 = vsel %vm386_vm6, %v2792_v52, %v2793_v10 }
 0x684   : > { %2768 = vst [vmem:[#allocation2 + $0x18] sm:$0xc] %v2766_v13 }
 0x685   : > { %2796 = vst [vmem:[#allocation2 + $0x20] sm:$0x3] %v2794_v46 }
 0x686   : > { %2652 = vrot.lane.b32.xlu2 %v4539_v29, %s3797_s23  ;;  %v2306_v29 = vmul.f32 %v4409_v39, %v2301_v2  ;;  %s3202_s23 = sshll.u32 %s289_s24, 3  ;;  %s3722_s24 = scalar_lea.hbm %s3721_s26, 64 }
 0x687   : > { %s4669_s27 = scalar_lea.vmem %s4733_s4, %s3202_s23  ;;  %s4676_s15 = scalar_lea.vmem %s4734_s5, %s3202_s23 }
 0x688   : > { %v2310_v22 = vmul.f32 %v2306_v29, %v2301_v2  ;;  %p3723_p5 = scmp.ne.s32.totalorder %s3721_s26, %s3722_s24  ;;  %p3728_p0 = scmp.lt.s32.totalorder %s3726_s6, %s3722_s24 }
 0x68a   : > { %p3724_p7 = pnand %p3723_p5, %p3889_p8  ;;  %p3729_p1 = por %p3728_p0, %p3727_p12 }
 0x68c   : > { %p3725_p11 = pneg %p3724_p7 }
 0x68e   : > { %p3730_p2 = pnand %p3729_p1, %p3725_p11 }
 0x690   : > { %v2783_v11 = vpop.permute.xlu1 %2782 }
 0x691   : > { %v2784_v12 = vrot.slane %v2783_v11, 4 }
 0x693   : > { %v2785_v14 = vsel %vm375_vm5, %v2783_v11, %v2784_v12 }
 0x694   : > { %2787 = vst [vmem:[#allocation2 + $0x1c] sm:$0xc] %v2785_v14 }
 0x698   : > { %v2828_v15 = vpop.permute.xlu2 %2827 }
 0x699   : > { %v2829_v16 = vrot.slane %v2828_v15, 4 }
 0x69b   : > { %v2830_v20 = vsel %vm333_vm3, %v2828_v15, %v2829_v16 }
 0x69c   : > { %2832 = vst [vmem:[#allocation2 + $0x28] sm:$0x3] %v2830_v20 }
 0x6a0   : > { %v2802_v24 = vpop.permute.xlu1 %2801 }
 0x6a1   : > { %2311 = vadd.xlane.f32.xlu1 %v2310_v22  ;;  %v2803_v25 = vrot.slane %v2802_v24, 4 }
 0x6a3   : > { %v2804_v28 = vsel %vm396_vm7, %v2802_v24, %v2803_v25 }
 0x6a4   : > { %2806 = vst [vmem:[#allocation2 + $0x20] sm:$0xc] %v2804_v28 }
 0x6a8   : > { %v2819_v30 = vpop.permute.xlu0 %2818 }
 0x6a9   : > { %v2820_v31 = vrot.slane %v2819_v30, 4 }
 0x6ab   : > { %v2821_v18 = vsel %vm323_vm0, %v2819_v30, %v2820_v31  ;;  %v3806_v30 = vmov 0.0  }
 0x6ac   : > { %2823 = vst [vmem:[#allocation2 + $0x24] sm:$0xc] %v2821_v18 }
 0x6ad   : > { %302 = vst.msk [vmem:[%s4669_s27] sm:$0xff] %vm301_vm8, %v3806_v30 }
 0x6ae   : > { %303 = vst.msk [vmem:[%s4676_s15] sm:$0xff] %vm301_vm8, %v3806_v30 }
 0x6af   : > { %2307 = vadd.xlane.f32.xlu2 %v2306_v29  ;;  %v3547_v29 = vld [vmem:[#allocation2 + $0x18] sm:$0xff] }
 0x6b0   : > { %v2857_v32 = vpop.permute.xlu2 %2856 }
 0x6b1   : > { %v2858_v39 = vrot.slane %v2857_v32, 4 }
 0x6b3   : > { %v2859_v33 = vsel %vm365_vm2, %v2857_v32, %v2858_v39  ;;  %v3548_v14 = vld [vmem:[#allocation2 + $0x20] sm:$0xff] }
 0x6b4   : > { %2861 = vst [vmem:[#allocation2 + $0x2c] sm:$0xc] %v2859_v33 }
 0x6b8   : > { %v2838_v26 = vpop.permute.xlu1 %2837 }
 0x6b9   : > { %v2839_v34 = vrot.slane %v2838_v26, 4 }
 0x6bb   : > { %v2840_v19 = vsel %vm344_vm1, %v2838_v26, %v2839_v34 }
 0x6bc   : > { %2842 = vst [vmem:[#allocation2 + $0x28] sm:$0xc] %v2840_v19 }
 0x6bf   : > { %v2632_v36 = vpop.f32.mrf.mxu2 }
 0x6c0   : > { %v2847_v43 = vpop.permute.xlu0 %2846  ;;  %2636 = vst [vmem:[%s4124_s28 + $0x30] sm:$0xff] %v2632_v36  ;;  %v2637_v57 = vmul.f32 %v4647_v23, %v2632_v36 }
 0x6c1   : > { %v2848_v59 = vrot.slane %v2847_v43, 4 }
 0x6c2   : > { %v2641_v41 = vmul.f32 %v2637_v57, %v2632_v36  ;;  %2638 = vadd.xlane.f32.xlu0 %v2637_v57 }
 0x6c3   : > { %v2849_v42 = vsel %vm354_vm4, %v2847_v43, %v2848_v59 }
 0x6c4   : > { %2851 = vst [vmem:[#allocation2 + $0x2c] sm:$0x3] %v2849_v42  ;;  %2642 = vadd.xlane.f32.xlu2 %v2641_v41 }
 0x6c7   : > { %v2634_v47 = vpop.f32.mrf.mxu2 }
 0x6c8   : > { %v2885_v44 = vpop.permute.xlu2 %2884 }
 0x6c9   : > { %v2886_v45 = vrot.slane %v2885_v44, 4 }
 0x6cb   : > { %v2887_v21 = vsel %vm396_vm7, %v2885_v44, %v2886_v45  ;;  %v3549_v60 = vld [vmem:[#allocation2 + $0x28] sm:$0xff] }
 0x6cc   : > { %2889 = vst [vmem:[#allocation2 + $0x34] sm:$0x3] %v2887_v21 }
 0x6d0   : > { %v2866_v49 = vpop.permute.xlu1 %2865  ;;  %v2735_v54 = vpop.permute.xlu2 %2734 }
 0x6d1   : > { %v2867_v50 = vrot.slane %v2866_v49, 4  ;;  %v2736_v51 = vrot.slane %v2735_v54, 4 }
 0x6d3   : > { %v2868_v17 = vsel %vm375_vm5, %v2866_v49, %v2867_v50  ;;  %v2737_v58 = vsel %vm323_vm0, %v2735_v54, %v2736_v51 }
 0x6d4   : > { %2870 = vst [vmem:[#allocation2 + $0x30] sm:$0x3] %v2868_v17 }
 0x6d5   : > { %2739 = vst [vmem:[#allocation2 + $0x14] sm:$0x3] %v2737_v58 }
 0x6d8   : > { %v2876_v61 = vpop.permute.xlu0 %2875  ;;  %v2745_v62 = vpop.permute.xlu1 %2744 }
 0x6d9   : > { %v2877_v63 = vrot.slane %v2876_v61, 4  ;;  %v2746_v0 = vrot.slane %v2745_v62, 4  ;;  %v2691_v1 = vpop.permute.xlu2 %2690 }
 0x6da   : > { %v2692_v2 = vrot.slane %v2691_v1, 4 }
 0x6db   : > { %v2878_v53 = vsel %vm386_vm6, %v2876_v61, %v2877_v63  ;;  %v2747_v5 = vsel %vm333_vm3, %v2745_v62, %v2746_v0 }
 0x6dc   : > { %2880 = vst [vmem:[#allocation2 + $0x30] sm:$0xc] %v2878_v53  ;;  %v2693_v48 = vsel %vm365_vm2, %v2691_v1, %v2692_v2 }
 0x6dd   : > { %2749 = vst [vmem:[#allocation2 + $0x14] sm:$0xc] %v2747_v5 }
 0x6de   : > { %2695 = vst [vmem:[#allocation2 + $0x8] sm:$0xc] %v2693_v48 }
 0x6e0   : > { %v2681_v6 = vpop.permute.xlu0 %2680 }
 0x6e1   : > { %v2682_v7 = vrot.slane %v2681_v6, 4  ;;  %v2700_v8 = vpop.permute.xlu1 %2699  ;;  %v2653_v37 = vpop.permute.xlu2 %2652 }
 0x6e2   : > { %v2701_v9 = vrot.slane %v2700_v8, 4  ;;  %v2654_v4 = vrot.slane %v2653_v37, 4 }
 0x6e3   : > { %v2683_v56 = vsel %vm354_vm4, %v2681_v6, %v2682_v7  ;;  %v3550_v3 = vld [vmem:[#allocation2 + $0x30] sm:$0xff] }
 0x6e4   : > { %2685 = vst [vmem:[#allocation2 + $0x8] sm:$0x3] %v2683_v56  ;;  %v2702_v35 = vsel %vm375_vm5, %v2700_v8, %v2701_v9  ;;  %v2655_v52 = vsel %vm323_vm0, %v2653_v37, %v2654_v4  ;;  %2955 = vmatpush.bf16.msrb.mxu3 %v3550_v3  ;;  %v3546_v24 = vld [vmem:[#allocation2 + $0x10] sm:$0xff] }
 0x6e5   : > { %2704 = vst [vmem:[#allocation2 + $0xc] sm:$0x3] %v2702_v35 }
 0x6e6   : > { %2657 = vst [vmem:[#allocation2] sm:$0xc] %v2655_v52 }
 0x6e8   : > { %v2710_v10 = vpop.permute.xlu0 %2709  ;;  %2956 = vmatpush.bf16.msrb.mxu3 %v3549_v60 }
 0x6e9   : > { %v2711_v11 = vrot.slane %v2710_v10, 4  ;;  %v2662_v12 = vpop.permute.xlu1 %2661 }
 0x6ea   : > { %v2663_v13 = vrot.slane %v2662_v12, 4 }
 0x6eb   : > { %v2712_v46 = vsel %vm386_vm6, %v2710_v10, %v2711_v11 }
 0x6ec   : > { %2714 = vst [vmem:[#allocation2 + $0xc] sm:$0xc] %v2712_v46  ;;  %v2664_v15 = vsel %vm333_vm3, %v2662_v12, %v2663_v13  ;;  %2957 = vmatpush.bf16.msrb.mxu3 %v3548_v14 }
 0x6ed   : > { %2666 = vst [vmem:[#allocation2 + $0x4] sm:$0x3] %v2664_v15 }
 0x6f0   : > { %v2672_v16 = vpop.permute.xlu0 %2671  ;;  %2958 = vmatpush.bf16.msrb.mxu3 %v3547_v29 }
 0x6f1   : > { %v2673_v20 = vrot.slane %v2672_v16, 4 }
 0x6f3   : > { %v2674_v22 = vsel %vm344_vm1, %v2672_v16, %v2673_v20  ;;  %v3545_v25 = vld [vmem:[#allocation2 + $0x8] sm:$0xff] }
 0x6f4   : > { %2676 = vst [vmem:[#allocation2 + $0x4] sm:$0xc] %v2674_v22  ;;  %2959 = vmatpush.bf16.msrb.mxu3 %v3546_v24 }
 0x6f8   : > { %2960 = vmatpush.bf16.msrb.mxu3 %v3545_v25 }
 0x6fb   : > { %v3544_v28 = vld [vmem:[#allocation2] sm:$0xff] }
 0x6fc   : > { %2961 = vmatpush.bf16.msrb.mxu3 %v3544_v28 }
 0x6ff   : > { %2962 = vmatmul.bf16.vlgmr.msrb.gmra.mxu3 %v4602_v55 }
 0x782   : > { %v2963_v55 = vpop.f32.mrf.mxu3 }
 0x783   : > { %2967 = vst [vmem:[%s4124_s28 + $0x38] sm:$0xff] %v2963_v55  ;;  %v2968_v31 = vmul.f32 %v4647_v23, %v2963_v55 }
 0x784   : > { %3733 = shalt.err (!%p3730_p2)
}
 0x785   : > { %3562 = dma.vmem_to_hbm [thread:$0]  (%p3889_p8), %s3008_s9, 1024, %s3010_s12, %s2984_s16   ;;  %v2972_v18 = vmul.f32 %v2968_v31, %v2963_v55  ;;  %2969 = vadd.xlane.f32.xlu1 %v2968_v31  ;;  %v2308_v39 = vpop.xlane.xlu2 %2307  ;;  %v2312_v33 = vpop.xlane.xlu1 %2311  ;;  %v2976_v23 = vld [vmem:[%s4669_s27] sm:$0xff] }
 0x786   : > { %v2639_v26 = vpop.xlane.xlu0 %2638  ;;  %v2309_v34 = vadd.f32 %v2308_v39, %v4552_v40  ;;  %v2313_v36 = vadd.f32 %v2312_v33, %v4565_v27  ;;  %v2980_v42 = vld [vmem:[%s4676_s15] sm:$0xff] }
 0x787   : > { %2973 = vadd.xlane.f32.xlu0 %v2972_v18 }
 0x788   : > { %v2640_v43 = vadd.f32 %v2639_v26, %v2309_v34 }
 0x78a   : > { %v2965_v32 = vpop.f32.mrf.mxu3 }
 0x78d   : > { %v2643_v19 = vpop.xlane.xlu2 %2642 }
 0x78e   : > { %v2644_v57 = vadd.f32 %v2643_v19, %v2313_v36 }
 0x7f8   : > { %v2970_v38 = vpop.xlane.xlu1 %2969 }
 0x7f9   : > { %v2971_v59 = vadd.f32 %v2970_v38, %v2640_v43 }
 0x7fa   : > { %v2974_v41 = vpop.xlane.xlu0 %2973 }
 0x7fb   : > { %v2977_v44 = vadd.f32 %v2976_v23, %v2971_v59  ;;  %v2975_v47 = vadd.f32 %v2974_v41, %v2644_v57 }
 0x7fd   : > { %2979 = vst.msk [vmem:[%s4669_s27] sm:$0xff] %vm301_vm8, %v2977_v44  ;;  %v2981_v45 = vadd.f32 %v2980_v42, %v2975_v47 }
 0x7ff   : > { %2982 = vst.msk [vmem:[%s4676_s15] sm:$0xff] %vm301_vm8, %v2981_v45 }
 0x800 PF: > { %s4750_s17 = sld [smem:[#allocation12_spill]]  ;;  %s3027_s28 = sand.u32 1, %s3772_s18  }
 0x801   : > { %p3573_p8 = pnand %p3197_p13, %p3893_p9  ;;  %s3028_s13 = scalar_lea.sflag [#allocation5], %s3027_s28 }
 0x803   : > { %p3574_p4 = pneg %p3573_p8 }
 0x805   : > { %3767 = dma.done.wait (%p3574_p4), %s3028_s13, 1024  }
 0x806   : > { %3769 = vsyncadd (%p3574_p4), %s3028_s13, 4294966272  ;;  %s23_s23 = sadd.s32 1, %s4750_s17   ;;  %s4751_s18 = smov %s3776_s19 }
 0x807   : > { %p20_p6 = scmp.ge.s32.totalorder %s23_s23, 4   ;;  %s4752_s19 = smov %s3780_s20 }
 0x808   : > { %s4753_s20 = smov %s3931_s1  ;;  %s4754_s21 = smov %s3788_s22 }
 0x809   : > { %s4755_s22 = smov %s4757_s14  ;;  %22 = sbr.rel (!%p20_p6) target bundleno = 9 (0x9), region = 223 }
 0x80e   :  { %3048 = vsyncpa [#allocation4], 1 }
 0x80f   :  { %3050 = vsyncpa [#allocation4 + $0x1], 1 }
 0x810   :  { %3051 = vsyncpa [#allocation7], 1 }
 0x811   :  { %3052 = vsyncpa [#allocation5], 1 }
 0x812   :  { %3054 = vsyncpa [#allocation5 + $0x1], 1 }

</bundles_post_ra>
